<compile_context>
chip_gen: v6e
topology: v6e:2x2x1
jax: 0.10.0
libtpu: 0.0.40
codegen_flags: <defaults>
</compile_context>

<pallas_src>
import functools

import numpy as np
import jax
import jax.numpy as jnp
from jax.experimental import pallas as pl
from jax.experimental.pallas import tpu as pltpu

NEG_SLOPE = 0.01   # F.leaky_relu default
BN_EPS = 1e-5      # nn.BatchNorm2d default
KSIZE, STRIDE, PAD = 4, 2, 1


# ------------------------------ Pallas kernel -------------------------------

def _discriminator_kernel(x_ref,
                          rsb1_ref, h1_ref,
                          rsb2_ref, h2_ref,
                          rsb3_ref, h3_ref,
                          g2_ref, b2_ref, g3_ref, b3_ref,
                          wfc_ref, selb_ref, fcb_ref,
                          o_ref, *, bn_counts, bn_channels):
    """Whole Discriminator forward in one kernel; everything stays in VMEM."""

    def lrelu(y):
        return jnp.where(y >= 0, y, NEG_SLOPE * y)

    def conv(x_bf, rsb_ref, h_ref):
        # rows_i = RSB_i @ X  (0/1 row gather, zero padding folded in).  The four
        # kernel-row taps are lane-concatenated and contracted against the pre-stacked
        # weight H_cat in a single MXU dot, so tap accumulation happens along the K
        # dimension inside the MXU instead of as three dependent full-tile VPU adds.
        # (A further option is emitting bf16 directly from the gather dots via
        # preferred_element_type=bfloat16; we keep f32 accumulation + one bf16 cast
        # per layer for portability of the matmul output dtype.)
        rows = [jnp.dot(rsb_ref[i], x_bf, preferred_element_type=jnp.float32)
                for i in range(KSIZE)]
        rows_cat = jnp.concatenate(rows, axis=1).astype(jnp.bfloat16)  # [M, 4*W*Cin]
        return jnp.dot(rows_cat, h_ref[...], preferred_element_type=jnp.float32)

    def channel_tile_mask(n, c):
        # stile[r, q] = 1 iff r % c == q % c, generated in-kernel from iotas
        # (zero HBM bytes).  c is a power of two, so the residue is a bitwise AND.
        r = jax.lax.broadcasted_iota(jnp.int32, (n, n), 0)
        q = jax.lax.broadcasted_iota(jnp.int32, (n, n), 1)
        return jnp.where(((r - q) & (c - 1)) == 0, 1.0, 0.0)           # f32 0/1

    def bn_lrelu(y, g_ref, b_ref, count, c):
        # Training-mode BatchNorm over (B, OH, OW) per channel on the [B*OH, OW*C]
        # layout.  rowsum and sqsum are stacked into one [2, OW*C] matrix (iota/where,
        # no concat) and re-tiled to the lane layout with a SINGLE 0/1 matmul.  Stats
        # stay f32 end to end (the 0/1 mask keeps the f32 multi-pass MXU contraction
        # exact); the normalize / lrelu epilogue is f32 on the VPU.
        n = y.shape[1]
        rowsum = jnp.sum(y, axis=0, keepdims=True)                     # [1, OW*C]
        sqsum = jnp.sum(y * y, axis=0, keepdims=True)                  # [1, OW*C]
        row_ix = jax.lax.broadcasted_iota(jnp.int32, (2, n), 0)
        stats = jnp.where(row_ix == 0, rowsum, sqsum)                  # [2, OW*C]
        stats_t = jnp.dot(stats, channel_tile_mask(n, c),
                          preferred_element_type=jnp.float32) * (1.0 / count)
        mean_t = stats_t[0:1, :]
        msq_t = stats_t[1:2, :]
        var_t = msq_t - mean_t * mean_t                                # biased variance
        yn = (y - mean_t) * jax.lax.rsqrt(var_t + BN_EPS) * g_ref[...] + b_ref[...]
        return lrelu(yn)

    cnt2, cnt3 = bn_counts
    c2, c3 = bn_channels

    x_bf = x_ref[...]                                                  # bf16 [B*32, 32*4]
    a1 = lrelu(conv(x_bf, rsb1_ref, h1_ref)).astype(jnp.bfloat16)      # [B*16, 16*cd]
    a2 = bn_lrelu(conv(a1, rsb2_ref, h2_ref),
                  g2_ref, b2_ref, cnt2, c2)                            # [B*8, 8*2cd] f32
    a3 = bn_lrelu(conv(a2.astype(jnp.bfloat16), rsb3_ref, h3_ref),
                  g3_ref, b3_ref, cnt3, c3)                            # [B*4, 4*4cd] f32
    # fc fused: fc weight is pre-rearranged into a3's layout -> elementwise multiply,
    # per-batch block reduction via a tiny 0/1 selection matmul, lane reduce, bias.
    z = a3 * wfc_ref[...]                                              # [B*4, 4*4cd] f32
    per_b = jnp.dot(selb_ref[...], z, preferred_element_type=jnp.float32)  # [B, 4*4cd]
    o_ref[...] = jnp.sum(per_b, axis=1, keepdims=True) + fcb_ref[...]      # [B, 1]


# ------------------- constant gather / weight-layout builders ----------------
# Pure host-side (numpy); built ONCE per parameter set in prepare_discriminator and
# shipped as ready device arrays (hoisted out of jit per the performance review).

def _row_gather(batch, h_in):
    """RSB_i[b*OH+oh, b*Hin+h] = 1 iff h == stride*oh + i - pad (padding rows -> 0)."""
    oh_n = (h_in + 2 * PAD - KSIZE) // STRIDE + 1
    rsb = np.zeros((KSIZE, batch * oh_n, batch * h_in), np.float32)
    for i in range(KSIZE):
        for b in range(batch):
            for oh in range(oh_n):
                h = STRIDE * oh + i - PAD
                if 0 <= h < h_in:
                    rsb[i, b * oh_n + oh, b * h_in + h] = 1.0
    return rsb


def _col_weight_cat(w_oihw, w_in):
    """H_cat[i*(W*Cin) + w*Cin + c, ow*Cout + o] = W[o, c, i, j], j = w - stride*ow + pad.

    The four kernel-row taps H_0..H_3 are stacked along rows so the kernel can do a
    single fused dot per conv layer (tap accumulation along K in the MXU)."""
    c_out, c_in, kh, kw = w_oihw.shape
    ow_n = (w_in + 2 * PAD - kw) // STRIDE + 1
    place = np.zeros((kw, w_in, ow_n), np.float32)
    for j in range(kw):
        for ow in range(ow_n):
            w = STRIDE * ow + j - PAD
            if 0 <= w < w_in:
                place[j, w, ow] = 1.0
    h = np.einsum('jwv,ocij->iwcvo', place, np.asarray(w_oihw, np.float32))
    return h.reshape(kh * w_in * c_in, ow_n * c_out)


def prepare_discriminator(params, batch, image_size=32):
    """Build all constant kernel operands once (pure host), return device arrays."""
    cd = params["w1"].shape[0]
    s1, s3, s4 = image_size, image_size // 4, image_size // 8
    c3 = 4 * cd
    bf16 = jnp.bfloat16

    w1 = np.asarray(params["w1"], np.float32)            # [cd, 3, 4, 4]
    w1p = np.zeros((cd, 4, KSIZE, KSIZE), np.float32)    # pad Cin 3 -> 4 (lane-dense)
    w1p[:, : w1.shape[1]] = w1

    # fc weight rearranged into a3's [B*4, 4*(4cd)] layout (PyTorch NCHW flatten order).
    wfc = (np.asarray(params["fc_w"], np.float32)
           .reshape(c3, s4, s4).transpose(1, 2, 0).reshape(s4, s4 * c3))

    return {
        "rsb1": jnp.asarray(_row_gather(batch, s1), bf16),
        "rsb2": jnp.asarray(_row_gather(batch, s1 // 2), bf16),
        "rsb3": jnp.asarray(_row_gather(batch, s1 // 4), bf16),
        "h1": jnp.asarray(_col_weight_cat(w1p, s1), bf16),
        "h2": jnp.asarray(_col_weight_cat(np.asarray(params["w2"], np.float32), s1 // 2), bf16),
        "h3": jnp.asarray(_col_weight_cat(np.asarray(params["w3"], np.float32), s1 // 4), bf16),
        "g2": jnp.asarray(np.tile(np.asarray(params["g2"], np.float32), s3)[None, :]),
        "b2": jnp.asarray(np.tile(np.asarray(params["b2"], np.float32), s3)[None, :]),
        "g3": jnp.asarray(np.tile(np.asarray(params["g3"], np.float32), s4)[None, :]),
        "b3": jnp.asarray(np.tile(np.asarray(params["b3"], np.float32), s4)[None, :]),
        "wfc": jnp.asarray(np.tile(wfc, (batch, 1))),
        "selb": jnp.asarray(np.kron(np.eye(batch, dtype=np.float32),
                                    np.ones((1, s4), np.float32))),
        "fcb": jnp.asarray(np.asarray(params["fc_b"], np.float32).reshape(1, 1)),
    }


# --------------------------------- wrapper -----------------------------------

def discriminator_forward(prepped, x_nchw):
    """Jitted forward: tiny input re-layout + one fused pallas_call."""
    b, cin, hh, ww = x_nchw.shape
    assert hh == ww and cin <= 4, "expected square input with <=4 channels"
    s1, s3, s4 = hh, hh // 4, hh // 8
    c2 = prepped["h2"].shape[1] // s3
    c3 = prepped["h3"].shape[1] // s4
    # In-kernel stile generation uses a bitwise residue -> needs power-of-two channel
    # counts (true for DCGAN conv_dims); otherwise ship a host-built bf16 0/1 stile.
    assert (c2 & (c2 - 1)) == 0 and (c3 & (c3 - 1)) == 0

    # Input -> lane-dense [B*H, W*4] bf16 (zero channel pad 3->4; bf16 because it is an
    # MXU operand anyway -- same numerics as the in-kernel cast it replaces).
    x_nhwc = jnp.transpose(x_nchw, (0, 2, 3, 1))
    x_nhwc = jnp.pad(x_nhwc, ((0, 0), (0, 0), (0, 0), (0, 4 - cin)))
    x_mat = x_nhwc.reshape(b * s1, s1 * 4).astype(jnp.bfloat16)

    kernel = functools.partial(
        _discriminator_kernel,
        bn_counts=(b * s3 * s3, b * s4 * s4),
        bn_channels=(c2, c3),
    )
    # Single program (no grid): total operand footprint is ~1.3 MB, far below VMEM on
    # v5e/v6e/v7x.  On v7x this uses one of the two TensorCores; at B=2 cross-core
    # BatchNorm coordination is not worth it -- revisit only if the batch grows.
    return pl.pallas_call(
        kernel,
        out_shape=jax.ShapeDtypeStruct((b, 1), jnp.float32),
        compiler_params=pltpu.CompilerParams(vmem_limit_bytes=32 * 1024 * 1024),
    )(x_mat,
      prepped["rsb1"], prepped["h1"],
      prepped["rsb2"], prepped["h2"],
      prepped["rsb3"], prepped["h3"],
      prepped["g2"], prepped["b2"], prepped["g3"], prepped["b3"],
      prepped["wfc"], prepped["selb"], prepped["fcb"])


# ----------------------- pure-JAX reference (check) --------------------------

def reference_forward(params, x_nchw):
    def conv2d(x, w):
        return jax.lax.conv_general_dilated(
            x, w, window_strides=(STRIDE, STRIDE), padding=[(PAD, PAD), (PAD, PAD)],
            dimension_numbers=("NCHW", "OIHW", "NCHW"),
            precision=jax.lax.Precision.HIGHEST)

    def lrelu(x):
        return jnp.where(x >= 0, x, NEG_SLOPE * x)

    def bn(x, g, b):
        mean = jnp.mean(x, axis=(0, 2, 3), keepdims=True)
        var = jnp.mean(jnp.square(x - mean), axis=(0, 2, 3), keepdims=True)
        return (x - mean) * jax.lax.rsqrt(var + BN_EPS) * g.reshape(1, -1, 1, 1) \
            + b.reshape(1, -1, 1, 1)

    x = lrelu(conv2d(x_nchw, params["w1"]))
    x = lrelu(bn(conv2d(x, params["w2"]), params["g2"], params["b2"]))
    x = lrelu(bn(conv2d(x, params["w3"]), params["g3"], params["b3"]))
    flat = x.reshape(x.shape[0], -1)
    return flat @ params["fc_w"].T + params["fc_b"]


# ----------------------------------- main ------------------------------------

if __name__ == "__main__":
    conv_dim = 16
    B = 2
    key = jax.random.PRNGKey(0)
    ks = jax.random.split(key, 10)

    params = {
        "w1": 0.05 * jax.random.normal(ks[0], (conv_dim, 3, 4, 4), jnp.float32),
        "w2": 0.05 * jax.random.normal(ks[1], (conv_dim * 2, conv_dim, 4, 4), jnp.float32),
        "g2": 1.0 + 0.1 * jax.random.normal(ks[2], (conv_dim * 2,), jnp.float32),
        "b2": 0.1 * jax.random.normal(ks[3], (conv_dim * 2,), jnp.float32),
        "w3": 0.05 * jax.random.normal(ks[4], (conv_dim * 4, conv_dim * 2, 4, 4), jnp.float32),
        "g3": 1.0 + 0.1 * jax.random.normal(ks[5], (conv_dim * 4,), jnp.float32),
        "b3": 0.1 * jax.random.normal(ks[6], (conv_dim * 4,), jnp.float32),
        "fc_w": 0.05 * jax.random.normal(ks[7], (1, conv_dim * 4 * 4 * 4), jnp.float32),
        "fc_b": 0.05 * jax.random.normal(ks[8], (1,), jnp.float32),
    }

    # Input must be 32x32 so three stride-2 convs yield the 4x4 map the fc expects.
    x = jax.random.normal(ks[9], (B, 3, 32, 32), jnp.float32)

    # Constant operands built once per parameter set, outside jit (hoisted relayout).
    prepped = prepare_discriminator(params, batch=B, image_size=32)

    fwd = jax.jit(discriminator_forward)
    out = jax.block_until_ready(fwd(prepped, x))
    ref = jax.block_until_ready(reference_forward(params, x))

    assert out.shape == (B, 1), out.shape
    assert jnp.all(jnp.isfinite(out))
    assert jnp.allclose(out, ref, rtol=2e-2, atol=2e-2), (out, ref)

    print("KERNEL_OK")
</pallas_src>

<mosaic_0001>
module attributes {stable_mosaic.version = 11 : i64} {
  func.func @_discriminator_kernel(%arg0: memref<64x128xbf16, #tpu.memory_space<vmem>>, %arg1: memref<4x32x64xbf16, #tpu.memory_space<vmem>>, %arg2: memref<512x256xbf16, #tpu.memory_space<vmem>>, %arg3: memref<4x16x32xbf16, #tpu.memory_space<vmem>>, %arg4: memref<1024x256xbf16, #tpu.memory_space<vmem>>, %arg5: memref<4x8x16xbf16, #tpu.memory_space<vmem>>, %arg6: memref<1024x256xbf16, #tpu.memory_space<vmem>>, %arg7: memref<1x256xf32, #tpu.memory_space<vmem>>, %arg8: memref<1x256xf32, #tpu.memory_space<vmem>>, %arg9: memref<1x256xf32, #tpu.memory_space<vmem>>, %arg10: memref<1x256xf32, #tpu.memory_space<vmem>>, %arg11: memref<8x256xf32, #tpu.memory_space<vmem>>, %arg12: memref<2x8xf32, #tpu.memory_space<vmem>>, %arg13: memref<1x1xf32, #tpu.memory_space<vmem>>, %arg14: memref<2x1xf32, #tpu.memory_space<vmem>>) attributes {dimension_semantics = [], scalar_prefetch = 0 : i64, scratch_operands = 0 : i64, tpu.core_type = #tpu.core_type<tc>} {
    %c0 = arith.constant 0 : index
    %c0_0 = arith.constant 0 : index
    %0 = vector.load %arg0[%c0, %c0_0] : memref<64x128xbf16, #tpu.memory_space<vmem>>, vector<64x128xbf16>
    %c0_1 = arith.constant 0 : index
    %c0_2 = arith.constant 0 : index
    %c0_3 = arith.constant 0 : index
    %1 = vector.load %arg1[%c0_1, %c0_2, %c0_3] : memref<4x32x64xbf16, #tpu.memory_space<vmem>>, vector<1x32x64xbf16>
    %2 = vector.shape_cast %1 : vector<1x32x64xbf16> to vector<32x64xbf16>
    %cst = arith.constant dense<0.000000e+00> : vector<32x128xf32>
    %3 = tpu.matmul %2, %0, %cst {dimension_numbers = #tpu.dot_dimension_numbers<[1], [0], [0], [1], [0, 0, 1, 1], [], []>} : vector<32x64xbf16>, vector<64x128xbf16>, vector<32x128xf32> -> vector<32x128xf32>
    %c1 = arith.constant 1 : index
    %c0_4 = arith.constant 0 : index
    %c0_5 = arith.constant 0 : index
    %4 = vector.load %arg1[%c1, %c0_4, %c0_5] : memref<4x32x64xbf16, #tpu.memory_space<vmem>>, vector<1x32x64xbf16>
    %5 = vector.shape_cast %4 : vector<1x32x64xbf16> to vector<32x64xbf16>
    %cst_6 = arith.constant dense<0.000000e+00> : vector<32x128xf32>
    %6 = tpu.matmul %5, %0, %cst_6 {dimension_numbers = #tpu.dot_dimension_numbers<[1], [0], [0], [1], [0, 0, 1, 1], [], []>} : vector<32x64xbf16>, vector<64x128xbf16>, vector<32x128xf32> -> vector<32x128xf32>
    %c2 = arith.constant 2 : index
    %c0_7 = arith.constant 0 : index
    %c0_8 = arith.constant 0 : index
    %7 = vector.load %arg1[%c2, %c0_7, %c0_8] : memref<4x32x64xbf16, #tpu.memory_space<vmem>>, vector<1x32x64xbf16>
    %8 = vector.shape_cast %7 : vector<1x32x64xbf16> to vector<32x64xbf16>
    %cst_9 = arith.constant dense<0.000000e+00> : vector<32x128xf32>
    %9 = tpu.matmul %8, %0, %cst_9 {dimension_numbers = #tpu.dot_dimension_numbers<[1], [0], [0], [1], [0, 0, 1, 1], [], []>} : vector<32x64xbf16>, vector<64x128xbf16>, vector<32x128xf32> -> vector<32x128xf32>
    %c3 = arith.constant 3 : index
    %c0_10 = arith.constant 0 : index
    %c0_11 = arith.constant 0 : index
    %10 = vector.load %arg1[%c3, %c0_10, %c0_11] : memref<4x32x64xbf16, #tpu.memory_space<vmem>>, vector<1x32x64xbf16>
    %11 = vector.shape_cast %10 : vector<1x32x64xbf16> to vector<32x64xbf16>
    %cst_12 = arith.constant dense<0.000000e+00> : vector<32x128xf32>
    %12 = tpu.matmul %11, %0, %cst_12 {dimension_numbers = #tpu.dot_dimension_numbers<[1], [0], [0], [1], [0, 0, 1, 1], [], []>} : vector<32x64xbf16>, vector<64x128xbf16>, vector<32x128xf32> -> vector<32x128xf32>
    %13 = tpu.concatenate %3, %6, %9, %12 in 1 : vector<32x128xf32>, vector<32x128xf32>, vector<32x128xf32>, vector<32x128xf32> -> vector<32x512xf32>
    %14 = arith.truncf %13 : vector<32x512xf32> to vector<32x512xbf16>
    %c0_13 = arith.constant 0 : index
    %c0_14 = arith.constant 0 : index
    %15 = vector.load %arg2[%c0_13, %c0_14] : memref<512x256xbf16, #tpu.memory_space<vmem>>, vector<512x256xbf16>
    %cst_15 = arith.constant dense<0.000000e+00> : vector<32x256xf32>
    %16 = tpu.matmul %14, %15, %cst_15 {dimension_numbers = #tpu.dot_dimension_numbers<[1], [0], [0], [1], [0, 0, 1, 1], [], []>} : vector<32x512xbf16>, vector<512x256xbf16>, vector<32x256xf32> -> vector<32x256xf32>
    %cst_16 = arith.constant 0.000000e+00 : f32
    %17 = vector.broadcast %cst_16 : f32 to vector<32x256xf32>
    %18 = arith.cmpf oge, %16, %17 : vector<32x256xf32>
    %cst_17 = arith.constant 0.00999999977 : f32
    %19 = vector.broadcast %cst_17 : f32 to vector<32x256xf32>
    %20 = arith.mulf %19, %16 : vector<32x256xf32>
    %21 = arith.select %18, %16, %20 : vector<32x256xi1>, vector<32x256xf32>
    %22 = arith.truncf %21 : vector<32x256xf32> to vector<32x256xbf16>
    %c0_18 = arith.constant 0 : index
    %c0_19 = arith.constant 0 : index
    %c0_20 = arith.constant 0 : index
    %23 = vector.load %arg3[%c0_18, %c0_19, %c0_20] : memref<4x16x32xbf16, #tpu.memory_space<vmem>>, vector<1x16x32xbf16>
    %24 = vector.shape_cast %23 : vector<1x16x32xbf16> to vector<16x32xbf16>
    %cst_21 = arith.constant dense<0.000000e+00> : vector<16x256xf32>
    %25 = tpu.matmul %24, %22, %cst_21 {dimension_numbers = #tpu.dot_dimension_numbers<[1], [0], [0], [1], [0, 0, 1, 1], [], []>} : vector<16x32xbf16>, vector<32x256xbf16>, vector<16x256xf32> -> vector<16x256xf32>
    %c1_22 = arith.constant 1 : index
    %c0_23 = arith.constant 0 : index
    %c0_24 = arith.constant 0 : index
    %26 = vector.load %arg3[%c1_22, %c0_23, %c0_24] : memref<4x16x32xbf16, #tpu.memory_space<vmem>>, vector<1x16x32xbf16>
    %27 = vector.shape_cast %26 : vector<1x16x32xbf16> to vector<16x32xbf16>
    %cst_25 = arith.constant dense<0.000000e+00> : vector<16x256xf32>
    %28 = tpu.matmul %27, %22, %cst_25 {dimension_numbers = #tpu.dot_dimension_numbers<[1], [0], [0], [1], [0, 0, 1, 1], [], []>} : vector<16x32xbf16>, vector<32x256xbf16>, vector<16x256xf32> -> vector<16x256xf32>
    %c2_26 = arith.constant 2 : index
    %c0_27 = arith.constant 0 : index
    %c0_28 = arith.constant 0 : index
    %29 = vector.load %arg3[%c2_26, %c0_27, %c0_28] : memref<4x16x32xbf16, #tpu.memory_space<vmem>>, vector<1x16x32xbf16>
    %30 = vector.shape_cast %29 : vector<1x16x32xbf16> to vector<16x32xbf16>
    %cst_29 = arith.constant dense<0.000000e+00> : vector<16x256xf32>
    %31 = tpu.matmul %30, %22, %cst_29 {dimension_numbers = #tpu.dot_dimension_numbers<[1], [0], [0], [1], [0, 0, 1, 1], [], []>} : vector<16x32xbf16>, vector<32x256xbf16>, vector<16x256xf32> -> vector<16x256xf32>
    %c3_30 = arith.constant 3 : index
    %c0_31 = arith.constant 0 : index
    %c0_32 = arith.constant 0 : index
    %32 = vector.load %arg3[%c3_30, %c0_31, %c0_32] : memref<4x16x32xbf16, #tpu.memory_space<vmem>>, vector<1x16x32xbf16>
    %33 = vector.shape_cast %32 : vector<1x16x32xbf16> to vector<16x32xbf16>
    %cst_33 = arith.constant dense<0.000000e+00> : vector<16x256xf32>
    %34 = tpu.matmul %33, %22, %cst_33 {dimension_numbers = #tpu.dot_dimension_numbers<[1], [0], [0], [1], [0, 0, 1, 1], [], []>} : vector<16x32xbf16>, vector<32x256xbf16>, vector<16x256xf32> -> vector<16x256xf32>
    %35 = tpu.concatenate %25, %28, %31, %34 in 1 : vector<16x256xf32>, vector<16x256xf32>, vector<16x256xf32>, vector<16x256xf32> -> vector<16x1024xf32>
    %36 = arith.truncf %35 : vector<16x1024xf32> to vector<16x1024xbf16>
    %c0_34 = arith.constant 0 : index
    %c0_35 = arith.constant 0 : index
    %37 = vector.load %arg4[%c0_34, %c0_35] : memref<1024x256xbf16, #tpu.memory_space<vmem>>, vector<1024x256xbf16>
    %cst_36 = arith.constant dense<0.000000e+00> : vector<16x256xf32>
    %38 = tpu.matmul %36, %37, %cst_36 {dimension_numbers = #tpu.dot_dimension_numbers<[1], [0], [0], [1], [0, 0, 1, 1], [], []>} : vector<16x1024xbf16>, vector<1024x256xbf16>, vector<16x256xf32> -> vector<16x256xf32>
    %cst_37 = arith.constant dense<0.000000e+00> : vector<256xf32>
    %39 = vector.multi_reduction <add>, %38, %cst_37 [0] : vector<16x256xf32> to vector<256xf32>
    %40 = vector.shape_cast %39 : vector<256xf32> to vector<1x256xf32>
    %41 = arith.mulf %38, %38 : vector<16x256xf32>
    %cst_38 = arith.constant dense<0.000000e+00> : vector<256xf32>
    %42 = vector.multi_reduction <add>, %41, %cst_38 [0] : vector<16x256xf32> to vector<256xf32>
    %43 = vector.shape_cast %42 : vector<256xf32> to vector<1x256xf32>
    %44 = tpu.iota {dimensions = array<i32: 0>} : vector<2x256xi32>
    %c0_i32 = arith.constant 0 : i32
    %45 = vector.broadcast %c0_i32 : i32 to vector<2x256xi32>
    %46 = arith.cmpi eq, %44, %45 : vector<2x256xi32>
    %47 = vector.shape_cast %40 : vector<1x256xf32> to vector<1x256xf32>
    %48 = vector.broadcast %47 : vector<1x256xf32> to vector<2x256xf32>
    %49 = vector.shape_cast %43 : vector<1x256xf32> to vector<1x256xf32>
    %50 = vector.broadcast %49 : vector<1x256xf32> to vector<2x256xf32>
    %51 = arith.select %46, %48, %50 : vector<2x256xi1>, vector<2x256xf32>
    %52 = tpu.iota {dimensions = array<i32: 0>} : vector<256x256xi32>
    %53 = tpu.iota {dimensions = array<i32: 1>} : vector<256x256xi32>
    %54 = arith.subi %52, %53 : vector<256x256xi32>
    %c31_i32 = arith.constant 31 : i32
    %55 = vector.broadcast %c31_i32 : i32 to vector<256x256xi32>
    %56 = arith.andi %54, %55 : vector<256x256xi32>
    %c0_i32_39 = arith.constant 0 : i32
    %57 = vector.broadcast %c0_i32_39 : i32 to vector<256x256xi32>
    %58 = arith.cmpi eq, %56, %57 : vector<256x256xi32>
    %cst_40 = arith.constant 1.000000e+00 : f32
    %cst_41 = arith.constant 0.000000e+00 : f32
    %59 = vector.broadcast %cst_40 : f32 to vector<256x256xf32>
    %60 = vector.broadcast %cst_41 : f32 to vector<256x256xf32>
    %61 = arith.select %58, %59, %60 : vector<256x256xi1>, vector<256x256xf32>
    %cst_42 = arith.constant dense<0.000000e+00> : vector<2x256xf32>
    %62 = tpu.matmul %51, %61, %cst_42 {dimension_numbers = #tpu.dot_dimension_numbers<[1], [0], [0], [1], [0, 0, 1, 1], [], []>} : vector<2x256xf32>, vector<256x256xf32>, vector<2x256xf32> -> vector<2x256xf32>
    %cst_43 = arith.constant 7.812500e-03 : f32
    %63 = vector.broadcast %cst_43 : f32 to vector<2x256xf32>
    %64 = arith.mulf %62, %63 : vector<2x256xf32>
    %65 = vector.extract_strided_slice %64 {offsets = [0, 0], sizes = [1, 256], strides = [1, 1]} : vector<2x256xf32> to vector<1x256xf32>
    %66 = vector.extract_strided_slice %64 {offsets = [1, 0], sizes = [1, 256], strides = [1, 1]} : vector<2x256xf32> to vector<1x256xf32>
    %67 = arith.mulf %65, %65 : vector<1x256xf32>
    %68 = arith.subf %66, %67 : vector<1x256xf32>
    %69 = vector.broadcast %65 : vector<1x256xf32> to vector<16x256xf32>
    %70 = arith.subf %38, %69 : vector<16x256xf32>
    %cst_44 = arith.constant 9.99999974E-6 : f32
    %71 = vector.broadcast %cst_44 : f32 to vector<1x256xf32>
    %72 = arith.addf %68, %71 : vector<1x256xf32>
    %73 = math.rsqrt %72 : vector<1x256xf32>
    %74 = vector.broadcast %73 : vector<1x256xf32> to vector<16x256xf32>
    %75 = arith.mulf %70, %74 : vector<16x256xf32>
    %c0_45 = arith.constant 0 : index
    %c0_46 = arith.constant 0 : index
    %76 = vector.load %arg7[%c0_45, %c0_46] : memref<1x256xf32, #tpu.memory_space<vmem>>, vector<1x256xf32>
    %77 = vector.broadcast %76 : vector<1x256xf32> to vector<16x256xf32>
    %78 = arith.mulf %75, %77 : vector<16x256xf32>
    %c0_47 = arith.constant 0 : index
    %c0_48 = arith.constant 0 : index
    %79 = vector.load %arg8[%c0_47, %c0_48] : memref<1x256xf32, #tpu.memory_space<vmem>>, vector<1x256xf32>
    %80 = vector.broadcast %79 : vector<1x256xf32> to vector<16x256xf32>
    %81 = arith.addf %78, %80 : vector<16x256xf32>
    %cst_49 = arith.constant 0.000000e+00 : f32
    %82 = vector.broadcast %cst_49 : f32 to vector<16x256xf32>
    %83 = arith.cmpf oge, %81, %82 : vector<16x256xf32>
    %cst_50 = arith.constant 0.00999999977 : f32
    %84 = vector.broadcast %cst_50 : f32 to vector<16x256xf32>
    %85 = arith.mulf %84, %81 : vector<16x256xf32>
    %86 = arith.select %83, %81, %85 : vector<16x256xi1>, vector<16x256xf32>
    %87 = arith.truncf %86 : vector<16x256xf32> to vector<16x256xbf16>
    %c0_51 = arith.constant 0 : index
    %c0_52 = arith.constant 0 : index
    %c0_53 = arith.constant 0 : index
    %88 = vector.load %arg5[%c0_51, %c0_52, %c0_53] : memref<4x8x16xbf16, #tpu.memory_space<vmem>>, vector<1x8x16xbf16>
    %89 = vector.shape_cast %88 : vector<1x8x16xbf16> to vector<8x16xbf16>
    %cst_54 = arith.constant dense<0.000000e+00> : vector<8x256xf32>
    %90 = tpu.matmul %89, %87, %cst_54 {dimension_numbers = #tpu.dot_dimension_numbers<[1], [0], [0], [1], [0, 0, 1, 1], [], []>} : vector<8x16xbf16>, vector<16x256xbf16>, vector<8x256xf32> -> vector<8x256xf32>
    %c1_55 = arith.constant 1 : index
    %c0_56 = arith.constant 0 : index
    %c0_57 = arith.constant 0 : index
    %91 = vector.load %arg5[%c1_55, %c0_56, %c0_57] : memref<4x8x16xbf16, #tpu.memory_space<vmem>>, vector<1x8x16xbf16>
    %92 = vector.shape_cast %91 : vector<1x8x16xbf16> to vector<8x16xbf16>
    %cst_58 = arith.constant dense<0.000000e+00> : vector<8x256xf32>
    %93 = tpu.matmul %92, %87, %cst_58 {dimension_numbers = #tpu.dot_dimension_numbers<[1], [0], [0], [1], [0, 0, 1, 1], [], []>} : vector<8x16xbf16>, vector<16x256xbf16>, vector<8x256xf32> -> vector<8x256xf32>
    %c2_59 = arith.constant 2 : index
    %c0_60 = arith.constant 0 : index
    %c0_61 = arith.constant 0 : index
    %94 = vector.load %arg5[%c2_59, %c0_60, %c0_61] : memref<4x8x16xbf16, #tpu.memory_space<vmem>>, vector<1x8x16xbf16>
    %95 = vector.shape_cast %94 : vector<1x8x16xbf16> to vector<8x16xbf16>
    %cst_62 = arith.constant dense<0.000000e+00> : vector<8x256xf32>
    %96 = tpu.matmul %95, %87, %cst_62 {dimension_numbers = #tpu.dot_dimension_numbers<[1], [0], [0], [1], [0, 0, 1, 1], [], []>} : vector<8x16xbf16>, vector<16x256xbf16>, vector<8x256xf32> -> vector<8x256xf32>
    %c3_63 = arith.constant 3 : index
    %c0_64 = arith.constant 0 : index
    %c0_65 = arith.constant 0 : index
    %97 = vector.load %arg5[%c3_63, %c0_64, %c0_65] : memref<4x8x16xbf16, #tpu.memory_space<vmem>>, vector<1x8x16xbf16>
    %98 = vector.shape_cast %97 : vector<1x8x16xbf16> to vector<8x16xbf16>
    %cst_66 = arith.constant dense<0.000000e+00> : vector<8x256xf32>
    %99 = tpu.matmul %98, %87, %cst_66 {dimension_numbers = #tpu.dot_dimension_numbers<[1], [0], [0], [1], [0, 0, 1, 1], [], []>} : vector<8x16xbf16>, vector<16x256xbf16>, vector<8x256xf32> -> vector<8x256xf32>
    %100 = tpu.concatenate %90, %93, %96, %99 in 1 : vector<8x256xf32>, vector<8x256xf32>, vector<8x256xf32>, vector<8x256xf32> -> vector<8x1024xf32>
    %101 = arith.truncf %100 : vector<8x1024xf32> to vector<8x1024xbf16>
    %c0_67 = arith.constant 0 : index
    %c0_68 = arith.constant 0 : index
    %102 = vector.load %arg6[%c0_67, %c0_68] : memref<1024x256xbf16, #tpu.memory_space<vmem>>, vector<1024x256xbf16>
    %cst_69 = arith.constant dense<0.000000e+00> : vector<8x256xf32>
    %103 = tpu.matmul %101, %102, %cst_69 {dimension_numbers = #tpu.dot_dimension_numbers<[1], [0], [0], [1], [0, 0, 1, 1], [], []>} : vector<8x1024xbf16>, vector<1024x256xbf16>, vector<8x256xf32> -> vector<8x256xf32>
    %cst_70 = arith.constant dense<0.000000e+00> : vector<256xf32>
    %104 = vector.multi_reduction <add>, %103, %cst_70 [0] : vector<8x256xf32> to vector<256xf32>
    %105 = vector.shape_cast %104 : vector<256xf32> to vector<1x256xf32>
    %106 = arith.mulf %103, %103 : vector<8x256xf32>
    %cst_71 = arith.constant dense<0.000000e+00> : vector<256xf32>
    %107 = vector.multi_reduction <add>, %106, %cst_71 [0] : vector<8x256xf32> to vector<256xf32>
    %108 = vector.shape_cast %107 : vector<256xf32> to vector<1x256xf32>
    %109 = tpu.iota {dimensions = array<i32: 0>} : vector<2x256xi32>
    %c0_i32_72 = arith.constant 0 : i32
    %110 = vector.broadcast %c0_i32_72 : i32 to vector<2x256xi32>
    %111 = arith.cmpi eq, %109, %110 : vector<2x256xi32>
    %112 = vector.shape_cast %105 : vector<1x256xf32> to vector<1x256xf32>
    %113 = vector.broadcast %112 : vector<1x256xf32> to vector<2x256xf32>
    %114 = vector.shape_cast %108 : vector<1x256xf32> to vector<1x256xf32>
    %115 = vector.broadcast %114 : vector<1x256xf32> to vector<2x256xf32>
    %116 = arith.select %111, %113, %115 : vector<2x256xi1>, vector<2x256xf32>
    %117 = tpu.iota {dimensions = array<i32: 0>} : vector<256x256xi32>
    %118 = tpu.iota {dimensions = array<i32: 1>} : vector<256x256xi32>
    %119 = arith.subi %117, %118 : vector<256x256xi32>
    %c63_i32 = arith.constant 63 : i32
    %120 = vector.broadcast %c63_i32 : i32 to vector<256x256xi32>
    %121 = arith.andi %119, %120 : vector<256x256xi32>
    %c0_i32_73 = arith.constant 0 : i32
    %122 = vector.broadcast %c0_i32_73 : i32 to vector<256x256xi32>
    %123 = arith.cmpi eq, %121, %122 : vector<256x256xi32>
    %cst_74 = arith.constant 1.000000e+00 : f32
    %cst_75 = arith.constant 0.000000e+00 : f32
    %124 = vector.broadcast %cst_74 : f32 to vector<256x256xf32>
    %125 = vector.broadcast %cst_75 : f32 to vector<256x256xf32>
    %126 = arith.select %123, %124, %125 : vector<256x256xi1>, vector<256x256xf32>
    %cst_76 = arith.constant dense<0.000000e+00> : vector<2x256xf32>
    %127 = tpu.matmul %116, %126, %cst_76 {dimension_numbers = #tpu.dot_dimension_numbers<[1], [0], [0], [1], [0, 0, 1, 1], [], []>} : vector<2x256xf32>, vector<256x256xf32>, vector<2x256xf32> -> vector<2x256xf32>
    %cst_77 = arith.constant 3.125000e-02 : f32
    %128 = vector.broadcast %cst_77 : f32 to vector<2x256xf32>
    %129 = arith.mulf %127, %128 : vector<2x256xf32>
    %130 = vector.extract_strided_slice %129 {offsets = [0, 0], sizes = [1, 256], strides = [1, 1]} : vector<2x256xf32> to vector<1x256xf32>
    %131 = vector.extract_strided_slice %129 {offsets = [1, 0], sizes = [1, 256], strides = [1, 1]} : vector<2x256xf32> to vector<1x256xf32>
    %132 = arith.mulf %130, %130 : vector<1x256xf32>
    %133 = arith.subf %131, %132 : vector<1x256xf32>
    %134 = vector.broadcast %130 : vector<1x256xf32> to vector<8x256xf32>
    %135 = arith.subf %103, %134 : vector<8x256xf32>
    %cst_78 = arith.constant 9.99999974E-6 : f32
    %136 = vector.broadcast %cst_78 : f32 to vector<1x256xf32>
    %137 = arith.addf %133, %136 : vector<1x256xf32>
    %138 = math.rsqrt %137 : vector<1x256xf32>
    %139 = vector.broadcast %138 : vector<1x256xf32> to vector<8x256xf32>
    %140 = arith.mulf %135, %139 : vector<8x256xf32>
    %c0_79 = arith.constant 0 : index
    %c0_80 = arith.constant 0 : index
    %141 = vector.load %arg9[%c0_79, %c0_80] : memref<1x256xf32, #tpu.memory_space<vmem>>, vector<1x256xf32>
    %142 = vector.broadcast %141 : vector<1x256xf32> to vector<8x256xf32>
    %143 = arith.mulf %140, %142 : vector<8x256xf32>
    %c0_81 = arith.constant 0 : index
    %c0_82 = arith.constant 0 : index
    %144 = vector.load %arg10[%c0_81, %c0_82] : memref<1x256xf32, #tpu.memory_space<vmem>>, vector<1x256xf32>
    %145 = vector.broadcast %144 : vector<1x256xf32> to vector<8x256xf32>
    %146 = arith.addf %143, %145 : vector<8x256xf32>
    %cst_83 = arith.constant 0.000000e+00 : f32
    %147 = vector.broadcast %cst_83 : f32 to vector<8x256xf32>
    %148 = arith.cmpf oge, %146, %147 : vector<8x256xf32>
    %cst_84 = arith.constant 0.00999999977 : f32
    %149 = vector.broadcast %cst_84 : f32 to vector<8x256xf32>
    %150 = arith.mulf %149, %146 : vector<8x256xf32>
    %151 = arith.select %148, %146, %150 : vector<8x256xi1>, vector<8x256xf32>
    %c0_85 = arith.constant 0 : index
    %c0_86 = arith.constant 0 : index
    %152 = vector.load %arg11[%c0_85, %c0_86] : memref<8x256xf32, #tpu.memory_space<vmem>>, vector<8x256xf32>
    %153 = arith.mulf %151, %152 : vector<8x256xf32>
    %c0_87 = arith.constant 0 : index
    %c0_88 = arith.constant 0 : index
    %154 = vector.load %arg12[%c0_87, %c0_88] : memref<2x8xf32, #tpu.memory_space<vmem>>, vector<2x8xf32>
    %cst_89 = arith.constant dense<0.000000e+00> : vector<2x256xf32>
    %155 = tpu.matmul %154, %153, %cst_89 {dimension_numbers = #tpu.dot_dimension_numbers<[1], [0], [0], [1], [0, 0, 1, 1], [], []>} : vector<2x8xf32>, vector<8x256xf32>, vector<2x256xf32> -> vector<2x256xf32>
    %cst_90 = arith.constant dense<0.000000e+00> : vector<2xf32>
    %156 = vector.multi_reduction <add>, %155, %cst_90 [1] : vector<2x256xf32> to vector<2xf32>
    %157 = vector.shape_cast %156 : vector<2xf32> to vector<2x1xf32>
    %c0_91 = arith.constant 0 : index
    %c0_92 = arith.constant 0 : index
    %158 = vector.load %arg13[%c0_91, %c0_92] : memref<1x1xf32, #tpu.memory_space<vmem>>, vector<1x1xf32>
    %159 = vector.broadcast %158 : vector<1x1xf32> to vector<2x1xf32>
    %160 = arith.addf %157, %159 : vector<2x1xf32>
    %c0_93 = arith.constant 0 : index
    %c0_94 = arith.constant 0 : index
    %161 = vector.load %arg14[%c0_93, %c0_94] : memref<2x1xf32, #tpu.memory_space<vmem>>, vector<2x1xf32>
    tpu.vector_store %arg14[%c0_93, %c0_94], %160 {strides = array<i32>} : memref<2x1xf32, #tpu.memory_space<vmem>>, vector<2x1xf32>,
    return
  }
}

</mosaic_0001>

<bundles_post_ra>
// kernel: discriminator_forward.1
= control target key start
LH: loop header
LB: loop body
LE: loop exit
PB: predicated region body
PF: predicated region fallthrough
CT: control target
= control target key end

     0   :  { %s6307_s0 = inlined_call_operand.vmem [shape: bf16[64,128], index: 0, kind: input, shape index: {}]   ;;  %s6308_s1 = inlined_call_operand.vmem [shape: bf16[4,32,64], index: 1, kind: input, shape index: {}]   ;;  %s6309_s2 = inlined_call_operand.vmem [shape: bf16[512,256], index: 2, kind: input, shape index: {}]   ;;  %s6310_s3 = inlined_call_operand.vmem [shape: bf16[4,16,32], index: 3, kind: input, shape index: {}]   ;;  %s6311_s4 = inlined_call_operand.hbm [shape: bf16[1024,256], index: 4, kind: input, shape index: {}]   ;;  %s6312_s5 = inlined_call_operand.vmem [shape: bf16[4,8,16], index: 5, kind: input, shape index: {}]   ;;  %s6313_s6 = inlined_call_operand.hbm [shape: bf16[1024,256], index: 6, kind: input, shape index: {}]   ;;  %s6314_s7 = inlined_call_operand.vmem [shape: f32[1,256], index: 7, kind: input, shape index: {}]   ;;  %s6315_s8 = inlined_call_operand.vmem [shape: f32[1,256], index: 8, kind: input, shape index: {}]   ;;  %s6316_s9 = inlined_call_operand.vmem [shape: f32[1,256], index: 9, kind: input, shape index: {}]   ;;  %s6317_s10 = inlined_call_operand.vmem [shape: f32[1,256], index: 10, kind: input, shape index: {}]   ;;  %s6318_s11 = inlined_call_operand.vmem [shape: f32[8,256], index: 11, kind: input, shape index: {}]   ;;  %s6319_s12 = inlined_call_operand.vmem [shape: f32[2,8], index: 12, kind: input, shape index: {}]   ;;  %s6320_s13 = inlined_call_operand.<no memory space> [shape: f32[1,1], index: 13, kind: input, shape index: {}]   ;;  %s6321_s14 = inlined_call_operand.vmem [shape: f32[2,1], index: 14, kind: output, shape index: {}]  }
   0x1   :  { %v19_v0 = vstv %s6320_s13 }
   0x2   :  { %20 = vst [vmem:[#allocation2] sm:$0x1] %v19_v0 }
   0x3   :  { %21 = vsyncpa [#allocation4], 0 }
   0x4   :  { %22 = vsyncpa [#allocation6], 0  ;;  %s5281_s15 = smov [#allocation3]  }
   0x5   :  { %s36_s16 = sshll.u32 %s5281_s15, 4  ;;  %s37_s16 = int_to_ptr.vmem [resolvable:$true] %s36_s16 }
   0x6   :  { %s5245_s17 = scalar_lea.vmem %s37_s16, 16384  ;;  %p5250_p1 = scmp.lt.s32.totalorder %s37_s16, %s37_s16 }
   0x7   :  { %p5246_p0 = scmp.ne.s32.totalorder %s37_s16, %s5245_s17  ;;  %p5251_p2 = scmp.lt.s32.totalorder %s5245_s17, %s5245_s17 }
   0x9   :  { %p5252_p3 = por %p5251_p2, %p5250_p1 }
   0xb   :  { %p5253_p4 = pnand %p5252_p3, %p5246_p0 }
   0xd   :  { %5256 = shalt.err (!%p5253_p4)
}
   0xe   :  { %s5282_s18 = smov 128   ;;  %s5283_s19 = smov 8  }
   0xf   :  { %42 = dma.hbm_to_vmem [thread:$0]  %s6311_s4, 16384, %s37_s16, [#allocation4], %s5282_s18, %s5282_s18, %s5283_s19  }
  0x10   :  { %s5284_s13 = smov [#allocation5]  }
  0x11   :  { %s50_s22 = sshll.u32 %s5284_s13, 4  ;;  %s51_s22 = int_to_ptr.vmem [resolvable:$true] %s50_s22 }
  0x12   :  { %s5265_s23 = scalar_lea.vmem %s51_s22, 16384  ;;  %p5270_p6 = scmp.lt.s32.totalorder %s51_s22, %s51_s22 }
  0x13   :  { %p5266_p5 = scmp.ne.s32.totalorder %s51_s22, %s5265_s23  ;;  %p5271_p7 = scmp.lt.s32.totalorder %s5265_s23, %s5265_s23 }
  0x15   :  { %p5272_p8 = por %p5271_p7, %p5270_p6 }
  0x17   :  { %p5273_p9 = pnand %p5272_p8, %p5266_p5 }
  0x19   :  { %5276 = shalt.err (!%p5273_p9)
}
  0x1a   :  { %56 = dma.hbm_to_vmem [thread:$0]  %s6313_s6, 16384, %s51_s22, [#allocation6], %s5282_s18, %s5282_s18, %s5283_s19  }
  0x1b   :  { %5277 = dma.done.wait [#allocation4], 16384  }
  0x1c   :  { %5278 = vsyncadd [#allocation4], 4294950912 }
  0x1d   :  { %5279 = dma.done.wait [#allocation6], 16384  }
  0x1e   :  { %5280 = vsyncadd [#allocation6], 4294950912  ;;  %v4733_v1 = vld [vmem:[%s6307_s0 + $0x18] sm:$0xff]   ;;  %v5378_v2 = vld [vmem:[%s6307_s0 + $0x10] sm:$0xff]   ;;  %vm124_vm0 = vcmask 523264   ;;  %vm923_vm9 = vcmask 261120  }
  0x1f   :  { %4678 = vmatprep.subr.bf16.mxu0 %v4733_v1  ;;  %4714 = vmatprep.subr.bf16.mxu1 %v4733_v1  ;;  %v5383_v3 = vld [vmem:[%s6307_s0 + $0x8] sm:$0xff]   ;;  %v4737_v4 = vld [vmem:[%s6308_s1] sm:$0xff]   ;;  %v4741_v6 = vld [vmem:[%s6308_s1 + $0x30] sm:$0xff]  }
  0x20   :  { %4679 = vmatpush3.bf16.msra.mxu0 %v4733_v1  ;;  %4715 = vmatpush3.bf16.msra.mxu1 %v4733_v1  ;;  %v5395_v5 = vld [vmem:[%s6307_s0] sm:$0xff]   ;;  %v4738_v7 = vld [vmem:[%s6308_s1 + $0x8] sm:$0xff]   ;;  %v4742_v8 = vld [vmem:[%s6308_s1 + $0x38] sm:$0xff]  }
  0x21   :  { %4680 = vmatprep.subr.bf16.mxu0 %v5378_v2  ;;  %4716 = vmatprep.subr.bf16.mxu1 %v5378_v2  ;;  %v4739_v9 = vld [vmem:[%s6308_s1 + $0x10] sm:$0xff]   ;;  %v4763_v12 = vld [vmem:[%s6309_s2 + $0x160] ss:$8 sps:$4 sm:$0xff]   ;;  %v4765_v13 = vld [vmem:[%s6309_s2 + $0x164] ss:$8 sps:$4 sm:$0xff]  }
  0x22   :  { %4686 = vmatprep.mubr.msk.bf16.mxu0 %vm124_vm0, %v4737_v4  ;;  %4722 = vmatprep.mubr.msk.bf16.mxu1 %vm124_vm0, %v4741_v6  ;;  %v4757_v10 = vld [vmem:[%s6309_s2 + $0x170] ss:$8 sps:$4 sm:$0xff]   ;;  %v4759_v11 = vld [vmem:[%s6309_s2 + $0x174] ss:$8 sps:$4 sm:$0xff]   ;;  %v4777_v16 = vld [vmem:[%s6309_s2 + $0x144] ss:$8 sps:$4 sm:$0xff]  }
  0x23   :  { %v4771_v14 = vld [vmem:[%s6309_s2 + $0x154] ss:$8 sps:$4 sm:$0xff]   ;;  %v4769_v15 = vld [vmem:[%s6309_s2 + $0x150] ss:$8 sps:$4 sm:$0xff]   ;;  %v4775_v17 = vld [vmem:[%s6309_s2 + $0x140] ss:$8 sps:$4 sm:$0xff]  }
  0x24   :  { %4681 = vmatpush3.bf16.msra.mxu0 %v5378_v2  ;;  %4717 = vmatpush3.bf16.msra.mxu1 %v5378_v2  ;;  %v4740_v18 = vld [vmem:[%s6308_s1 + $0x18] sm:$0xff]   ;;  %v4743_v20 = vld [vmem:[%s6308_s1 + $0x20] sm:$0xff]   ;;  %v4744_v25 = vld [vmem:[%s6308_s1 + $0x28] sm:$0xff]  }
  0x25   :  { %4682 = vmatprep.subr.bf16.mxu0 %v5383_v3  ;;  %4718 = vmatprep.subr.bf16.mxu1 %v5383_v3  ;;  %v4783_v19 = vld [vmem:[%s6309_s2 + $0x134] ss:$8 sps:$4 sm:$0xff]   ;;  %v4781_v21 = vld [vmem:[%s6309_s2 + $0x130] ss:$8 sps:$4 sm:$0xff]   ;;  %v4789_v22 = vld [vmem:[%s6309_s2 + $0x124] ss:$8 sps:$4 sm:$0xff]  }
  0x26   :  { %v4787_v23 = vld [vmem:[%s6309_s2 + $0x120] ss:$8 sps:$4 sm:$0xff]   ;;  %v4747_v24 = vld [vmem:[%s6309_s2 + $0x74] ss:$8 sps:$4 sm:$0xff]   ;;  %v4745_v26 = vld [vmem:[%s6309_s2 + $0x70] ss:$8 sps:$4 sm:$0xff]  }
  0x27   :  { %v4750_v27 = vld [vmem:[%s6309_s2 + $0x64] ss:$8 sps:$4 sm:$0xff]   ;;  %v4748_v28 = vld [vmem:[%s6309_s2 + $0x60] ss:$8 sps:$4 sm:$0xff]   ;;  %v4753_v29 = vld [vmem:[%s6309_s2 + $0x54] ss:$8 sps:$4 sm:$0xff]  }
  0x28   :  { %4683 = vmatpush3.bf16.msra.mxu0 %v5383_v3  ;;  %4719 = vmatpush3.bf16.msra.mxu1 %v5383_v3  ;;  %v4751_v30 = vld [vmem:[%s6309_s2 + $0x50] ss:$8 sps:$4 sm:$0xff]   ;;  %v4756_v31 = vld [vmem:[%s6309_s2 + $0x44] ss:$8 sps:$4 sm:$0xff]   ;;  %v4754_v32 = vld [vmem:[%s6309_s2 + $0x40] ss:$8 sps:$4 sm:$0xff]  }
  0x29   :  { %4684 = vmatprep.subr.bf16.mxu0 %v5395_v5  ;;  %4720 = vmatprep.subr.bf16.mxu1 %v5395_v5  ;;  %v4762_v33 = vld [vmem:[%s6309_s2 + $0x34] ss:$8 sps:$4 sm:$0xff]   ;;  %v4760_v34 = vld [vmem:[%s6309_s2 + $0x30] ss:$8 sps:$4 sm:$0xff]   ;;  %v4768_v35 = vld [vmem:[%s6309_s2 + $0x24] ss:$8 sps:$4 sm:$0xff]  }
  0x2a   :  { %v4766_v36 = vld [vmem:[%s6309_s2 + $0x20] ss:$8 sps:$4 sm:$0xff]   ;;  %v4774_v37 = vld [vmem:[%s6309_s2 + $0x14] ss:$8 sps:$4 sm:$0xff]   ;;  %v4772_v38 = vld [vmem:[%s6309_s2 + $0x10] ss:$8 sps:$4 sm:$0xff]  }
  0x2b   :  { %v4780_v39 = vld [vmem:[%s6309_s2 + $0x4] ss:$8 sps:$4 sm:$0xff]   ;;  %v4778_v40 = vld [vmem:[%s6309_s2] ss:$8 sps:$4 sm:$0xff]   ;;  %v4786_v41 = vld [vmem:[%s6309_s2 + $0xf4] ss:$8 sps:$4 sm:$0xff]  }
  0x2c   :  { %4685 = vmatpush3.bf16.msra.mxu0 %v5395_v5  ;;  %4721 = vmatpush3.bf16.msra.mxu1 %v5395_v5  ;;  %v4784_v42 = vld [vmem:[%s6309_s2 + $0xf0] ss:$8 sps:$4 sm:$0xff]   ;;  %v4792_v43 = vld [vmem:[%s6309_s2 + $0xe4] ss:$8 sps:$4 sm:$0xff]   ;;  %v4795_v44 = vld [vmem:[%s6309_s2 + $0x114] ss:$8 sps:$4 sm:$0xff]  }
  0x2d   :  { %4690 = vmatprep.subr.bf16.mxu0 %v4733_v1  ;;  %835 = vmatprep.subr.bf16.mxu1 %v4759_v11  ;;  %v4790_v45 = vld [vmem:[%s6309_s2 + $0xe0] ss:$8 sps:$4 sm:$0xff]   ;;  %v4793_v46 = vld [vmem:[%s6309_s2 + $0x110] ss:$8 sps:$4 sm:$0xff]   ;;  %v4798_v47 = vld [vmem:[%s6309_s2 + $0xd4] ss:$8 sps:$4 sm:$0xff]  }
  0x2e   :  { %v4801_v48 = vld [vmem:[%s6309_s2 + $0x104] ss:$8 sps:$4 sm:$0xff]   ;;  %v4796_v49 = vld [vmem:[%s6309_s2 + $0xd0] ss:$8 sps:$4 sm:$0xff]   ;;  %v4799_v50 = vld [vmem:[%s6309_s2 + $0x100] ss:$8 sps:$4 sm:$0xff]  }
  0x2f   :  { %4687 = vmatmul.mubr.msk.bf16.vlgmr.msra.gmra.mxu0 %vm124_vm0, %v4738_v7  ;;  %4723 = vmatmul.mubr.msk.bf16.vlgmr.msra.gmra.mxu1 %vm124_vm0, %v4742_v8  ;;  %v4804_v51 = vld [vmem:[%s6309_s2 + $0xc4] ss:$8 sps:$4 sm:$0xff]   ;;  %v4805_v52 = vld [vmem:[%s6309_s2 + $0x1f0] ss:$8 sps:$4 sm:$0xff]   ;;  %v4807_v53 = vld [vmem:[%s6309_s2 + $0x1f4] ss:$8 sps:$4 sm:$0xff]  }
  0x30   :  { %4691 = vmatpush3.bf16.msra.mxu0 %v4733_v1  ;;  %4698 = vmatprep.mubr.msk.bf16.mxu0 %vm124_vm0, %v4739_v9  ;;  %v4802_v54 = vld [vmem:[%s6309_s2 + $0xc0] ss:$8 sps:$4 sm:$0xff]   ;;  %v4813_v55 = vld [vmem:[%s6309_s2 + $0x1e4] ss:$8 sps:$4 sm:$0xff]   ;;  %v4810_v56 = vld [vmem:[%s6309_s2 + $0xb4] ss:$8 sps:$4 sm:$0xff]  }
  0x31   :  { %4692 = vmatprep.subr.bf16.mxu0 %v5378_v2  ;;  %836 = vmatpush1.bf16.msra.mxu1 %v4757_v10  ;;  %v4811_v57 = vld [vmem:[%s6309_s2 + $0x1e0] ss:$8 sps:$4 sm:$0xff]   ;;  %v4808_v58 = vld [vmem:[%s6309_s2 + $0xb0] ss:$8 sps:$4 sm:$0xff]   ;;  %v4816_v59 = vld [vmem:[%s6309_s2 + $0xa4] ss:$8 sps:$4 sm:$0xff]  }
  0x32   :  { %837 = vmatprep.subr.bf16.mxu1 %v4765_v13  ;;  %v4819_v60 = vld [vmem:[%s6309_s2 + $0x1d4] ss:$8 sps:$4 sm:$0xff]   ;;  %v4814_v61 = vld [vmem:[%s6309_s2 + $0xa0] ss:$8 sps:$4 sm:$0xff]   ;;  %v4817_v62 = vld [vmem:[%s6309_s2 + $0x1d0] ss:$8 sps:$4 sm:$0xff]  }
  0x33   :  { %v4822_v63 = vld [vmem:[%s6309_s2 + $0x94] ss:$8 sps:$4 sm:$0xff]   ;;  %v4825_v0 = vld [vmem:[%s6309_s2 + $0x1c4] ss:$8 sps:$4 sm:$0xff]   ;;  %v4826_v4 = vld [vmem:[%s6309_s2 + $0x80] ss:$8 sps:$4 sm:$0xff]  }
  0x34   :  { %4693 = vmatpush3.bf16.msra.mxu0 %v5378_v2  ;;  %v4829_v6 = vld [vmem:[%s6309_s2 + $0x1b0] ss:$8 sps:$4 sm:$0xff]   ;;  %v4832_v7 = vld [vmem:[%s6309_s2 + $0x1a0] ss:$8 sps:$4 sm:$0xff]   ;;  %v4834_v8 = vld [vmem:[%s6309_s2 + $0x1a4] ss:$8 sps:$4 sm:$0xff]  }
  0x35   :  { %4694 = vmatprep.subr.bf16.mxu0 %v5383_v3  ;;  %838 = vmatpush1.bf16.msra.mxu1 %v4763_v12  ;;  %v4837_v9 = vld [vmem:[%s6309_s2 + $0x194] ss:$8 sps:$4 sm:$0xff]   ;;  %v4835_v10 = vld [vmem:[%s6309_s2 + $0x190] ss:$8 sps:$4 sm:$0xff]   ;;  %v4840_v11 = vld [vmem:[%s6309_s2 + $0x184] ss:$8 sps:$4 sm:$0xff]  }
  0x36   :  { %839 = vmatprep.subr.bf16.mxu1 %v4771_v14  ;;  %v4838_v12 = vld [vmem:[%s6309_s2 + $0x180] ss:$8 sps:$4 sm:$0xff]  }
  0x38   :  { %4695 = vmatpush3.bf16.msra.mxu0 %v5383_v3 }
  0x39   :  { %4696 = vmatprep.subr.bf16.mxu0 %v5395_v5  ;;  %840 = vmatpush1.bf16.msra.mxu1 %v4769_v15 }
  0x3a   :  { %841 = vmatprep.subr.bf16.mxu1 %v4777_v16 }
  0x3c   :  { %4697 = vmatpush3.bf16.msra.mxu0 %v5395_v5 }
  0x3d   :  { %4702 = vmatprep.subr.bf16.mxu0 %v4733_v1  ;;  %842 = vmatpush1.bf16.msra.mxu1 %v4775_v17 }
  0x3e   :  { %843 = vmatprep.subr.bf16.mxu1 %v4783_v19 }
  0x3f   :  { %4699 = vmatmul.mubr.msk.bf16.vlgmr.msra.gmra.mxu0 %vm124_vm0, %v4740_v18 }
  0x40   :  { %4703 = vmatpush3.bf16.msra.mxu0 %v4733_v1  ;;  %4710 = vmatprep.mubr.msk.bf16.mxu0 %vm124_vm0, %v4743_v20  ;;  %v4820_v1 = vld [vmem:[%s6309_s2 + $0x90] ss:$8 sps:$4 sm:$0xff]  }
  0x41   :  { %4704 = vmatprep.subr.bf16.mxu0 %v5378_v2  ;;  %844 = vmatpush1.bf16.msra.mxu1 %v4781_v21 }
  0x42   :  { %845 = vmatprep.subr.bf16.mxu1 %v4789_v22 }
  0x44   :  { %4705 = vmatpush3.bf16.msra.mxu0 %v5378_v2  ;;  %v4823_v2 = vld [vmem:[%s6309_s2 + $0x1c0] ss:$8 sps:$4 sm:$0xff]  }
  0x45   :  { %4706 = vmatprep.subr.bf16.mxu0 %v5383_v3  ;;  %846 = vmatpush1.bf16.msra.mxu1 %v4787_v23 }
  0x46   :  { %847 = vmatprep.subr.bf16.mxu1 %v4795_v44 }
  0x48   :  { %4707 = vmatpush3.bf16.msra.mxu0 %v5383_v3  ;;  %v4828_v3 = vld [vmem:[%s6309_s2 + $0x84] ss:$8 sps:$4 sm:$0xff]  }
  0x49   :  { %4708 = vmatprep.subr.bf16.mxu0 %v5395_v5  ;;  %848 = vmatpush1.bf16.msra.mxu1 %v4793_v46 }
  0x4a   :  { %849 = vmatprep.subr.bf16.mxu1 %v4801_v48 }
  0x4c   :  { %4709 = vmatpush3.bf16.msra.mxu0 %v5395_v5  ;;  %v4831_v5 = vld [vmem:[%s6309_s2 + $0x1b4] ss:$8 sps:$4 sm:$0xff]  }
  0x4d   :  { %782 = vmatprep.subr.bf16.mxu0 %v4747_v24  ;;  %850 = vmatpush1.bf16.msra.mxu1 %v4799_v50 }
  0x4e   :  { %851 = vmatprep.subr.bf16.mxu1 %v4807_v53 }
  0x4f   :  { %4711 = vmatmul.mubr.msk.bf16.vlgmr.msra.gmra.mxu0 %vm124_vm0, %v4744_v25 }
  0x50   :  { %783 = vmatpush1.bf16.msra.mxu0 %v4745_v26 }
  0x51   :  { %784 = vmatprep.subr.bf16.mxu0 %v4750_v27  ;;  %852 = vmatpush2.bf16.msra.mxu1 %v4805_v52 }
  0x52   :  { %853 = vmatprep.subr.bf16.mxu1 %v4813_v55 }
  0x54   :  { %785 = vmatpush1.bf16.msra.mxu0 %v4748_v28 }
  0x55   :  { %786 = vmatprep.subr.bf16.mxu0 %v4753_v29  ;;  %854 = vmatpush2.bf16.msra.mxu1 %v4811_v57 }
  0x56   :  { %855 = vmatprep.subr.bf16.mxu1 %v4819_v60 }
  0x58   :  { %787 = vmatpush1.bf16.msra.mxu0 %v4751_v30 }
  0x59   :  { %788 = vmatprep.subr.bf16.mxu0 %v4756_v31  ;;  %856 = vmatpush2.bf16.msra.mxu1 %v4817_v62 }
  0x5a   :  { %857 = vmatprep.subr.bf16.mxu1 %v4825_v0 }
  0x5c   :  { %789 = vmatpush1.bf16.msra.mxu0 %v4754_v32 }
  0x5d   :  { %790 = vmatprep.subr.bf16.mxu0 %v4762_v33  ;;  %858 = vmatpush2.bf16.msra.mxu1 %v4823_v2 }
  0x5e   :  { %859 = vmatprep.subr.bf16.mxu1 %v4831_v5 }
  0x60   :  { %791 = vmatpush1.bf16.msra.mxu0 %v4760_v34 }
  0x61   :  { %792 = vmatprep.subr.bf16.mxu0 %v4768_v35  ;;  %860 = vmatpush2.bf16.msra.mxu1 %v4829_v6 }
  0x62   :  { %861 = vmatprep.subr.bf16.mxu1 %v4834_v8 }
  0x64   :  { %793 = vmatpush1.bf16.msra.mxu0 %v4766_v36 }
  0x65   :  { %794 = vmatprep.subr.bf16.mxu0 %v4774_v37  ;;  %862 = vmatpush2.bf16.msra.mxu1 %v4832_v7  ;;  %v6322_v37 = vmov 0  }
  0x66   :  { %863 = vmatprep.subr.bf16.mxu1 %v4837_v9 }
  0x68   :  { %795 = vmatpush1.bf16.msra.mxu0 %v4772_v38 }
  0x69   :  { %796 = vmatprep.subr.bf16.mxu0 %v4780_v39  ;;  %864 = vmatpush2.bf16.msra.mxu1 %v4835_v10 }
  0x6a   :  { %865 = vmatprep.subr.bf16.mxu1 %v4840_v11 }
  0x6c   :  { %797 = vmatpush1.bf16.msra.mxu0 %v4778_v40 }
  0x6d   :  { %798 = vmatprep.subr.bf16.mxu0 %v4786_v41  ;;  %866 = vmatpush2.bf16.msra.mxu1 %v4838_v12 }
  0x70   :  { %799 = vmatpush2.bf16.msra.mxu0 %v4784_v42 }
  0x71   :  { %800 = vmatprep.subr.bf16.mxu0 %v4792_v43 }
  0x74   :  { %801 = vmatpush2.bf16.msra.mxu0 %v4790_v45 }
  0x75   :  { %802 = vmatprep.subr.bf16.mxu0 %v4798_v47 }
  0x78   :  { %803 = vmatpush2.bf16.msra.mxu0 %v4796_v49 }
  0x79   :  { %804 = vmatprep.subr.bf16.mxu0 %v4804_v51 }
  0x7c   :  { %805 = vmatpush2.bf16.msra.mxu0 %v4802_v54 }
  0x7d   :  { %806 = vmatprep.subr.bf16.mxu0 %v4810_v56 }
  0x80   :  { %807 = vmatpush2.bf16.msra.mxu0 %v4808_v58 }
  0x81   :  { %808 = vmatprep.subr.bf16.mxu0 %v4816_v59 }
  0x84   :  { %809 = vmatpush2.bf16.msra.mxu0 %v4814_v61 }
  0x85   :  { %810 = vmatprep.subr.bf16.mxu0 %v4822_v63 }
  0x88   :  { %811 = vmatpush2.bf16.msra.mxu0 %v4820_v1 }
  0x89   :  { %812 = vmatprep.subr.bf16.mxu0 %v4828_v3 }
  0x8c   :  { %813 = vmatpush2.bf16.msra.mxu0 %v4826_v4 }
  0xef   :  { %v4724_v13 = vpop.f32.mrf.mxu1  ;;  %v4688_v14 = vpop.f32.mrf.mxu0 }
  0xf1   :  { %v375_v15 = vpop.f32.mrf.mxu1  ;;  %v165_v17 = vpop.f32.mrf.mxu0 }
  0xf3   :  { %v4725_v16 = vpop.f32.mrf.mxu1  ;;  %v4689_v20 = vpop.f32.mrf.mxu0 }
  0xf4   :  { %v394_v29 = vpack.c.bf16 %v4689_v20, %v4688_v14  ;;  %v397_v35 = vpack.c.bf16 %v4725_v16, %v4724_v13  ;;  %v4847_v20 = vld [vmem:[#allocation3 + $0x74] ss:$8 sps:$4 sm:$0xff]  }
  0xf5   :  { %v378_v18 = vpop.f32.mrf.mxu1  ;;  %v168_v21 = vpop.f32.mrf.mxu0 }
  0xf6   :  { %v393_v19 = vpack.c.bf16 %v378_v18, %v375_v15  ;;  %v390_v27 = vpack.c.bf16 %v168_v21, %v165_v17  ;;  %v4841_v18 = vld [vmem:[%s6310_s3] sm:$0xff]  }
  0xf7   :  { %v4850_v21 = vld [vmem:[#allocation3 + $0x174] ss:$8 sps:$4 sm:$0xff]  }
  0xf8   :  { %867 = vmatprep.mubr.bf16.mxu1 %v393_v19  ;;  %v4842_v19 = vld [vmem:[%s6310_s3 + $0x8] sm:$0xff]  }
  0xff   :  { %v4700_v22 = vpop.f32.mrf.mxu0 }
 0x101   :  { %v235_v23 = vpop.f32.mrf.mxu0 }
 0x103   :  { %v4701_v24 = vpop.f32.mrf.mxu0 }
 0x104   :  { %v395_v28 = vpack.c.bf16 %v4701_v24, %v4700_v22  ;;  %v4843_v22 = vld [vmem:[%s6310_s3 + $0x10] sm:$0xff]  }
 0x105   :  { %v238_v25 = vpop.f32.mrf.mxu0  ;;  %v4845_v24 = vld [vmem:[#allocation3 + $0x70] ss:$8 sps:$4 sm:$0xff]  }
 0x106   :  { %v391_v26 = vpack.c.bf16 %v238_v25, %v235_v23  ;;  %v4844_v23 = vld [vmem:[%s6310_s3 + $0x18] sm:$0xff]  }
 0x107   :  { %v4848_v25 = vld [vmem:[#allocation3 + $0x170] ss:$8 sps:$4 sm:$0xff]  }
 0x108   :  { %814 = vmatprep.mubr.bf16.mxu0 %v391_v26  ;;  %v4853_v26 = vld [vmem:[#allocation3 + $0x64] ss:$8 sps:$4 sm:$0xff]  }
 0x109   :  { %815 = vmatmul.mubr.bf16.vlgmr.msra.gmra.mxu0 %v390_v27  ;;  %v4856_v27 = vld [vmem:[#allocation3 + $0x164] ss:$8 sps:$4 sm:$0xff]  }
 0x10a   :  { %824 = vmatprep.mubr.bf16.mxu0 %v395_v28  ;;  %v4851_v28 = vld [vmem:[#allocation3 + $0x60] ss:$8 sps:$4 sm:$0xff]  }
 0x10f   :  { %v4712_v30 = vpop.f32.mrf.mxu0 }
 0x111   :  { %v305_v31 = vpop.f32.mrf.mxu0  ;;  %825 = vmatmul.mubr.bf16.gmra.mxu0 %v394_v29  ;;  %v4854_v29 = vld [vmem:[#allocation3 + $0x160] ss:$8 sps:$4 sm:$0xff]  }
 0x112   :  { %959 = vmatprep.mubr.bf16.mxu0 %v6322_v37 }
 0x113   :  { %v4713_v32 = vpop.f32.mrf.mxu0 }
 0x114   :  { %v396_v36 = vpack.c.bf16 %v4713_v32, %v4712_v30  ;;  %v4859_v30 = vld [vmem:[#allocation3 + $0x54] ss:$8 sps:$4 sm:$0xff]   ;;  %v4857_v32 = vld [vmem:[#allocation3 + $0x50] ss:$8 sps:$4 sm:$0xff]  }
 0x115   :  { %v308_v33 = vpop.f32.mrf.mxu0 }
 0x116   :  { %v392_v34 = vpack.c.bf16 %v308_v33, %v305_v31  ;;  %v4862_v31 = vld [vmem:[#allocation3 + $0x154] ss:$8 sps:$4 sm:$0xff]   ;;  %v4860_v33 = vld [vmem:[#allocation3 + $0x150] ss:$8 sps:$4 sm:$0xff]  }
 0x118   :  { %868 = vmatmul.mubr.bf16.vlgmr.msra.gmra.mxu1 %v392_v34  ;;  %v4865_v34 = vld [vmem:[#allocation3 + $0x44] ss:$8 sps:$4 sm:$0xff]  }
 0x119   :  { %877 = vmatprep.mubr.bf16.mxu1 %v397_v35  ;;  %v4868_v35 = vld [vmem:[#allocation3 + $0x144] ss:$8 sps:$4 sm:$0xff]  }
 0x120   :  { %878 = vmatmul.mubr.bf16.gmra.mxu1 %v396_v36  ;;  %v4863_v36 = vld [vmem:[#allocation3 + $0x40] ss:$8 sps:$4 sm:$0xff]  }
 0x121   :  { %1013 = vmatprep.mubr.bf16.mxu1 %v6322_v37 }
 0x1c9   :  { %v816_v38 = vpop.f32.mrf.mxu0 }
 0x1cb   :  { %v818_v39 = vpop.f32.mrf.mxu0 }
 0x1cd   :  { %v820_v40 = vpop.f32.mrf.mxu0 }
 0x1cf   :  { %v822_v41 = vpop.f32.mrf.mxu0 }
 0x1d1   :  { %v826_v43 = vpop.f32.mrf.mxu0 }
 0x1d3   :  { %v828_v46 = vpop.f32.mrf.mxu0 }
 0x1d5   :  { %v830_v49 = vpop.f32.mrf.mxu0 }
 0x1d7   :  { %v832_v57 = vpop.f32.mrf.mxu0 }
 0x1d8   :  { %v869_v42 = vpop.f32.mrf.mxu1 }
 0x1d9   :  { %v870_v0 = vadd.f32 %v869_v42, %v816_v38  ;;  %v4866_v38 = vld [vmem:[#allocation3 + $0x140] ss:$8 sps:$4 sm:$0xff]   ;;  %v4872_v42 = vld [vmem:[#allocation3 + $0x130] ss:$8 sps:$4 sm:$0xff]  }
 0x1da   :  { %v871_v44 = vpop.f32.mrf.mxu1 }
 0x1db   :  { %v872_v55 = vadd.f32 %v871_v44, %v818_v39  ;;  %v896_v9 = vmul.f32 0.01, %v870_v0  ;;  %vm888_vm8 = vcmp.ge.f32.partialorder %v870_v0, 0.0  ;;  %v4871_v39 = vld [vmem:[#allocation3 + $0x34] ss:$8 sps:$4 sm:$0xff]  }
 0x1dc   :  { %v873_v45 = vpop.f32.mrf.mxu1  ;;  %v4880_v44 = vld [vmem:[#allocation3 + $0x124] ss:$8 sps:$4 sm:$0xff]  }
 0x1dd   :  { %v874_v58 = vadd.f32 %v873_v45, %v820_v40  ;;  %v897_v2 = vmul.f32 0.01, %v872_v55  ;;  %vm889_vm6 = vcmp.ge.f32.partialorder %v872_v55, 0.0  ;;  %v904_v16 = vsel %vm888_vm8, %v870_v0, %v896_v9  ;;  %v4874_v40 = vld [vmem:[#allocation3 + $0x134] ss:$8 sps:$4 sm:$0xff]  }
 0x1de   :  { %v875_v47 = vpop.f32.mrf.mxu1  ;;  %v4875_v45 = vld [vmem:[#allocation3 + $0x20] ss:$8 sps:$4 sm:$0xff]   ;;  %v4910_v0 = vld [vmem:[#allocation3 + $0x1d4] ss:$8 sps:$4 sm:$0xff]   ;;  %v4917_v9 = vld [vmem:[#allocation3 + $0xb0] ss:$8 sps:$4 sm:$0xff]  }
 0x1df   :  { %v876_v50 = vadd.f32 %v875_v47, %v822_v41  ;;  %v898_v4 = vmul.f32 0.01, %v874_v58  ;;  %vm890_vm7 = vcmp.ge.f32.partialorder %v874_v58, 0.0  ;;  %v905_v12 = vsel %vm889_vm6, %v872_v55, %v897_v2  ;;  %v4869_v41 = vld [vmem:[#allocation3 + $0x30] ss:$8 sps:$4 sm:$0xff]  }
 0x1e0   :  { %v879_v48 = vpop.f32.mrf.mxu1  ;;  %v4883_v47 = vld [vmem:[#allocation3 + $0x14] ss:$8 sps:$4 sm:$0xff]   ;;  %v4908_v2 = vld [vmem:[#allocation3 + $0x1d0] ss:$8 sps:$4 sm:$0xff]  }
 0x1e1   :  { %v880_v53 = vadd.f32 %v879_v48, %v826_v43  ;;  %v899_v59 = vmul.f32 0.01, %v876_v50  ;;  %vm891_vm2 = vcmp.ge.f32.partialorder %v876_v50, 0.0  ;;  %v906_v14 = vsel %vm890_vm7, %v874_v58, %v898_v4  ;;  %v4877_v43 = vld [vmem:[#allocation3 + $0x24] ss:$8 sps:$4 sm:$0xff]  }
 0x1e2   :  { %v881_v51 = vpop.f32.mrf.mxu1  ;;  %v912_v17 = vpack.c.bf16 %v906_v14, %v904_v16  ;;  %v4886_v48 = vld [vmem:[#allocation3 + $0x114] ss:$8 sps:$4 sm:$0xff]   ;;  %v4896_v58 = vld [vmem:[#allocation3 + $0x1f0] ss:$8 sps:$4 sm:$0xff]   ;;  %v4916_v4 = vld [vmem:[#allocation3 + $0x1c4] ss:$8 sps:$4 sm:$0xff]  }
 0x1e3   :  { %v882_v52 = vadd.f32 %v881_v51, %v828_v46  ;;  %v900_v1 = vmul.f32 0.01, %v880_v53  ;;  %vm892_vm4 = vcmp.ge.f32.partialorder %v880_v53, 0.0  ;;  %v907_v6 = vsel %vm891_vm2, %v876_v50, %v899_v59  ;;  %v4878_v46 = vld [vmem:[#allocation3 + $0x120] ss:$8 sps:$4 sm:$0xff]  }
 0x1e4   :  { %v883_v54 = vpop.f32.mrf.mxu1  ;;  %v913_v15 = vpack.c.bf16 %v907_v6, %v905_v12  ;;  %v4884_v50 = vld [vmem:[#allocation3 + $0x110] ss:$8 sps:$4 sm:$0xff]   ;;  %v4889_v51 = vld [vmem:[#allocation3 + $0x4] ss:$8 sps:$4 sm:$0xff]   ;;  %v4895_v55 = vld [vmem:[#allocation3 + $0xf4] ss:$8 sps:$4 sm:$0xff]  }
 0x1e5   :  { %v884_v56 = vadd.f32 %v883_v54, %v830_v49  ;;  %v901_v61 = vmul.f32 0.01, %v882_v52  ;;  %vm893_vm3 = vcmp.ge.f32.partialorder %v882_v52, 0.0  ;;  %v908_v10 = vsel %vm892_vm4, %v880_v53, %v900_v1  ;;  %v4881_v49 = vld [vmem:[#allocation3 + $0x10] ss:$8 sps:$4 sm:$0xff]  }
 0x1e6   :  { %v885_v60 = vpop.f32.mrf.mxu1  ;;  %v4887_v53 = vld [vmem:[#allocation3] ss:$8 sps:$4 sm:$0xff]   ;;  %v4901_v59 = vld [vmem:[#allocation3 + $0xe4] ss:$8 sps:$4 sm:$0xff]   ;;  %v4905_v1 = vld [vmem:[#allocation3 + $0xd0] ss:$8 sps:$4 sm:$0xff]  }
 0x1e7   :  { %vm894_vm1 = vcmp.ge.f32.partialorder %v884_v56, 0.0  ;;  %v902_v62 = vmul.f32 0.01, %v884_v56  ;;  %v886_v63 = vadd.f32 %v885_v60, %v832_v57  ;;  %v909_v7 = vsel %vm893_vm3, %v882_v52, %v901_v61  ;;  %v4892_v52 = vld [vmem:[#allocation3 + $0x104] ss:$8 sps:$4 sm:$0xff]  }
 0x1e8   :  { %v4890_v54 = vld [vmem:[#allocation3 + $0x100] ss:$8 sps:$4 sm:$0xff]   ;;  %v4893_v57 = vld [vmem:[#allocation3 + $0xf0] ss:$8 sps:$4 sm:$0xff]   ;;  %v4904_v60 = vld [vmem:[#allocation3 + $0x1e4] ss:$8 sps:$4 sm:$0xff]  }
 0x1e9   :  { %vm895_vm5 = vcmp.ge.f32.partialorder %v886_v63, 0.0  ;;  %v903_v3 = vmul.f32 0.01, %v886_v63  ;;  %v910_v5 = vsel %vm894_vm1, %v884_v56, %v902_v62  ;;  %v4898_v56 = vld [vmem:[#allocation3 + $0x1f4] ss:$8 sps:$4 sm:$0xff]  }
 0x1ea   :  { %v914_v13 = vpack.c.bf16 %v910_v5, %v908_v10  ;;  %v4899_v61 = vld [vmem:[#allocation3 + $0xe0] ss:$8 sps:$4 sm:$0xff]   ;;  %v4920_v10 = vld [vmem:[#allocation3 + $0x1b0] ss:$8 sps:$4 sm:$0xff]   ;;  %v4928_v12 = vld [vmem:[#allocation3 + $0x1a4] ss:$8 sps:$4 sm:$0xff]  }
 0x1eb   :  { %v911_v8 = vsel %vm895_vm5, %v886_v63, %v903_v3  ;;  %v4902_v62 = vld [vmem:[#allocation3 + $0x1e0] ss:$8 sps:$4 sm:$0xff]   ;;  %v4907_v63 = vld [vmem:[#allocation3 + $0xd4] ss:$8 sps:$4 sm:$0xff]   ;;  %v4913_v3 = vld [vmem:[#allocation3 + $0xc4] ss:$8 sps:$4 sm:$0xff]  }
 0x1ec   :  { %v915_v11 = vpack.c.bf16 %v911_v8, %v909_v7  ;;  %v4911_v5 = vld [vmem:[#allocation3 + $0xc0] ss:$8 sps:$4 sm:$0xff]   ;;  %v4919_v7 = vld [vmem:[#allocation3 + $0xb4] ss:$8 sps:$4 sm:$0xff]  }
 0x1ed   :  { %v4914_v6 = vld [vmem:[#allocation3 + $0x1c0] ss:$8 sps:$4 sm:$0xff]   ;;  %v4922_v8 = vld [vmem:[#allocation3 + $0x1b4] ss:$8 sps:$4 sm:$0xff]  }
 0x1ee   :  { %939 = vmatprep.subr.bf16.mxu0 %v915_v11  ;;  %993 = vmatprep.subr.bf16.mxu1 %v915_v11  ;;  %v4926_v14 = vld [vmem:[#allocation3 + $0x1a0] ss:$8 sps:$4 sm:$0xff]   ;;  %v4934_v16 = vld [vmem:[#allocation3 + $0x194] ss:$8 sps:$4 sm:$0xff]  }
 0x1ef   :  { %940 = vmatpush1.bf16.msra.mxu0 %v914_v13  ;;  %994 = vmatpush1.bf16.msra.mxu1 %v914_v13 }
 0x1f0   :  { %941 = vmatprep.subr.bf16.mxu0 %v913_v15  ;;  %995 = vmatprep.subr.bf16.mxu1 %v913_v15 }
 0x1f3   :  { %942 = vmatpush1.bf16.msra.mxu0 %v912_v17  ;;  %996 = vmatpush1.bf16.msra.mxu1 %v912_v17 }
 0x1f4   :  { %1047 = vmatprep.subr.bf16.mxu0 %v915_v11  ;;  %1101 = vmatprep.subr.bf16.mxu1 %v915_v11  ;;  %v4925_v11 = vld [vmem:[#allocation3 + $0xa4] ss:$8 sps:$4 sm:$0xff]  }
 0x1f6   :  { %4248 = vmatmul.mubr.msk.bf16.vlgmr.msra.gmra.mxu0 %vm923_vm9, %v4841_v18  ;;  %4252 = vmatmul.mubr.msk.bf16.vlgmr.msra.gmra.mxu1 %vm923_vm9, %v4842_v19  ;;  %v4932_v18 = vld [vmem:[#allocation3 + $0x190] ss:$8 sps:$4 sm:$0xff]   ;;  %v4937_v19 = vld [vmem:[#allocation3 + $0x84] ss:$8 sps:$4 sm:$0xff]  }
 0x1f7   :  { %1048 = vmatpush1.bf16.msra.mxu0 %v914_v13  ;;  %1102 = vmatpush1.bf16.msra.mxu1 %v914_v13  ;;  %v4923_v13 = vld [vmem:[#allocation3 + $0xa0] ss:$8 sps:$4 sm:$0xff]  }
 0x1f8   :  { %1049 = vmatprep.subr.bf16.mxu0 %v913_v15  ;;  %1103 = vmatprep.subr.bf16.mxu1 %v913_v15  ;;  %v4931_v15 = vld [vmem:[#allocation3 + $0x94] ss:$8 sps:$4 sm:$0xff]  }
 0x1f9   :  { %1067 = vmatprep.mubr.bf16.mxu0 %v6322_v37  ;;  %1121 = vmatprep.mubr.bf16.mxu1 %v6322_v37 }
 0x1fb   :  { %1050 = vmatpush1.bf16.msra.mxu0 %v912_v17  ;;  %1104 = vmatpush1.bf16.msra.mxu1 %v912_v17  ;;  %v4929_v17 = vld [vmem:[#allocation3 + $0x90] ss:$8 sps:$4 sm:$0xff]  }
 0x1fc   :  { %1908 = vmatprep.subr.bf16.mxu0 %v4847_v20  ;;  %1951 = vmatprep.subr.bf16.mxu1 %v4850_v21  ;;  %v4940_v20 = vld [vmem:[#allocation3 + $0x184] ss:$8 sps:$4 sm:$0xff]   ;;  %v4935_v21 = vld [vmem:[#allocation3 + $0x80] ss:$8 sps:$4 sm:$0xff]  }
 0x1fe   :  { %4256 = vmatmul.mubr.msk.bf16.vlgmr.msra.gmra.mxu0 %vm923_vm9, %v4843_v22  ;;  %4260 = vmatmul.mubr.msk.bf16.vlgmr.msra.gmra.mxu1 %vm923_vm9, %v4844_v23  ;;  %v4938_v22 = vld [vmem:[#allocation3 + $0x180] ss:$8 sps:$4 sm:$0xff]   ;;  %v4943_v23 = vld [vmem:[#allocation3 + $0x274] ss:$8 sps:$4 sm:$0xff]  }
 0x1ff   :  { %1909 = vmatpush1.bf16.msra.mxu0 %v4845_v24  ;;  %1952 = vmatpush1.bf16.msra.mxu1 %v4848_v25  ;;  %v4946_v24 = vld [vmem:[#allocation3 + $0x374] ss:$8 sps:$4 sm:$0xff]  }
 0x200   :  { %1910 = vmatprep.subr.bf16.mxu0 %v4853_v26  ;;  %1953 = vmatprep.subr.bf16.mxu1 %v4856_v27 }
 0x203   :  { %1911 = vmatpush1.bf16.msra.mxu0 %v4851_v28  ;;  %1954 = vmatpush1.bf16.msra.mxu1 %v4854_v29 }
 0x204   :  { %1912 = vmatprep.subr.bf16.mxu0 %v4859_v30  ;;  %1955 = vmatprep.subr.bf16.mxu1 %v4862_v31 }
 0x207   :  { %1913 = vmatpush1.bf16.msra.mxu0 %v4857_v32  ;;  %1956 = vmatpush1.bf16.msra.mxu1 %v4860_v33 }
 0x208   :  { %1914 = vmatprep.subr.bf16.mxu0 %v4865_v34  ;;  %1957 = vmatprep.subr.bf16.mxu1 %v4868_v35  ;;  %v4941_v35 = vld [vmem:[#allocation3 + $0x270] ss:$8 sps:$4 sm:$0xff]  }
 0x20b   :  { %1915 = vmatpush1.bf16.msra.mxu0 %v4863_v36  ;;  %1958 = vmatpush1.bf16.msra.mxu1 %v4866_v38  ;;  %v4944_v36 = vld [vmem:[#allocation3 + $0x370] ss:$8 sps:$4 sm:$0xff]  }
 0x20c   :  { %1916 = vmatprep.subr.bf16.mxu0 %v4871_v39  ;;  %1959 = vmatprep.subr.bf16.mxu1 %v4874_v40  ;;  %v4949_v40 = vld [vmem:[#allocation3 + $0x264] ss:$8 sps:$4 sm:$0xff]  }
 0x20f   :  { %1917 = vmatpush1.bf16.msra.mxu0 %v4869_v41  ;;  %1960 = vmatpush1.bf16.msra.mxu1 %v4872_v42  ;;  %v4952_v41 = vld [vmem:[#allocation3 + $0x364] ss:$8 sps:$4 sm:$0xff]  }
 0x210   :  { %1918 = vmatprep.subr.bf16.mxu0 %v4877_v43  ;;  %1961 = vmatprep.subr.bf16.mxu1 %v4880_v44 }
 0x213   :  { %1919 = vmatpush1.bf16.msra.mxu0 %v4875_v45  ;;  %1962 = vmatpush1.bf16.msra.mxu1 %v4878_v46  ;;  %v4947_v46 = vld [vmem:[#allocation3 + $0x260] ss:$8 sps:$4 sm:$0xff]  }
 0x214   :  { %1920 = vmatprep.subr.bf16.mxu0 %v4883_v47  ;;  %1963 = vmatprep.subr.bf16.mxu1 %v4886_v48  ;;  %v4950_v47 = vld [vmem:[#allocation3 + $0x360] ss:$8 sps:$4 sm:$0xff]   ;;  %v4955_v48 = vld [vmem:[#allocation3 + $0x254] ss:$8 sps:$4 sm:$0xff]  }
 0x217   :  { %1921 = vmatpush1.bf16.msra.mxu0 %v4881_v49  ;;  %1964 = vmatpush1.bf16.msra.mxu1 %v4884_v50  ;;  %v4958_v49 = vld [vmem:[#allocation3 + $0x354] ss:$8 sps:$4 sm:$0xff]  }
 0x218   :  { %1922 = vmatprep.subr.bf16.mxu0 %v4889_v51  ;;  %1965 = vmatprep.subr.bf16.mxu1 %v4892_v52 }
 0x21b   :  { %1923 = vmatpush1.bf16.msra.mxu0 %v4887_v53  ;;  %1966 = vmatpush1.bf16.msra.mxu1 %v4890_v54  ;;  %v4953_v54 = vld [vmem:[#allocation3 + $0x250] ss:$8 sps:$4 sm:$0xff]  }
 0x21c   :  { %1924 = vmatprep.subr.bf16.mxu0 %v4895_v55  ;;  %1967 = vmatprep.subr.bf16.mxu1 %v4898_v56  ;;  %v4956_v55 = vld [vmem:[#allocation3 + $0x350] ss:$8 sps:$4 sm:$0xff]  }
 0x21f   :  { %1925 = vmatpush2.bf16.msra.mxu0 %v4893_v57  ;;  %1968 = vmatpush2.bf16.msra.mxu1 %v4896_v58  ;;  %v4961_v58 = vld [vmem:[#allocation3 + $0x244] ss:$8 sps:$4 sm:$0xff]  }
 0x220   :  { %1926 = vmatprep.subr.bf16.mxu0 %v4901_v59  ;;  %1969 = vmatprep.subr.bf16.mxu1 %v4904_v60  ;;  %v4964_v59 = vld [vmem:[#allocation3 + $0x344] ss:$8 sps:$4 sm:$0xff]   ;;  %v4959_v60 = vld [vmem:[#allocation3 + $0x240] ss:$8 sps:$4 sm:$0xff]  }
 0x223   :  { %1927 = vmatpush2.bf16.msra.mxu0 %v4899_v61  ;;  %1970 = vmatpush2.bf16.msra.mxu1 %v4902_v62  ;;  %v4962_v61 = vld [vmem:[#allocation3 + $0x340] ss:$8 sps:$4 sm:$0xff]   ;;  %v4967_v62 = vld [vmem:[#allocation3 + $0x234] ss:$8 sps:$4 sm:$0xff]  }
 0x224   :  { %1928 = vmatprep.subr.bf16.mxu0 %v4907_v63  ;;  %1971 = vmatprep.subr.bf16.mxu1 %v4910_v0  ;;  %v4970_v63 = vld [vmem:[#allocation3 + $0x334] ss:$8 sps:$4 sm:$0xff]   ;;  %v4965_v0 = vld [vmem:[#allocation3 + $0x230] ss:$8 sps:$4 sm:$0xff]  }
 0x227   :  { %1929 = vmatpush2.bf16.msra.mxu0 %v4905_v1  ;;  %1972 = vmatpush2.bf16.msra.mxu1 %v4908_v2  ;;  %v4968_v1 = vld [vmem:[#allocation3 + $0x330] ss:$8 sps:$4 sm:$0xff]   ;;  %v4973_v2 = vld [vmem:[#allocation3 + $0x224] ss:$8 sps:$4 sm:$0xff]  }
 0x228   :  { %1930 = vmatprep.subr.bf16.mxu0 %v4913_v3  ;;  %1973 = vmatprep.subr.bf16.mxu1 %v4916_v4  ;;  %v4976_v3 = vld [vmem:[#allocation3 + $0x324] ss:$8 sps:$4 sm:$0xff]   ;;  %v4971_v4 = vld [vmem:[#allocation3 + $0x220] ss:$8 sps:$4 sm:$0xff]  }
 0x22b   :  { %1931 = vmatpush2.bf16.msra.mxu0 %v4911_v5  ;;  %1974 = vmatpush2.bf16.msra.mxu1 %v4914_v6  ;;  %v4974_v5 = vld [vmem:[#allocation3 + $0x320] ss:$8 sps:$4 sm:$0xff]   ;;  %v4979_v6 = vld [vmem:[#allocation3 + $0x214] ss:$8 sps:$4 sm:$0xff]  }
 0x22c   :  { %1932 = vmatprep.subr.bf16.mxu0 %v4919_v7  ;;  %1975 = vmatprep.subr.bf16.mxu1 %v4922_v8  ;;  %v4982_v7 = vld [vmem:[#allocation3 + $0x314] ss:$8 sps:$4 sm:$0xff]   ;;  %v4977_v8 = vld [vmem:[#allocation3 + $0x210] ss:$8 sps:$4 sm:$0xff]  }
 0x22f   :  { %1933 = vmatpush2.bf16.msra.mxu0 %v4917_v9  ;;  %1976 = vmatpush2.bf16.msra.mxu1 %v4920_v10  ;;  %v4980_v9 = vld [vmem:[#allocation3 + $0x310] ss:$8 sps:$4 sm:$0xff]   ;;  %v4985_v10 = vld [vmem:[#allocation3 + $0x204] ss:$8 sps:$4 sm:$0xff]  }
 0x230   :  { %1934 = vmatprep.subr.bf16.mxu0 %v4925_v11  ;;  %1977 = vmatprep.subr.bf16.mxu1 %v4928_v12  ;;  %v4988_v11 = vld [vmem:[#allocation3 + $0x304] ss:$8 sps:$4 sm:$0xff]   ;;  %v4983_v12 = vld [vmem:[#allocation3 + $0x200] ss:$8 sps:$4 sm:$0xff]  }
 0x233   :  { %1935 = vmatpush2.bf16.msra.mxu0 %v4923_v13  ;;  %1978 = vmatpush2.bf16.msra.mxu1 %v4926_v14  ;;  %v4986_v13 = vld [vmem:[#allocation3 + $0x300] ss:$8 sps:$4 sm:$0xff]   ;;  %v4991_v14 = vld [vmem:[#allocation3 + $0x2f4] ss:$8 sps:$4 sm:$0xff]  }
 0x234   :  { %1936 = vmatprep.subr.bf16.mxu0 %v4931_v15  ;;  %1979 = vmatprep.subr.bf16.mxu1 %v4934_v16  ;;  %v4994_v15 = vld [vmem:[#allocation3 + $0x3f4] ss:$8 sps:$4 sm:$0xff]   ;;  %v4989_v16 = vld [vmem:[#allocation3 + $0x2f0] ss:$8 sps:$4 sm:$0xff]  }
 0x237   :  { %1937 = vmatpush2.bf16.msra.mxu0 %v4929_v17  ;;  %1980 = vmatpush2.bf16.msra.mxu1 %v4932_v18  ;;  %v4992_v17 = vld [vmem:[#allocation3 + $0x3f0] ss:$8 sps:$4 sm:$0xff]   ;;  %v4997_v18 = vld [vmem:[#allocation3 + $0x2e4] ss:$8 sps:$4 sm:$0xff]  }
 0x238   :  { %1938 = vmatprep.subr.bf16.mxu0 %v4937_v19  ;;  %1981 = vmatprep.subr.bf16.mxu1 %v4940_v20  ;;  %v5000_v19 = vld [vmem:[#allocation3 + $0x3e4] ss:$8 sps:$4 sm:$0xff]   ;;  %v4995_v20 = vld [vmem:[#allocation3 + $0x2e0] ss:$8 sps:$4 sm:$0xff]  }
 0x23b   :  { %1939 = vmatpush2.bf16.msra.mxu0 %v4935_v21  ;;  %1982 = vmatpush2.bf16.msra.mxu1 %v4938_v22  ;;  %v4998_v21 = vld [vmem:[#allocation3 + $0x3e0] ss:$8 sps:$4 sm:$0xff]   ;;  %v5003_v22 = vld [vmem:[#allocation3 + $0x2d4] ss:$8 sps:$4 sm:$0xff]  }
 0x23c   :  { %1994 = vmatprep.subr.bf16.mxu0 %v4943_v23  ;;  %2037 = vmatprep.subr.bf16.mxu1 %v4946_v24  ;;  %v5006_v23 = vld [vmem:[#allocation3 + $0x3d4] ss:$8 sps:$4 sm:$0xff]   ;;  %v5001_v24 = vld [vmem:[#allocation3 + $0x2d0] ss:$8 sps:$4 sm:$0xff]  }
 0x2b6   :  { %v961_v25 = vpop.f32.mrf.mxu0  ;;  %v1015_v26 = vpop.f32.mrf.mxu1 }
 0x2b8   :  { %v963_v27 = vpop.f32.mrf.mxu0  ;;  %v1017_v28 = vpop.f32.mrf.mxu1 }
 0x2ba   :  { %v965_v29 = vpop.f32.mrf.mxu0  ;;  %v1019_v30 = vpop.f32.mrf.mxu1 }
 0x2bb   :  { %v1132_v38 = vpack.c.bf16 %v965_v29, %v961_v25  ;;  %v1134_v39 = vpack.c.bf16 %v1019_v30, %v1015_v26  ;;  %v5004_v25 = vld [vmem:[#allocation3 + $0x3d0] ss:$8 sps:$4 sm:$0xff]   ;;  %v5009_v26 = vld [vmem:[#allocation3 + $0x2c4] ss:$8 sps:$4 sm:$0xff]   ;;  %v5010_v29 = vld [vmem:[#allocation3 + $0x3c0] ss:$8 sps:$4 sm:$0xff]  }
 0x2bc   :  { %v967_v31 = vpop.f32.mrf.mxu0  ;;  %v1021_v32 = vpop.f32.mrf.mxu1  ;;  %v5015_v30 = vld [vmem:[#allocation3 + $0x2b4] ss:$8 sps:$4 sm:$0xff]  }
 0x2bd   :  { %v1133_v33 = vpack.c.bf16 %v967_v31, %v963_v27  ;;  %v1135_v34 = vpack.c.bf16 %v1021_v32, %v1017_v28  ;;  %v5012_v27 = vld [vmem:[#allocation3 + $0x3c4] ss:$8 sps:$4 sm:$0xff]   ;;  %v5007_v28 = vld [vmem:[#allocation3 + $0x2c0] ss:$8 sps:$4 sm:$0xff]   ;;  %v5018_v31 = vld [vmem:[#allocation3 + $0x3b4] ss:$8 sps:$4 sm:$0xff]  }
 0x2be   :  { %v5658_v42 = vpop.f32.mrf.mxu0  ;;  %v5660_v43 = vpop.f32.mrf.mxu1  ;;  %v5013_v32 = vld [vmem:[#allocation3 + $0x2b0] ss:$8 sps:$4 sm:$0xff]  }
 0x2bf   :  { %1940 = vmatprep.mubr.bf16.mxu0 %v1133_v33  ;;  %1983 = vmatprep.mubr.bf16.mxu1 %v1135_v34  ;;  %v5016_v33 = vld [vmem:[#allocation3 + $0x3b0] ss:$8 sps:$4 sm:$0xff]   ;;  %v5021_v34 = vld [vmem:[#allocation3 + $0x2a4] ss:$8 sps:$4 sm:$0xff]  }
 0x2c0   :  { %1941 = vmatmul.mubr.bf16.vlgmr.msra.gmra.mxu0 %v1132_v38  ;;  %1984 = vmatmul.mubr.bf16.vlgmr.msra.gmra.mxu1 %v1134_v39  ;;  %v1071_v44 = vpop.f32.mrf.mxu0  ;;  %v1125_v45 = vpop.f32.mrf.mxu1  ;;  %v5022_v38 = vld [vmem:[#allocation3 + $0x3a0] ss:$8 sps:$4 sm:$0xff]   ;;  %v5027_v39 = vld [vmem:[#allocation3 + $0x294] ss:$8 sps:$4 sm:$0xff]  }
 0x2c1   :  { %1995 = vmatpush1.bf16.msra.mxu0 %v4941_v35  ;;  %2038 = vmatpush1.bf16.msra.mxu1 %v4944_v36  ;;  %v5024_v35 = vld [vmem:[#allocation3 + $0x3a4] ss:$8 sps:$4 sm:$0xff]   ;;  %v5019_v36 = vld [vmem:[#allocation3 + $0x2a0] ss:$8 sps:$4 sm:$0xff]  }
 0x2c2   :  { %1996 = vmatprep.subr.bf16.mxu0 %v4949_v40  ;;  %2039 = vmatprep.subr.bf16.mxu1 %v4952_v41  ;;  %v5662_v50 = vpop.f32.mrf.mxu0  ;;  %v5664_v51 = vpop.f32.mrf.mxu1  ;;  %v5030_v40 = vld [vmem:[#allocation3 + $0x394] ss:$8 sps:$4 sm:$0xff]   ;;  %v5025_v41 = vld [vmem:[#allocation3 + $0x290] ss:$8 sps:$4 sm:$0xff]  }
 0x2c4   :  { %v1075_v52 = vpop.f32.mrf.mxu0  ;;  %v1129_v53 = vpop.f32.mrf.mxu1 }
 0x2c5   :  { %1997 = vmatpush1.bf16.msra.mxu0 %v4947_v46  ;;  %2040 = vmatpush1.bf16.msra.mxu1 %v4950_v47  ;;  %v1137_v56 = vpack.c.bf16 %v1075_v52, %v1071_v44  ;;  %v1139_v57 = vpack.c.bf16 %v1129_v53, %v1125_v45  ;;  %v5028_v44 = vld [vmem:[#allocation3 + $0x390] ss:$8 sps:$4 sm:$0xff]   ;;  %v5033_v45 = vld [vmem:[#allocation3 + $0x284] ss:$8 sps:$4 sm:$0xff]   ;;  %v5031_v47 = vld [vmem:[#allocation3 + $0x280] ss:$8 sps:$4 sm:$0xff]   ;;  %v1138_v52 = vpack.c.bf16 %v5664_v51, %v5660_v43  ;;  %v2112_v53 = vlaneseq }
 0x2c6   :  { %1998 = vmatprep.subr.bf16.mxu0 %v4955_v48  ;;  %2041 = vmatprep.subr.bf16.mxu1 %v4958_v49  ;;  %v5036_v46 = vld [vmem:[#allocation3 + $0x384] ss:$8 sps:$4 sm:$0xff]   ;;  %v5034_v48 = vld [vmem:[#allocation3 + $0x380] ss:$8 sps:$4 sm:$0xff]   ;;  %v1136_v49 = vpack.c.bf16 %v5662_v50, %v5658_v42 }
 0x2c7   :  { %2026 = vmatprep.mubr.bf16.mxu0 %v1137_v56  ;;  %2069 = vmatprep.mubr.bf16.mxu1 %v1139_v57 }
 0x2c9   :  { %1999 = vmatpush1.bf16.msra.mxu0 %v4953_v54  ;;  %2042 = vmatpush1.bf16.msra.mxu1 %v4956_v55  ;;  %v5671_v54 = vshrl.u32 %v2112_v53, 7  ;;  %v5673_v55 = vand.u32 127, %v2112_v53 }
 0x2ca   :  { %2000 = vmatprep.subr.bf16.mxu0 %v4961_v58  ;;  %2043 = vmatprep.subr.bf16.mxu1 %v4964_v59 }
 0x2cb   :  { %v2131_v56 = vadd.s32 120, %v5671_v54  ;;  %v5677_v57 = vadd.s32 128, %v5673_v55  ;;  %v2130_v58 = vadd.s32 112, %v5671_v54  ;;  %v2129_v42 = vadd.s32 104, %v5671_v54 }
 0x2cc   :  { %v2128_v43 = vadd.s32 96, %v5671_v54  ;;  %v2127_v50 = vadd.s32 88, %v5671_v54  ;;  %v2126_v51 = vadd.s32 80, %v5671_v54  ;;  %v2125_v59 = vadd.s32 72, %v5671_v54 }
 0x2cd   :  { %2001 = vmatpush1.bf16.msra.mxu0 %v4959_v60  ;;  %2044 = vmatpush1.bf16.msra.mxu1 %v4962_v61  ;;  %v5686_v60 = vsub.s32 %v2131_v56, %v5677_v57  ;;  %v5689_v61 = vsub.s32 %v2131_v56, %v5673_v55 }
 0x2ce   :  { %2002 = vmatprep.subr.bf16.mxu0 %v4967_v62  ;;  %2045 = vmatprep.subr.bf16.mxu1 %v4970_v63  ;;  %v5692_v62 = vsub.s32 %v2130_v58, %v5677_v57  ;;  %v5695_v63 = vsub.s32 %v2130_v58, %v5673_v55 }
 0x2d1   :  { %2003 = vmatpush1.bf16.msra.mxu0 %v4965_v0  ;;  %2046 = vmatpush1.bf16.msra.mxu1 %v4968_v1  ;;  %v5698_v0 = vsub.s32 %v2129_v42, %v5677_v57  ;;  %v5701_v1 = vsub.s32 %v2129_v42, %v5673_v55 }
 0x2d2   :  { %2004 = vmatprep.subr.bf16.mxu0 %v4973_v2  ;;  %2047 = vmatprep.subr.bf16.mxu1 %v4976_v3  ;;  %v5704_v2 = vsub.s32 %v2128_v43, %v5677_v57  ;;  %v5707_v3 = vsub.s32 %v2128_v43, %v5673_v55 }
 0x2d5   :  { %2005 = vmatpush1.bf16.msra.mxu0 %v4971_v4  ;;  %2048 = vmatpush1.bf16.msra.mxu1 %v4974_v5  ;;  %v2246_v4 = vand.u32 31, %v5686_v60  ;;  %v2245_v5 = vand.u32 31, %v5689_v61 }
 0x2d6   :  { %2006 = vmatprep.subr.bf16.mxu0 %v4979_v6  ;;  %2049 = vmatprep.subr.bf16.mxu1 %v4982_v7  ;;  %v2244_v6 = vand.u32 31, %v5692_v62  ;;  %v2243_v7 = vand.u32 31, %v5695_v63 }
 0x2d7   :  { %vm2310_vm10 = vcmp.eq.s32.totalorder %v2246_v4, 0  ;;  %vm2309_vm11 = vcmp.eq.s32.totalorder %v2245_v5, 0 }
 0x2d8   :  { %vm2308_vm12 = vcmp.eq.s32.totalorder %v2244_v6, 0  ;;  %vm2307_vm13 = vcmp.eq.s32.totalorder %v2243_v7, 0  ;;  %v2118_v6 = vadd.s32 16, %v5671_v54  ;;  %v2117_v7 = vadd.s32 8, %v5671_v54 }
 0x2d9   :  { %2007 = vmatpush1.bf16.msra.mxu0 %v4977_v8  ;;  %2050 = vmatpush1.bf16.msra.mxu1 %v4980_v9  ;;  %v2242_v8 = vand.u32 31, %v5698_v0  ;;  %v2241_v9 = vand.u32 31, %v5701_v1 }
 0x2da   :  { %2008 = vmatprep.subr.bf16.mxu0 %v4985_v10  ;;  %2051 = vmatprep.subr.bf16.mxu1 %v4988_v11  ;;  %v2240_v10 = vand.u32 31, %v5704_v2  ;;  %v2239_v11 = vand.u32 31, %v5707_v3 }
 0x2db   :  { %vm5718_vm14 = vcmp.eq.s32.totalorder %v2242_v8, 0  ;;  %vm5722_vm15 = vcmp.eq.s32.totalorder %v2241_v9, 0 }
 0x2dc   :  { %vm5726_vm0 = vcmp.eq.s32.totalorder %v2240_v10, 0  ;;  %vm5744_vm1 = vcmp.eq.s32.totalorder %v2239_v11, 0  ;;  %v5855_v11 = vsub.s32 %v2118_v6, %v5677_v57 }
 0x2dd   :  { %2009 = vmatpush1.bf16.msra.mxu0 %v4983_v12  ;;  %2052 = vmatpush1.bf16.msra.mxu1 %v4986_v13  ;;  %v6345_v12 = vmov 1.0   ;;  %v5858_v13 = vsub.s32 %v2118_v6, %v5673_v55 }
 0x2de   :  { %2010 = vmatprep.subr.bf16.mxu0 %v4991_v14  ;;  %2053 = vmatprep.subr.bf16.mxu1 %v4994_v15  ;;  %v2147_v14 = vadd.s32 248, %v5671_v54 }
 0x2e1   :  { %2011 = vmatpush2.bf16.msra.mxu0 %v4989_v16  ;;  %2054 = vmatpush2.bf16.msra.mxu1 %v4992_v17  ;;  %v5732_v16 = vsub.s32 %v2127_v50, %v5677_v57  ;;  %v5735_v17 = vsub.s32 %v2127_v50, %v5673_v55 }
 0x2e2   :  { %2012 = vmatprep.subr.bf16.mxu0 %v4997_v18  ;;  %2055 = vmatprep.subr.bf16.mxu1 %v5000_v19  ;;  %v5738_v18 = vsub.s32 %v2126_v51, %v5677_v57  ;;  %v5741_v19 = vsub.s32 %v2126_v51, %v5673_v55 }
 0x2e5   :  { %2013 = vmatpush2.bf16.msra.mxu0 %v4995_v20  ;;  %2056 = vmatpush2.bf16.msra.mxu1 %v4998_v21  ;;  %v5749_v21 = vsub.s32 %v2125_v59, %v5677_v57  ;;  %v5864_v20 = vsub.s32 %v2117_v7, %v5677_v57 }
 0x2e6   :  { %2014 = vmatprep.subr.bf16.mxu0 %v5003_v22  ;;  %2057 = vmatprep.subr.bf16.mxu1 %v5006_v23  ;;  %v5752_v22 = vsub.s32 %v2125_v59, %v5673_v55  ;;  %v2124_v23 = vadd.s32 64, %v5671_v54 }
 0x2e9   :  { %2015 = vmatpush2.bf16.msra.mxu0 %v5001_v24  ;;  %2058 = vmatpush2.bf16.msra.mxu1 %v5004_v25  ;;  %v2238_v24 = vand.u32 31, %v5732_v16  ;;  %v2237_v25 = vand.u32 31, %v5735_v17 }
 0x2ea   :  { %2016 = vmatprep.subr.bf16.mxu0 %v5009_v26  ;;  %2059 = vmatprep.subr.bf16.mxu1 %v5012_v27  ;;  %v2236_v26 = vand.u32 31, %v5738_v18  ;;  %v2123_v27 = vadd.s32 56, %v5671_v54 }
 0x2eb   :  { %vm2302_vm2 = vcmp.eq.s32.totalorder %v2238_v24, 0  ;;  %vm2301_vm3 = vcmp.eq.s32.totalorder %v2237_v25, 0  ;;  %v2220_v24 = vand.u32 31, %v5855_v11  ;;  %v5873_v25 = vsub.s32 %v5671_v54, %v5677_v57 }
 0x2ec   :  { %vm5777_vm4 = vcmp.eq.s32.totalorder %v2236_v26, 0  ;;  %v2146_v26 = vadd.s32 240, %v5671_v54 }
 0x2ed   :  { %2017 = vmatpush2.bf16.msra.mxu0 %v5007_v28  ;;  %2060 = vmatpush2.bf16.msra.mxu1 %v5010_v29  ;;  %v2235_v28 = vand.u32 31, %v5741_v19  ;;  %v2234_v29 = vand.u32 31, %v5749_v21 }
 0x2ee   :  { %2018 = vmatprep.subr.bf16.mxu0 %v5015_v30  ;;  %2061 = vmatprep.subr.bf16.mxu1 %v5018_v31  ;;  %v5766_v30 = vsub.s32 %v2124_v23, %v5677_v57  ;;  %v5769_v31 = vsub.s32 %v2124_v23, %v5673_v55  ;;  %v5867_v23 = vsub.s32 %v2117_v7, %v5673_v55  ;;  %v2143_v7 = vadd.s32 216, %v5671_v54 }
 0x2ef   :  { %vm2299_vm5 = vcmp.eq.s32.totalorder %v2235_v28, 0  ;;  %vm5795_vm6 = vcmp.eq.s32.totalorder %v2234_v29, 0  ;;  %v5882_v28 = vsub.s32 %v5671_v54, %v5673_v55  ;;  %v2218_v29 = vand.u32 31, %v5864_v20 }
 0x2f1   :  { %2019 = vmatpush2.bf16.msra.mxu0 %v5013_v32  ;;  %2062 = vmatpush2.bf16.msra.mxu1 %v5016_v33  ;;  %v2233_v33 = vand.u32 31, %v5752_v22  ;;  %v5887_v32 = vsub.s32 %v2147_v14, %v5677_v57 }
 0x2f2   :  { %2020 = vmatprep.subr.bf16.mxu0 %v5021_v34  ;;  %2063 = vmatprep.subr.bf16.mxu1 %v5024_v35  ;;  %v2232_v34 = vand.u32 31, %v5766_v30  ;;  %v5787_v35 = vsub.s32 %v2123_v27, %v5677_v57 }
 0x2f3   :  { %vm2297_vm7 = vcmp.eq.s32.totalorder %v2233_v33, 0  ;;  %6372 = vst [vmem:[#allocation9_spill] sm:$0xff] %v5887_v32  ;;  %v2217_v33 = vand.u32 31, %v5867_v23 }
 0x2f4   :  { %vm2296_vm8 = vcmp.eq.s32.totalorder %v2232_v34, 0  ;;  %v5892_v34 = vsub.s32 %v2147_v14, %v5673_v55  ;;  %v5938_v14 = vsub.s32 %v2143_v7, %v5677_v57 }
 0x2f5   :  { %2021 = vmatpush2.bf16.msra.mxu0 %v5019_v36  ;;  %2064 = vmatpush2.bf16.msra.mxu1 %v5022_v38  ;;  %v5790_v36 = vsub.s32 %v2123_v27, %v5673_v55  ;;  %v2122_v38 = vadd.s32 48, %v5671_v54  ;;  %v2219_v27 = vand.u32 31, %v5858_v13 }
 0x2f6   :  { %2022 = vmatprep.subr.bf16.mxu0 %v5027_v39  ;;  %2065 = vmatprep.subr.bf16.mxu1 %v5030_v40  ;;  %v2121_v39 = vadd.s32 40, %v5671_v54  ;;  %6373 = vst [vmem:[#allocation10_spill] sm:$0xff] %v5892_v34  ;;  %v2215_v40 = vand.u32 31, %v5882_v28  ;;  %6380 = vst [vmem:[#allocation17_spill] sm:$0xff] %v5938_v14 }
 0x2f8   :  { %v5818_v53 = vsub.s32 %v2121_v39, %v5673_v55 }
 0x2f9   :  { %2023 = vmatpush2.bf16.msra.mxu0 %v5025_v41  ;;  %2066 = vmatpush2.bf16.msra.mxu1 %v5028_v44  ;;  %v2231_v41 = vand.u32 31, %v5769_v31  ;;  %v2120_v44 = vadd.s32 32, %v5671_v54 }
 0x2fa   :  { %2024 = vmatprep.subr.bf16.mxu0 %v5033_v45  ;;  %2067 = vmatprep.subr.bf16.mxu1 %v5036_v46  ;;  %v2230_v45 = vand.u32 31, %v5787_v35  ;;  %v5804_v46 = vsub.s32 %v2122_v38, %v5677_v57  ;;  %v2225_v59 = vand.u32 31, %v5818_v53 }
 0x2fb   :  { %v5823_v58 = vsub.s32 %v2120_v44, %v5677_v57  ;;  %vm2295_vm9 = vcmp.eq.s32.totalorder %v2231_v41, 0  ;;  %v5831_v50 = vsub.s32 %v2120_v44, %v5673_v55  ;;  %v2278_v41 = vand.u32 31, %v5887_v32 }
 0x2fc   :  { %v2228_v56 = vand.u32 31, %v5804_v46  ;;  %v2277_v44 = vand.u32 31, %v5892_v34 }
 0x2fd   :  { %2025 = vmatpush2.bf16.msra.mxu0 %v5031_v47  ;;  %2068 = vmatpush2.bf16.msra.mxu1 %v5034_v48  ;;  %v5807_v47 = vsub.s32 %v2122_v38, %v5673_v55  ;;  %v2119_v48 = vadd.s32 24, %v5671_v54  ;;  %v2224_v5 = vand.u32 31, %v5823_v58  ;;  %v2223_v9 = vand.u32 31, %v5831_v50 }
 0x2fe   :  { %4389 = vmatprep.subr.msk.mxu0 %vm2310_vm10, %v6345_v12  ;;  %vm2294_vm10 = vcmp.eq.s32.totalorder %v2230_v45, 0  ;;  %v2216_v38 = vand.u32 31, %v5873_v25 }
 0x2ff   :  { %v2227_v42 = vand.u32 31, %v5807_v47  ;;  %v5835_v51 = vsub.s32 %v2119_v48, %v5677_v57  ;;  %v5840_v4 = vsub.s32 %v2119_v48, %v5673_v55  ;;  %v2145_v48 = vadd.s32 232, %v5671_v54 }
 0x300   :  { %2027 = vmatmul.mubr.bf16.vlgmr.msra.gmra.mxu0 %v1136_v49  ;;  %2070 = vmatmul.mubr.bf16.vlgmr.msra.gmra.mxu1 %v1138_v52  ;;  %v2229_v49 = vand.u32 31, %v5790_v36  ;;  %v5815_v52 = vsub.s32 %v2121_v39, %v5677_v57  ;;  %v5897_v39 = vsub.s32 %v2146_v26, %v5677_v57 }
 0x301   :  { %2601 = vmatprep.mubr.bf16.mxu1 %v6322_v37  ;;  %4390 = vmatpush1.msk.msra.mxu0 %vm2309_vm11, %v6345_v12  ;;  %v2222_v10 = vand.u32 31, %v5835_v51  ;;  %v2221_v15 = vand.u32 31, %v5840_v4  ;;  %v2136_v37 = vadd.s32 160, %v5671_v54 }
 0x302   :  { %4391 = vmatprep.subr.msk.mxu0 %vm2308_vm12, %v6345_v12  ;;  %v2226_v43 = vand.u32 31, %v5815_v52  ;;  %vm2293_vm11 = vcmp.eq.s32.totalorder %v2229_v49, 0  ;;  %vm2292_vm12 = vcmp.eq.s32.totalorder %v2228_v56, 0  ;;  %6374 = vst [vmem:[#allocation11_spill] sm:$0xff] %v5897_v39  ;;  %v2276_v45 = vand.u32 31, %v5897_v39 }
 0x303   :  { %4392 = vmatpush1.msk.msra.mxu0 %vm2307_vm13, %v6345_v12  ;;  %vm2291_vm13 = vcmp.eq.s32.totalorder %v2227_v42, 0  ;;  %v5916_v49 = vsub.s32 %v2146_v26, %v5673_v55  ;;  %v5919_v56 = vsub.s32 %v2145_v48, %v5677_v57  ;;  %v2144_v42 = vadd.s32 224, %v5671_v54 }
 0x304   :  { %4393 = vmatprep.subr.msk.mxu0 %vm5718_vm14, %v6345_v12  ;;  %vm5847_vm14 = vcmp.eq.s32.totalorder %v2226_v43, 0  ;;  %v5944_v26 = vsub.s32 %v2143_v7, %v5673_v55  ;;  %v2139_v7 = vadd.s32 184, %v5671_v54 }
 0x305   :  { %4394 = vmatpush1.msk.msra.mxu0 %vm5722_vm15, %v6345_v12  ;;  %vm2289_vm15 = vcmp.eq.s32.totalorder %v2225_v59, 0  ;;  %6375 = vst [vmem:[#allocation12_spill] sm:$0xff] %v5916_v49  ;;  %6376 = vst [vmem:[#allocation13_spill] sm:$0xff] %v5919_v56  ;;  %v2275_v43 = vand.u32 31, %v5916_v49  ;;  %v5924_v59 = vsub.s32 %v2145_v48, %v5673_v55  ;;  %v5928_v6 = vsub.s32 %v2144_v42, %v5677_v57 }
 0x306   :  { %4395 = vmatprep.subr.msk.mxu0 %vm5726_vm0, %v6345_v12  ;;  %vm2288_vm0 = vcmp.eq.s32.totalorder %v2224_v5, 0  ;;  %v2274_v5 = vand.u32 31, %v5919_v56  ;;  %6381 = vst [vmem:[#allocation18_spill] sm:$0xff] %v5944_v26 }
 0x307   :  { %4396 = vmatpush1.msk.msra.mxu0 %vm5744_vm1, %v6345_v12  ;;  %vm2287_vm1 = vcmp.eq.s32.totalorder %v2223_v9, 0  ;;  %6377 = vst [vmem:[#allocation14_spill] sm:$0xff] %v5924_v59  ;;  %6378 = vst [vmem:[#allocation15_spill] sm:$0xff] %v5928_v6  ;;  %v2273_v8 = vand.u32 31, %v5924_v59  ;;  %v5933_v9 = vsub.s32 %v2144_v42, %v5673_v55 }
 0x308   :  { %4397 = vmatprep.subr.msk.mxu0 %vm2302_vm2, %v6345_v12  ;;  %vm2286_vm2 = vcmp.eq.s32.totalorder %v2222_v10, 0  ;;  %v2272_v10 = vand.u32 31, %v5928_v6 }
 0x309   :  { %4398 = vmatpush1.msk.msra.mxu0 %vm2301_vm3, %v6345_v12  ;;  %vm2285_vm3 = vcmp.eq.s32.totalorder %v2221_v15, 0  ;;  %6379 = vst [vmem:[#allocation16_spill] sm:$0xff] %v5933_v9  ;;  %v2142_v15 = vadd.s32 208, %v5671_v54 }
 0x30a   :  { %4399 = vmatprep.subr.msk.mxu0 %vm5777_vm4, %v6345_v12  ;;  %vm2284_vm4 = vcmp.eq.s32.totalorder %v2220_v24, 0  ;;  %v2271_v24 = vand.u32 31, %v5933_v9 }
 0x30b   :  { %4400 = vmatpush1.msk.msra.mxu0 %vm2299_vm5, %v6345_v12  ;;  %vm2283_vm5 = vcmp.eq.s32.totalorder %v2219_v27, 0  ;;  %v2270_v27 = vand.u32 31, %v5938_v14 }
 0x30c   :  { %4401 = vmatprep.subr.msk.mxu0 %vm5795_vm6, %v6345_v12  ;;  %vm2282_vm6 = vcmp.eq.s32.totalorder %v2218_v29, 0  ;;  %v5949_v29 = vsub.s32 %v2142_v15, %v5677_v57 }
 0x30d   :  { %4402 = vmatpush1.msk.msra.mxu0 %vm2297_vm7, %v6345_v12  ;;  %vm2281_vm7 = vcmp.eq.s32.totalorder %v2217_v33, 0  ;;  %v2141_v33 = vadd.s32 200, %v5671_v54 }
 0x30e   :  { %4403 = vmatprep.subr.msk.mxu0 %vm2296_vm8, %v6345_v12  ;;  %vm2280_vm8 = vcmp.eq.s32.totalorder %v2216_v38, 0  ;;  %6382 = vst [vmem:[#allocation19_spill] sm:$0xff] %v5949_v29  ;;  %v2269_v38 = vand.u32 31, %v5944_v26 }
 0x30f   :  { %4404 = vmatpush1.msk.msra.mxu0 %vm2295_vm9, %v6345_v12  ;;  %vm2279_vm9 = vcmp.eq.s32.totalorder %v2215_v40, 0  ;;  %v5955_v40 = vsub.s32 %v2142_v15, %v5673_v55  ;;  %v5966_v42 = vsub.s32 %v2141_v33, %v5673_v55 }
 0x310   :  { %4405 = vmatprep.subr.msk.mxu0 %vm2294_vm10, %v6345_v12  ;;  %vm2342_vm10 = vcmp.eq.s32.totalorder %v2278_v41, 0  ;;  %v2268_v41 = vand.u32 31, %v5949_v29 }
 0x311   :  { %4406 = vmatpush1.msk.msra.mxu0 %vm2293_vm11, %v6345_v12  ;;  %vm2341_vm11 = vcmp.eq.s32.totalorder %v2277_v44, 0  ;;  %6383 = vst [vmem:[#allocation20_spill] sm:$0xff] %v5955_v40  ;;  %v5960_v44 = vsub.s32 %v2141_v33, %v5677_v57  ;;  %v2267_v48 = vand.u32 31, %v5955_v40  ;;  %6385 = vst [vmem:[#allocation22_spill] sm:$0xff] %v5966_v42 }
 0x312   :  { %4407 = vmatprep.subr.msk.mxu0 %vm2292_vm12, %v6345_v12  ;;  %vm2340_vm12 = vcmp.eq.s32.totalorder %v2276_v45, 0  ;;  %v2140_v45 = vadd.s32 192, %v5671_v54 }
 0x313   :  { %4408 = vmatpush1.msk.msra.mxu0 %vm2291_vm13, %v6345_v12  ;;  %vm2339_vm13 = vcmp.eq.s32.totalorder %v2275_v43, 0  ;;  %6384 = vst [vmem:[#allocation21_spill] sm:$0xff] %v5960_v44  ;;  %v2266_v43 = vand.u32 31, %v5960_v44 }
 0x314   :  { %4409 = vmatprep.subr.msk.mxu0 %vm5847_vm14, %v6345_v12  ;;  %vm2338_vm14 = vcmp.eq.s32.totalorder %v2274_v5, 0  ;;  %v5971_v5 = vsub.s32 %v2140_v45, %v5677_v57 }
 0x315   :  { %4410 = vmatpush1.msk.msra.mxu0 %vm2289_vm15, %v6345_v12  ;;  %vm2337_vm15 = vcmp.eq.s32.totalorder %v2273_v8, 0  ;;  %v2265_v8 = vand.u32 31, %v5966_v42 }
 0x316   :  { %4411 = vmatprep.subr.msk.mxu0 %vm2288_vm0, %v6345_v12  ;;  %vm2336_vm0 = vcmp.eq.s32.totalorder %v2272_v10, 0  ;;  %6386 = vst [vmem:[#allocation23_spill] sm:$0xff] %v5971_v5  ;;  %v5977_v10 = vsub.s32 %v2140_v45, %v5673_v55  ;;  %v2264_v15 = vand.u32 31, %v5971_v5 }
 0x317   :  { %4412 = vmatpush1.msk.msra.mxu0 %vm2287_vm1, %v6345_v12  ;;  %vm2335_vm1 = vcmp.eq.s32.totalorder %v2271_v24, 0  ;;  %v5982_v24 = vsub.s32 %v2139_v7, %v5677_v57 }
 0x318   :  { %4413 = vmatprep.subr.msk.mxu0 %vm2286_vm2, %v6345_v12  ;;  %vm2334_vm2 = vcmp.eq.s32.totalorder %v2270_v27, 0  ;;  %6387 = vst [vmem:[#allocation24_spill] sm:$0xff] %v5977_v10  ;;  %v2138_v27 = vadd.s32 176, %v5671_v54  ;;  %v2263_v33 = vand.u32 31, %v5977_v10 }
 0x319   :  { %4414 = vmatpush1.msk.msra.mxu0 %vm2285_vm3, %v6345_v12  ;;  %vm2333_vm3 = vcmp.eq.s32.totalorder %v2269_v38, 0  ;;  %6388 = vst [vmem:[#allocation25_spill] sm:$0xff] %v5982_v24  ;;  %v5988_v38 = vsub.s32 %v2139_v7, %v5673_v55 }
 0x31a   :  { %4415 = vmatprep.subr.msk.mxu0 %vm2284_vm4, %v6345_v12  ;;  %vm2332_vm4 = vcmp.eq.s32.totalorder %v2268_v41, 0  ;;  %v2262_v41 = vand.u32 31, %v5982_v24  ;;  %v5993_v45 = vsub.s32 %v2138_v27, %v5677_v57 }
 0x31b   :  { %4416 = vmatpush1.msk.msra.mxu0 %vm2283_vm5, %v6345_v12  ;;  %vm2331_vm5 = vcmp.eq.s32.totalorder %v2267_v48, 0  ;;  %6389 = vst [vmem:[#allocation26_spill] sm:$0xff] %v5988_v38  ;;  %v2137_v48 = vadd.s32 168, %v5671_v54 }
 0x31c   :  { %4417 = vmatprep.subr.msk.mxu0 %vm2282_vm6, %v6345_v12  ;;  %vm2330_vm6 = vcmp.eq.s32.totalorder %v2266_v43, 0  ;;  %6390 = vst [vmem:[#allocation27_spill] sm:$0xff] %v5993_v45  ;;  %v2261_v43 = vand.u32 31, %v5988_v38  ;;  %v2260_v7 = vand.u32 31, %v5993_v45  ;;  %v2135_v45 = vadd.s32 152, %v5671_v54 }
 0x31d   :  { %4418 = vmatpush1.msk.msra.mxu0 %vm2281_vm7, %v6345_v12  ;;  %vm2329_vm7 = vcmp.eq.s32.totalorder %v2265_v8, 0  ;;  %v5999_v8 = vsub.s32 %v2138_v27, %v5673_v55  ;;  %v6010_v38 = vsub.s32 %v2137_v48, %v5673_v55 }
 0x31e   :  { %4419 = vmatprep.subr.msk.mxu0 %vm2280_vm8, %v6345_v12  ;;  %vm2328_vm8 = vcmp.eq.s32.totalorder %v2264_v15, 0  ;;  %v6004_v15 = vsub.s32 %v2137_v48, %v5677_v57 }
 0x31f   :  { %4420 = vmatpush1.msk.msra.mxu0 %vm2279_vm9, %v6345_v12  ;;  %vm2327_vm9 = vcmp.eq.s32.totalorder %v2263_v33, 0  ;;  %6391 = vst [vmem:[#allocation28_spill] sm:$0xff] %v5999_v8  ;;  %v2259_v33 = vand.u32 31, %v5999_v8  ;;  %6393 = vst [vmem:[#allocation30_spill] sm:$0xff] %v6010_v38  ;;  %v6021_v8 = vsub.s32 %v2136_v37, %v5673_v55 }
 0x320   :  { %4421 = vmatprep.subr.msk.mxu0 %vm2342_vm10, %v6345_v12  ;;  %vm2326_vm10 = vcmp.eq.s32.totalorder %v2262_v41, 0  ;;  %6392 = vst [vmem:[#allocation29_spill] sm:$0xff] %v6004_v15  ;;  %v2258_v27 = vand.u32 31, %v6004_v15  ;;  %v6015_v41 = vsub.s32 %v2136_v37, %v5677_v57  ;;  %v2134_v15 = vadd.s32 144, %v5671_v54 }
 0x321   :  { %4422 = vmatpush2.msk.msra.mxu0 %vm2341_vm11, %v6345_v12  ;;  %vm2325_vm11 = vcmp.eq.s32.totalorder %v2261_v43, 0  ;;  %v2257_v43 = vand.u32 31, %v6010_v38  ;;  %6395 = vst [vmem:[#allocation32_spill] sm:$0xff] %v6021_v8  ;;  %v6032_v38 = vsub.s32 %v2135_v45, %v5673_v55  ;;  %v2133_v37 = vadd.s32 136, %v5671_v54 }
 0x322   :  { %4423 = vmatprep.subr.msk.mxu0 %vm2340_vm12, %v6345_v12  ;;  %vm2324_vm12 = vcmp.eq.s32.totalorder %v2260_v7, 0  ;;  %6394 = vst [vmem:[#allocation31_spill] sm:$0xff] %v6015_v41  ;;  %v2256_v48 = vand.u32 31, %v6015_v41  ;;  %v6026_v7 = vsub.s32 %v2135_v45, %v5677_v57  ;;  %v6038_v41 = vsub.s32 %v2134_v15, %v5677_v57 }
 0x323   :  { %4424 = vmatpush2.msk.msra.mxu0 %vm2339_vm13, %v6345_v12  ;;  %vm2323_vm13 = vcmp.eq.s32.totalorder %v2259_v33, 0  ;;  %v2255_v33 = vand.u32 31, %v6021_v8  ;;  %6397 = vst [vmem:[#allocation34_spill] sm:$0xff] %v6032_v38  ;;  %v6041_v24 = vsub.s32 %v2134_v15, %v5673_v55  ;;  %v6046_v45 = vsub.s32 %v2133_v37, %v5677_v57 }
 0x324   :  { %4425 = vmatprep.subr.msk.mxu0 %vm2338_vm14, %v6345_v12  ;;  %vm2322_vm14 = vcmp.eq.s32.totalorder %v2258_v27, 0  ;;  %6396 = vst [vmem:[#allocation33_spill] sm:$0xff] %v6026_v7  ;;  %v2254_v27 = vand.u32 31, %v6026_v7  ;;  %6398 = vst [vmem:[#allocation35_spill] sm:$0xff] %v6038_v41  ;;  %v6049_v8 = vsub.s32 %v2133_v37, %v5673_v55  ;;  %v2132_v15 = vadd.s32 128, %v5671_v54 }
 0x325   :  { %4426 = vmatpush2.msk.msra.mxu0 %vm2337_vm15, %v6345_v12  ;;  %vm2321_vm15 = vcmp.eq.s32.totalorder %v2257_v43, 0  ;;  %6399 = vst [vmem:[#allocation36_spill] sm:$0xff] %v6041_v24  ;;  %v2253_v43 = vand.u32 31, %v6032_v38  ;;  %6400 = vst [vmem:[#allocation37_spill] sm:$0xff] %v6046_v45  ;;  %v2251_v7 = vand.u32 31, %v6041_v24 }
 0x326   :  { %4427 = vmatprep.subr.msk.mxu0 %vm2336_vm0, %v6345_v12  ;;  %vm2320_vm0 = vcmp.eq.s32.totalorder %v2256_v48, 0  ;;  %6401 = vst [vmem:[#allocation38_spill] sm:$0xff] %v6049_v8  ;;  %v2252_v48 = vand.u32 31, %v6038_v41  ;;  %v2249_v38 = vand.u32 31, %v6049_v8  ;;  %v6060_v37 = vsub.s32 %v2132_v15, %v5677_v57 }
 0x327   :  { %4428 = vmatpush2.msk.msra.mxu0 %vm2335_vm1, %v6345_v12  ;;  %vm2319_vm1 = vcmp.eq.s32.totalorder %v2255_v33, 0  ;;  %v2250_v33 = vand.u32 31, %v6046_v45 }
 0x328   :  { %4429 = vmatprep.subr.msk.mxu0 %vm2334_vm2, %v6345_v12  ;;  %vm2318_vm2 = vcmp.eq.s32.totalorder %v2254_v27, 0  ;;  %6402 = vst [vmem:[#allocation39_spill] sm:$0xff] %v6060_v37  ;;  %v6063_v27 = vsub.s32 %v2132_v15, %v5673_v55 }
 0x329   :  { %4430 = vmatpush2.msk.msra.mxu0 %vm2333_vm3, %v6345_v12  ;;  %vm2317_vm3 = vcmp.eq.s32.totalorder %v2253_v43, 0  ;;  %v2248_v43 = vand.u32 31, %v6060_v37 }
 0x32a   :  { %4431 = vmatprep.subr.msk.mxu0 %vm2332_vm4, %v6345_v12  ;;  %vm2316_vm4 = vcmp.eq.s32.totalorder %v2252_v48, 0  ;;  %6403 = vst [vmem:[#allocation40_spill] sm:$0xff] %v6063_v27  ;;  %v2247_v8 = vand.u32 31, %v6063_v27 }
 0x32b   :  { %4432 = vmatpush2.msk.msra.mxu0 %vm2331_vm5, %v6345_v12  ;;  %vm2315_vm5 = vcmp.eq.s32.totalorder %v2251_v7, 0 }
 0x32c   :  { %4433 = vmatprep.subr.msk.mxu0 %vm2330_vm6, %v6345_v12  ;;  %vm2314_vm6 = vcmp.eq.s32.totalorder %v2250_v33, 0 }
 0x32d   :  { %4434 = vmatpush2.msk.msra.mxu0 %vm2329_vm7, %v6345_v12  ;;  %vm2313_vm7 = vcmp.eq.s32.totalorder %v2249_v38, 0 }
 0x32e   :  { %4435 = vmatprep.subr.msk.mxu0 %vm2328_vm8, %v6345_v12  ;;  %vm2312_vm8 = vcmp.eq.s32.totalorder %v2248_v43, 0 }
 0x32f   :  { %4436 = vmatpush2.msk.msra.mxu0 %vm2327_vm9, %v6345_v12  ;;  %vm2311_vm9 = vcmp.eq.s32.totalorder %v2247_v8, 0 }
 0x330   :  { %4437 = vmatprep.subr.msk.mxu0 %vm2326_vm10, %v6345_v12  ;;  %vm2114_vm10 = vcmp.eq.s32.totalorder %v5671_v54, 0 }
 0x331   :  { %4438 = vmatpush2.msk.msra.mxu0 %vm2325_vm11, %v6345_v12 }
 0x332   :  { %4439 = vmatprep.subr.msk.mxu0 %vm2324_vm12, %v6345_v12 }
 0x333   :  { %4440 = vmatpush2.msk.msra.mxu0 %vm2323_vm13, %v6345_v12 }
 0x334   :  { %4441 = vmatprep.subr.msk.mxu0 %vm2322_vm14, %v6345_v12 }
 0x335   :  { %4442 = vmatpush2.msk.msra.mxu0 %vm2321_vm15, %v6345_v12  ;;  %vm2565_vm15 = vcmask 130048  }
 0x336   :  { %4443 = vmatprep.subr.msk.mxu0 %vm2320_vm0, %v6345_v12 }
 0x337   :  { %4444 = vmatpush2.msk.msra.mxu0 %vm2319_vm1, %v6345_v12 }
 0x338   :  { %4445 = vmatprep.subr.msk.mxu0 %vm2318_vm2, %v6345_v12 }
 0x339   :  { %4446 = vmatpush2.msk.msra.mxu0 %vm2317_vm3, %v6345_v12 }
 0x33a   :  { %4447 = vmatprep.subr.msk.mxu0 %vm2316_vm4, %v6345_v12 }
 0x33b   :  { %4448 = vmatpush2.msk.msra.mxu0 %vm2315_vm5, %v6345_v12 }
 0x33c   :  { %4449 = vmatprep.subr.msk.mxu0 %vm2314_vm6, %v6345_v12 }
 0x33d   :  { %4450 = vmatpush2.msk.msra.mxu0 %vm2313_vm7, %v6345_v12 }
 0x33e   :  { %4451 = vmatprep.subr.msk.mxu0 %vm2312_vm8, %v6345_v12 }
 0x33f   :  { %4452 = vmatpush2.msk.msra.mxu0 %vm2311_vm9, %v6345_v12 }
 0x380   :  { %v1942_v55 = vpop.f32.mrf.mxu0  ;;  %v1985_v57 = vpop.f32.mrf.mxu1 }
 0x381   :  { %v1986_v45 = vadd.f32 %v1985_v57, %v1942_v55 }
 0x382   :  { %v1944_v7 = vpop.f32.mrf.mxu0  ;;  %v1987_v38 = vpop.f32.mrf.mxu1 }
 0x383   :  { %v1988_v41 = vadd.f32 %v1987_v38, %v1944_v7 }
 0x384   :  { %v1946_v48 = vpop.f32.mrf.mxu0  ;;  %v1989_v15 = vpop.f32.mrf.mxu1 }
 0x385   :  { %v1990_v8 = vadd.f32 %v1989_v15, %v1946_v48 }
 0x386   :  { %v1948_v33 = vpop.f32.mrf.mxu0  ;;  %v1991_v37 = vpop.f32.mrf.mxu1 }
 0x387   :  { %v1992_v12 = vadd.f32 %v1991_v37, %v1948_v33 }
 0x3c0   :  { %v2028_v27 = vpop.f32.mrf.mxu0  ;;  %v2071_v24 = vpop.f32.mrf.mxu1 }
 0x3c1   :  { %v2029_v10 = vadd.f32 %v2028_v27, %v1986_v45 }
 0x3c2   :  { %v2030_v5 = vpop.f32.mrf.mxu0  ;;  %v2073_v43 = vpop.f32.mrf.mxu1 }
 0x3c3   :  { %v2031_v42 = vadd.f32 %v2030_v5, %v1988_v41  ;;  %v6073_v29 = vadd.f32 %v2071_v24, %v2029_v10 }
 0x3c4   :  { %v2032_v44 = vpop.f32.mrf.mxu0  ;;  %v2075_v40 = vpop.f32.mrf.mxu1 }
 0x3c5   :  { %v2033_v26 = vadd.f32 %v2032_v44, %v1990_v8  ;;  %v6075_v14 = vadd.f32 %v2073_v43, %v2031_v42  ;;  %v2094_v45 = vmul.f32 %v6073_v29, %v6073_v29 }
 0x3c6   :  { %v2034_v9 = vpop.f32.mrf.mxu0  ;;  %v2077_v57 = vpop.f32.mrf.mxu1 }
 0x3c7   :  { %v6077_v6 = vadd.f32 %v2075_v40, %v2033_v26  ;;  %v2035_v55 = vadd.f32 %v2034_v9, %v1992_v12  ;;  %v2095_v44 = vmul.f32 %v6075_v14, %v6075_v14 }
 0x3c9   :  { %v2080_v27 = vadd.f32 %v6077_v6, %v6073_v29  ;;  %v2096_v5 = vmul.f32 %v6077_v6, %v6077_v6  ;;  %v6085_v41 = vadd.f32 %v2077_v57, %v2035_v55 }
 0x3cb   :  { %v2081_v42 = vrot.slane %v2080_v27, 4  ;;  %v2098_v10 = vadd.f32 %v2096_v5, %v2094_v45  ;;  %v2087_v12 = vadd.f32 %v6085_v41, %v6075_v14  ;;  %v2097_v9 = vmul.f32 %v6085_v41, %v6085_v41 }
 0x3cd   :  { %v2082_v26 = vadd.f32 %v2081_v42, %v2080_v27  ;;  %v2099_v40 = vrot.slane %v2098_v10, 4  ;;  %v2088_v24 = vrot.slane %v2087_v12, 4  ;;  %v2105_v37 = vadd.f32 %v2097_v9, %v2095_v44  ;;  %v5046_v9 = vld [vmem:[#allocation5 + $0x170] ss:$8 sps:$4 sm:$0xff]  }
 0x3cf   :  { %v2083_v7 = vrot.slane %v2082_v26, 2  ;;  %v2100_v38 = vadd.f32 %v2099_v40, %v2098_v10  ;;  %v2089_v48 = vadd.f32 %v2088_v24, %v2087_v12  ;;  %v2106_v15 = vrot.slane %v2105_v37, 4  ;;  %v5052_v40 = vld [vmem:[#allocation5 + $0x160] ss:$8 sps:$4 sm:$0xff]   ;;  %v5054_v24 = vld [vmem:[#allocation5 + $0x164] ss:$8 sps:$4 sm:$0xff]  }
 0x3d1   :  { %v2101_v33 = vrot.slane %v2100_v38, 2  ;;  %v2090_v43 = vrot.slane %v2089_v48, 2  ;;  %v2107_v8 = vadd.f32 %v2106_v15, %v2105_v37  ;;  %v2084_v55 = vadd.f32 %v2083_v7, %v2082_v26  ;;  %v5048_v26 = vld [vmem:[#allocation5 + $0x174] ss:$8 sps:$4 sm:$0xff]   ;;  %v5076_v37 = vld [vmem:[#allocation5 + $0x120] ss:$8 sps:$4 sm:$0xff]  }
 0x3d2   :  { %3565 = vmatprep.subr.bf16.mxu0 %v5048_v26  ;;  %v5078_v7 = vld [vmem:[#allocation5 + $0x124] ss:$8 sps:$4 sm:$0xff]   ;;  %v5088_v15 = vld [vmem:[#allocation5 + $0x100] ss:$8 sps:$4 sm:$0xff]  }
 0x3d3   :  { %v2091_v57 = vadd.f32 %v2090_v43, %v2089_v48  ;;  %v2108_v45 = vrot.slane %v2107_v8, 2  ;;  %v2102_v5 = vadd.f32 %v2101_v33, %v2100_v38  ;;  %v2085_v39 = vrot.slane %v2084_v55, 1  ;;  %v5082_v38 = vld [vmem:[#allocation5 + $0x110] ss:$8 sps:$4 sm:$0xff]   ;;  %v5084_v48 = vld [vmem:[#allocation5 + $0x114] ss:$8 sps:$4 sm:$0xff]  }
 0x3d4   :  { %v5090_v33 = vld [vmem:[#allocation5 + $0x104] ss:$8 sps:$4 sm:$0xff]   ;;  %v5094_v43 = vld [vmem:[#allocation5 + $0x1f0] ss:$8 sps:$4 sm:$0xff]  }
 0x3d5   :  { %v2092_v59 = vrot.slane %v2091_v57, 1  ;;  %v2109_v56 = vadd.f32 %v2108_v45, %v2107_v8  ;;  %v2103_v49 = vrot.slane %v2102_v5, 1  ;;  %v2086_v44 = vadd.f32 %v2085_v39, %v2084_v55  ;;  %v5064_v39 = vld [vmem:[#allocation5 + $0x140] ss:$8 sps:$4 sm:$0xff]   ;;  %v5096_v8 = vld [vmem:[#allocation5 + $0x1f4] ss:$8 sps:$4 sm:$0xff]  }
 0x3d6   :  { %v5100_v55 = vld [vmem:[#allocation5 + $0x1e0] ss:$8 sps:$4 sm:$0xff]   ;;  %v5106_v45 = vld [vmem:[#allocation5 + $0x1d0] ss:$8 sps:$4 sm:$0xff]  }
 0x3d7   :  { %v2110_v34 = vrot.slane %v2109_v56, 1  ;;  %v2104_v27 = vadd.f32 %v2103_v49, %v2102_v5  ;;  %v2093_v42 = vadd.f32 %v2092_v59, %v2091_v57  ;;  %v5060_v49 = vld [vmem:[#allocation5 + $0x154] ss:$8 sps:$4 sm:$0xff]   ;;  %v5102_v57 = vld [vmem:[#allocation5 + $0x1e4] ss:$8 sps:$4 sm:$0xff]  }
 0x3d8   :  { %v5072_v59 = vld [vmem:[#allocation5 + $0x134] ss:$8 sps:$4 sm:$0xff]  }
 0x3d9   :  { %v2111_v32 = vadd.f32 %v2110_v34, %v2109_v56  ;;  %v2115_v12 = vsel %vm2114_vm10, %v2086_v44, %v2104_v27  ;;  %v5058_v34 = vld [vmem:[#allocation5 + $0x150] ss:$8 sps:$4 sm:$0xff]   ;;  %v5066_v56 = vld [vmem:[#allocation5 + $0x144] ss:$8 sps:$4 sm:$0xff]   ;;  %v5108_v5 = vld [vmem:[#allocation5 + $0x1d4] ss:$8 sps:$4 sm:$0xff]  }
 0x3da   :  { %v5112_v27 = vld [vmem:[#allocation5 + $0x1c0] ss:$8 sps:$4 sm:$0xff]   ;;  %v5118_v44 = vld [vmem:[#allocation5 + $0x1b0] ss:$8 sps:$4 sm:$0xff]  }
 0x3db   :  { %v2116_v10 = vsel %vm2114_vm10, %v2093_v42, %v2111_v32  ;;  %v5070_v32 = vld [vmem:[#allocation5 + $0x130] ss:$8 sps:$4 sm:$0xff]   ;;  %v5114_v42 = vld [vmem:[#allocation5 + $0x1c4] ss:$8 sps:$4 sm:$0xff]  }
 0x3dc   :  { %2471 = vmatprep.mubr.f32.mxu0 %v2116_v10  ;;  %v5120_v10 = vld [vmem:[#allocation5 + $0x1b4] ss:$8 sps:$4 sm:$0xff]  }
 0x3dd   :  { %2472 = vmatmul.mubr.f32.vlgmr.msra.gmra.mxu0 %v2115_v12 }
 0x3de   :  { %3566 = vmatpush1.bf16.msra.mxu0 %v5046_v9 }
 0x3df   :  { %3567 = vmatprep.subr.bf16.mxu0 %v5054_v24 }
 0x3e2   :  { %3568 = vmatpush1.bf16.msra.mxu0 %v5052_v40 }
 0x3e3   :  { %3569 = vmatprep.subr.bf16.mxu0 %v5060_v49 }
 0x3e6   :  { %3570 = vmatpush1.bf16.msra.mxu0 %v5058_v34 }
 0x3e7   :  { %3571 = vmatprep.subr.bf16.mxu0 %v5066_v56 }
 0x3ea   :  { %3572 = vmatpush1.bf16.msra.mxu0 %v5064_v39 }
 0x3eb   :  { %3573 = vmatprep.subr.bf16.mxu0 %v5072_v59 }
 0x3ee   :  { %3574 = vmatpush1.bf16.msra.mxu0 %v5070_v32 }
 0x3ef   :  { %3575 = vmatprep.subr.bf16.mxu0 %v5078_v7  ;;  %v6099_v7 = vsub.s32 0, %v5671_v54 }
 0x3f2   :  { %3576 = vmatpush1.bf16.msra.mxu0 %v5076_v37 }
 0x3f3   :  { %3577 = vmatprep.subr.bf16.mxu0 %v5084_v48  ;;  %v6103_v48 = vsub.s32 1, %v5671_v54 }
 0x3f6   :  { %3578 = vmatpush1.bf16.msra.mxu0 %v5082_v38 }
 0x3f7   :  { %3579 = vmatprep.subr.bf16.mxu0 %v5090_v33 }
 0x3fa   :  { %3580 = vmatpush1.bf16.msra.mxu0 %v5088_v15  ;;  %v2518_v15 = vld [vmem:[%s6314_s7] sm:$0x3] }
 0x3fb   :  { %3581 = vmatprep.subr.bf16.mxu0 %v5096_v8 }
 0x3fe   :  { %3582 = vmatpush2.bf16.msra.mxu0 %v5094_v43  ;;  %v2534_v43 = vld [vmem:[%s6315_s8] sm:$0x3] }
 0x3ff   :  { %3583 = vmatprep.subr.bf16.mxu0 %v5102_v57 }
 0x402   :  { %3584 = vmatpush2.bf16.msra.mxu0 %v5100_v55 }
 0x403   :  { %3585 = vmatprep.subr.bf16.mxu0 %v5108_v5  ;;  %v2523_v5 = vrot.slane %v2518_v15, %v6099_v7 }
 0x406   :  { %3586 = vmatpush2.bf16.msra.mxu0 %v5106_v45 }
 0x407   :  { %3587 = vmatprep.subr.bf16.mxu0 %v5114_v42 }
 0x40a   :  { %3588 = vmatpush2.bf16.msra.mxu0 %v5112_v27 }
 0x40b   :  { %3589 = vmatprep.subr.bf16.mxu0 %v5120_v10  ;;  %v2539_v10 = vrot.slane %v2534_v43, %v6099_v7 }
 0x40e   :  { %3590 = vmatpush2.bf16.msra.mxu0 %v5118_v44  ;;  %v2527_v44 = vrot.slane %v2518_v15, %v6103_v48 }
 0x49d   :  { %v2473_v12 = vpop.f32.mrf.mxu0 }
 0x49e   :  { %v2478_v9 = vmul.f32 0.0078125, %v2473_v12 }
 0x49f   :  { %v2475_v26 = vpop.f32.mrf.mxu0 }
 0x4a0   :  { %v2480_v40 = vmul.f32 %v2478_v9, %v2478_v9  ;;  %v2479_v24 = vmul.f32 0.0078125, %v2475_v26  ;;  %v2493_v38 = vrot.slane %v2478_v9, %v6099_v7 }
 0x4a2   :  { %v2484_v34 = vrot.slane %v2480_v40, 7  ;;  %v2481_v49 = vmul.f32 %v2479_v24, %v2479_v24  ;;  %v2497_v33 = vrot.slane %v2479_v24, %v6099_v7  ;;  %v2498_v55 = vsub.f32 %v6073_v29, %v2493_v38 }
 0x4a3   :  { %v2500_v57 = vsub.f32 %v6077_v6, %v2493_v38  ;;  %v2543_v29 = vrot.slane %v2534_v43, %v6103_v48 }
 0x4a4   :  { %v2488_v39 = vsub.f32 %v2478_v9, %v2484_v34  ;;  %v2485_v56 = vrot.slane %v2481_v49, 7  ;;  %v2499_v42 = vsub.f32 %v6075_v14, %v2497_v33  ;;  %v2501_v26 = vsub.f32 %v6085_v41, %v2497_v33 }
 0x4a6   :  { %v2502_v32 = vadd.f32 1e-05, %v2488_v39  ;;  %v2489_v59 = vsub.f32 %v2479_v24, %v2485_v56 }
 0x4a8   :  { %5229 = vrsqrt.f32 %v2502_v32  ;;  %v2503_v37 = vadd.f32 1e-05, %v2489_v59 }
 0x4aa   :  { %5231 = vrsqrt.f32 %v2503_v37 }
 0x4b5   :  { %v5230_v8 = vpop.eup %5229 }
 0x4b6   :  { %v2509_v45 = vrot.slane %v5230_v8, %v6103_v48 }
 0x4b7   :  { %v5232_v27 = vpop.eup %5231 }
 0x4b8   :  { %v2514_v12 = vmul.f32 %v2509_v45, %v2498_v55  ;;  %v2516_v9 = vmul.f32 %v2509_v45, %v2500_v57  ;;  %v2513_v40 = vrot.slane %v5232_v27, %v6103_v48  ;;  %v2564_v27 = vld [vmem:[%s6312_s5] sm:$0xf] }
 0x4ba   :  { %v2530_v6 = vmul.f32 %v2523_v5, %v2514_v12  ;;  %v2532_v24 = vmul.f32 %v2523_v5, %v2516_v9  ;;  %v2515_v34 = vmul.f32 %v2513_v40, %v2499_v42  ;;  %v2517_v49 = vmul.f32 %v2513_v40, %v2501_v26  ;;  %v5039_v12 = vld [vmem:[#allocation5 + $0x74] ss:$8 sps:$4 sm:$0xff]   ;;  %v4458_v9 = vld [vmem:[%s6312_s5 + $0xc] sm:$0xf]  ;;  %v5037_v26 = vld [vmem:[#allocation5 + $0x70] ss:$8 sps:$4 sm:$0xff]  }
 0x4bb   :  { %v6404_v42 = vmov 0   ;;  %v5042_v40 = vld [vmem:[#allocation5 + $0x64] ss:$8 sps:$4 sm:$0xff]  }
 0x4bc   :  { %v2531_v39 = vmul.f32 %v2527_v44, %v2515_v34  ;;  %v2533_v56 = vmul.f32 %v2527_v44, %v2517_v49  ;;  %v2546_v32 = vadd.f32 %v2539_v10, %v2530_v6  ;;  %v2548_v14 = vadd.f32 %v2539_v10, %v2532_v24  ;;  %v4454_v44 = vld [vmem:[%s6312_s5 + $0x4] sm:$0xf]  ;;  %v4456_v10 = vld [vmem:[%s6312_s5 + $0x8] sm:$0xf]  ;;  %v5045_v6 = vld [vmem:[#allocation5 + $0x54] ss:$8 sps:$4 sm:$0xff]  }
 0x4bd   :  { %v5043_v24 = vld [vmem:[#allocation5 + $0x50] ss:$8 sps:$4 sm:$0xff]   ;;  %v5051_v34 = vld [vmem:[#allocation5 + $0x44] ss:$8 sps:$4 sm:$0xff]   ;;  %v5049_v49 = vld [vmem:[#allocation5 + $0x40] ss:$8 sps:$4 sm:$0xff]  }
 0x4be   :  { %v2547_v59 = vadd.f32 %v2543_v29, %v2531_v39  ;;  %v2549_v37 = vadd.f32 %v2543_v29, %v2533_v56  ;;  %vm2550_vm11 = vcmp.ge.f32.partialorder %v2546_v32, 0.0  ;;  %vm2552_vm12 = vcmp.ge.f32.partialorder %v2548_v14, 0.0  ;;  %v5040_v29 = vld [vmem:[#allocation5 + $0x60] ss:$8 sps:$4 sm:$0xff]   ;;  %v5057_v39 = vld [vmem:[#allocation5 + $0x34] ss:$8 sps:$4 sm:$0xff]  }
 0x4bf   :  { %v2554_v38 = vmul.f32 0.01, %v2546_v32  ;;  %v2556_v15 = vmul.f32 0.01, %v2548_v14  ;;  %v5055_v56 = vld [vmem:[#allocation5 + $0x30] ss:$8 sps:$4 sm:$0xff]  }
 0x4c0   :  { %vm2551_vm13 = vcmp.ge.f32.partialorder %v2547_v59, 0.0  ;;  %vm2553_vm14 = vcmp.ge.f32.partialorder %v2549_v37, 0.0  ;;  %v2555_v41 = vmul.f32 0.01, %v2547_v59  ;;  %v2557_v33 = vmul.f32 0.01, %v2549_v37 }
 0x4c1   :  { %v2558_v8 = vsel %vm2550_vm11, %v2546_v32, %v2554_v38  ;;  %v2560_v43 = vsel %vm2552_vm12, %v2548_v14, %v2556_v15  ;;  %v5063_v32 = vld [vmem:[#allocation5 + $0x24] ss:$8 sps:$4 sm:$0xff]   ;;  %v5061_v14 = vld [vmem:[#allocation5 + $0x20] ss:$8 sps:$4 sm:$0xff]  }
 0x4c2   :  { %v2559_v55 = vsel %vm2551_vm13, %v2547_v59, %v2555_v41  ;;  %v2561_v57 = vsel %vm2553_vm14, %v2549_v37, %v2557_v33  ;;  %v2562_v5 = vpack.c.bf16 %v2560_v43, %v2558_v8  ;;  %v5069_v59 = vld [vmem:[#allocation5 + $0x14] ss:$8 sps:$4 sm:$0xff]   ;;  %v5067_v37 = vld [vmem:[#allocation5 + $0x10] ss:$8 sps:$4 sm:$0xff]   ;;  %v5075_v38 = vld [vmem:[#allocation5 + $0x4] ss:$8 sps:$4 sm:$0xff]  }
 0x4c3   :  { %v2563_v45 = vpack.c.bf16 %v2561_v57, %v2559_v55  ;;  %v5073_v15 = vld [vmem:[#allocation5] ss:$8 sps:$4 sm:$0xff]   ;;  %v5081_v41 = vld [vmem:[#allocation5 + $0xf4] ss:$8 sps:$4 sm:$0xff]   ;;  %v5079_v33 = vld [vmem:[#allocation5 + $0xf0] ss:$8 sps:$4 sm:$0xff]  }
 0x4c4   :  { %v5087_v8 = vld [vmem:[#allocation5 + $0xe4] ss:$8 sps:$4 sm:$0xff]   ;;  %v5085_v43 = vld [vmem:[#allocation5 + $0xe0] ss:$8 sps:$4 sm:$0xff]   ;;  %v5093_v55 = vld [vmem:[#allocation5 + $0xd4] ss:$8 sps:$4 sm:$0xff]  }
 0x4c5   :  { %2583 = vmatprep.subr.bf16.mxu1 %v2563_v45  ;;  %v5091_v57 = vld [vmem:[#allocation5 + $0xd0] ss:$8 sps:$4 sm:$0xff]  }
 0x4c6   :  { %2584 = vmatpush1.bf16.msra.mxu1 %v2562_v5 }
 0x4c7   :  { %2629 = vmatprep.subr.bf16.mxu1 %v2563_v45 }
 0x4c9   :  { %4453 = vmatmul.mubr.msk.bf16.vlgmr.msra.gmra.mxu1 %vm2565_vm15, %v2564_v27  ;;  %v5097_v27 = vld [vmem:[#allocation5 + $0xc0] ss:$8 sps:$4 sm:$0xff]  }
 0x4ca   :  { %2630 = vmatpush1.bf16.msra.mxu1 %v2562_v5  ;;  %2647 = vmatprep.mubr.bf16.mxu1 %v6404_v42 }
 0x4cb   :  { %2675 = vmatprep.subr.bf16.mxu1 %v2563_v45 }
 0x4d1   :  { %4455 = vmatmul.mubr.msk.bf16.vlgmr.msra.gmra.mxu1 %vm2565_vm15, %v4454_v44  ;;  %v5105_v44 = vld [vmem:[#allocation5 + $0xb4] ss:$8 sps:$4 sm:$0xff]  }
 0x4d2   :  { %2676 = vmatpush1.bf16.msra.mxu1 %v2562_v5  ;;  %2693 = vmatprep.mubr.bf16.mxu1 %v6404_v42 }
 0x4d3   :  { %2721 = vmatprep.subr.bf16.mxu1 %v2563_v45  ;;  %v5099_v45 = vld [vmem:[#allocation5 + $0xc4] ss:$8 sps:$4 sm:$0xff]  }
 0x4d9   :  { %4457 = vmatmul.mubr.msk.bf16.vlgmr.msra.gmra.mxu1 %vm2565_vm15, %v4456_v10  ;;  %v5129_v10 = vld [vmem:[#allocation5 + $0x194] ss:$8 sps:$4 sm:$0xff]  }
 0x4da   :  { %2722 = vmatpush1.bf16.msra.mxu1 %v2562_v5  ;;  %2739 = vmatprep.mubr.bf16.mxu1 %v6404_v42  ;;  %v5126_v5 = vld [vmem:[#allocation5 + $0x1a4] ss:$8 sps:$4 sm:$0xff]   ;;  %v5124_v42 = vld [vmem:[#allocation5 + $0x1a0] ss:$8 sps:$4 sm:$0xff]  }
 0x4db   :  { %3524 = vmatprep.subr.bf16.mxu1 %v5039_v12  ;;  %3591 = vmatprep.subr.bf16.mxu0 %v5126_v5  ;;  %v5103_v12 = vld [vmem:[#allocation5 + $0xb0] ss:$8 sps:$4 sm:$0xff]  }
 0x4dc   :  { %3592 = vmatpush2.bf16.msra.mxu0 %v5124_v42  ;;  %v5142_v42 = vld [vmem:[#allocation5 + $0x370] ss:$8 sps:$4 sm:$0xff]  }
 0x4dd   :  { %3593 = vmatprep.subr.bf16.mxu0 %v5129_v10 }
 0x4e1   :  { %4459 = vmatmul.mubr.msk.bf16.vlgmr.msra.gmra.mxu1 %vm2565_vm15, %v4458_v9  ;;  %v5127_v9 = vld [vmem:[#allocation5 + $0x190] ss:$8 sps:$4 sm:$0xff]  }
 0x4e2   :  { %3525 = vmatpush1.bf16.msra.mxu1 %v5037_v26  ;;  %v5111_v26 = vld [vmem:[#allocation5 + $0xa4] ss:$8 sps:$4 sm:$0xff]   ;;  %3594 = vmatpush2.bf16.msra.mxu0 %v5127_v9 }
 0x4e3   :  { %3526 = vmatprep.subr.bf16.mxu1 %v5042_v40  ;;  %v5135_v40 = vld [vmem:[#allocation5 + $0x184] ss:$8 sps:$4 sm:$0xff]  }
 0x4e4   :  { %3595 = vmatprep.subr.bf16.mxu0 %v5135_v40  ;;  %v5150_v9 = vld [vmem:[#allocation5 + $0x364] ss:$8 sps:$4 sm:$0xff]   ;;  %v5145_v40 = vld [vmem:[#allocation5 + $0x240] ss:$8 sps:$4 sm:$0xff]  }
 0x4e6   :  { %3527 = vmatpush1.bf16.msra.mxu1 %v5040_v29  ;;  %v5109_v29 = vld [vmem:[#allocation5 + $0xa0] ss:$8 sps:$4 sm:$0xff]  }
 0x4e7   :  { %3528 = vmatprep.subr.bf16.mxu1 %v5045_v6  ;;  %v5133_v6 = vld [vmem:[#allocation5 + $0x180] ss:$8 sps:$4 sm:$0xff]  }
 0x4e8   :  { %3596 = vmatpush2.bf16.msra.mxu0 %v5133_v6  ;;  %v5153_v6 = vld [vmem:[#allocation5 + $0x234] ss:$8 sps:$4 sm:$0xff]  }
 0x4ea   :  { %3529 = vmatpush1.bf16.msra.mxu1 %v5043_v24  ;;  %v5117_v24 = vld [vmem:[#allocation5 + $0x94] ss:$8 sps:$4 sm:$0xff]  }
 0x4eb   :  { %3530 = vmatprep.subr.bf16.mxu1 %v5051_v34  ;;  %v5144_v34 = vld [vmem:[#allocation5 + $0x374] ss:$8 sps:$4 sm:$0xff]  }
 0x4ec   :  { %3647 = vmatprep.subr.bf16.mxu0 %v5144_v34 }
 0x4ee   :  { %3531 = vmatpush1.bf16.msra.mxu1 %v5049_v49  ;;  %v5115_v49 = vld [vmem:[#allocation5 + $0x90] ss:$8 sps:$4 sm:$0xff]  }
 0x4ef   :  { %3532 = vmatprep.subr.bf16.mxu1 %v5057_v39  ;;  %v5123_v39 = vld [vmem:[#allocation5 + $0x84] ss:$8 sps:$4 sm:$0xff]  }
 0x4f2   :  { %3533 = vmatpush1.bf16.msra.mxu1 %v5055_v56  ;;  %v5121_v56 = vld [vmem:[#allocation5 + $0x80] ss:$8 sps:$4 sm:$0xff]  }
 0x4f3   :  { %3534 = vmatprep.subr.bf16.mxu1 %v5063_v32  ;;  %v5132_v32 = vld [vmem:[#allocation5 + $0x274] ss:$8 sps:$4 sm:$0xff]  }
 0x4f6   :  { %3535 = vmatpush1.bf16.msra.mxu1 %v5061_v14 }
 0x4f7   :  { %3536 = vmatprep.subr.bf16.mxu1 %v5069_v59 }
 0x4fa   :  { %3537 = vmatpush1.bf16.msra.mxu1 %v5067_v37 }
 0x4fb   :  { %3538 = vmatprep.subr.bf16.mxu1 %v5075_v38  ;;  %v5130_v38 = vld [vmem:[#allocation5 + $0x270] ss:$8 sps:$4 sm:$0xff]  }
 0x4fe   :  { %3539 = vmatpush1.bf16.msra.mxu1 %v5073_v15 }
 0x4ff   :  { %3540 = vmatprep.subr.bf16.mxu1 %v5081_v41 }
 0x502   :  { %3541 = vmatpush2.bf16.msra.mxu1 %v5079_v33  ;;  %v5138_v33 = vld [vmem:[#allocation5 + $0x264] ss:$8 sps:$4 sm:$0xff]  }
 0x503   :  { %3542 = vmatprep.subr.bf16.mxu1 %v5087_v8 }
 0x506   :  { %3543 = vmatpush2.bf16.msra.mxu1 %v5085_v43  ;;  %v5136_v43 = vld [vmem:[#allocation5 + $0x260] ss:$8 sps:$4 sm:$0xff]  }
 0x507   :  { %3544 = vmatprep.subr.bf16.mxu1 %v5093_v55 }
 0x50a   :  { %3545 = vmatpush2.bf16.msra.mxu1 %v5091_v57  ;;  %v5141_v57 = vld [vmem:[#allocation5 + $0x254] ss:$8 sps:$4 sm:$0xff]  }
 0x50b   :  { %3546 = vmatprep.subr.bf16.mxu1 %v5099_v45 }
 0x50e   :  { %3547 = vmatpush2.bf16.msra.mxu1 %v5097_v27  ;;  %v5139_v27 = vld [vmem:[#allocation5 + $0x250] ss:$8 sps:$4 sm:$0xff]  }
 0x50f   :  { %3548 = vmatprep.subr.bf16.mxu1 %v5105_v44 }
 0x512   :  { %3549 = vmatpush2.bf16.msra.mxu1 %v5103_v12  ;;  %v5147_v12 = vld [vmem:[#allocation5 + $0x244] ss:$8 sps:$4 sm:$0xff]  }
 0x513   :  { %3550 = vmatprep.subr.bf16.mxu1 %v5111_v26 }
 0x516   :  { %3551 = vmatpush2.bf16.msra.mxu1 %v5109_v29  ;;  %v5148_v29 = vld [vmem:[#allocation5 + $0x360] ss:$8 sps:$4 sm:$0xff]  }
 0x517   :  { %3552 = vmatprep.subr.bf16.mxu1 %v5117_v24  ;;  %v5156_v24 = vld [vmem:[#allocation5 + $0x354] ss:$8 sps:$4 sm:$0xff]  }
 0x51a   :  { %3553 = vmatpush2.bf16.msra.mxu1 %v5115_v49 }
 0x51b   :  { %3554 = vmatprep.subr.bf16.mxu1 %v5123_v39  ;;  %v5151_v39 = vld [vmem:[#allocation5 + $0x230] ss:$8 sps:$4 sm:$0xff]  }
 0x51e   :  { %3555 = vmatpush2.bf16.msra.mxu1 %v5121_v56  ;;  %v5154_v56 = vld [vmem:[#allocation5 + $0x350] ss:$8 sps:$4 sm:$0xff]  }
 0x51f   :  { %3606 = vmatprep.subr.bf16.mxu1 %v5132_v32 }
 0x589   :  { %v2603_v14 = vpop.f32.mrf.mxu1 }
 0x58a   :  { %v2748_v15 = vpack.c.bf16 %v2603_v14, %v2603_v14  ;;  %v5159_v14 = vld [vmem:[#allocation5 + $0x224] ss:$8 sps:$4 sm:$0xff]  }
 0x58b   :  { %v2605_v59 = vpop.f32.mrf.mxu1 }
 0x58c   :  { %v2749_v37 = vpack.c.bf16 %v2605_v59, %v2605_v59  ;;  %v5162_v59 = vld [vmem:[#allocation5 + $0x344] ss:$8 sps:$4 sm:$0xff]  }
 0x58d   :  { %v2607_v41 = vpop.f32.mrf.mxu1 }
 0x58e   :  { %3556 = vmatprep.mubr.bf16.mxu1 %v2749_v37  ;;  %v5160_v41 = vld [vmem:[#allocation5 + $0x340] ss:$8 sps:$4 sm:$0xff]  }
 0x58f   :  { %v2608_v8 = vpop.f32.mrf.mxu1  ;;  %3557 = vmatmul.mubr.bf16.vlgmr.msra.gmra.mxu1 %v2748_v15  ;;  %v5157_v15 = vld [vmem:[#allocation5 + $0x220] ss:$8 sps:$4 sm:$0xff]  }
 0x590   :  { %3607 = vmatpush1.bf16.msra.mxu1 %v5130_v38  ;;  %v5168_v8 = vld [vmem:[#allocation5 + $0x334] ss:$8 sps:$4 sm:$0xff]  }
 0x591   :  { %v2649_v55 = vpop.f32.mrf.mxu1  ;;  %3608 = vmatprep.subr.bf16.mxu1 %v5138_v33  ;;  %v5165_v33 = vld [vmem:[#allocation5 + $0x214] ss:$8 sps:$4 sm:$0xff]  }
 0x592   :  { %v2750_v44 = vpack.c.bf16 %v2649_v55, %v2649_v55 }
 0x593   :  { %v2651_v45 = vpop.f32.mrf.mxu1 }
 0x594   :  { %v2751_v5 = vpack.c.bf16 %v2651_v45, %v2651_v45  ;;  %3609 = vmatpush1.bf16.msra.mxu1 %v5136_v43  ;;  %v5166_v45 = vld [vmem:[#allocation5 + $0x330] ss:$8 sps:$4 sm:$0xff]  }
 0x595   :  { %v2653_v10 = vpop.f32.mrf.mxu1  ;;  %3610 = vmatprep.subr.bf16.mxu1 %v5141_v57  ;;  %v5163_v57 = vld [vmem:[#allocation5 + $0x210] ss:$8 sps:$4 sm:$0xff]  }
 0x596   :  { %3597 = vmatprep.mubr.bf16.mxu0 %v2751_v5 }
 0x597   :  { %v2654_v26 = vpop.f32.mrf.mxu1  ;;  %3598 = vmatmul.mubr.bf16.vlgmr.msra.gmra.mxu0 %v2750_v44 }
 0x598   :  { %3611 = vmatpush1.bf16.msra.mxu1 %v5139_v27  ;;  %3648 = vmatpush1.bf16.msra.mxu0 %v5142_v42  ;;  %v5171_v27 = vld [vmem:[#allocation5 + $0x204] ss:$8 sps:$4 sm:$0xff]   ;;  %v5177_v26 = vld [vmem:[#allocation5 + $0x2f4] ss:$8 sps:$4 sm:$0xff]  }
 0x599   :  { %3612 = vmatprep.subr.bf16.mxu1 %v5147_v12  ;;  %3649 = vmatprep.subr.bf16.mxu0 %v5150_v9  ;;  %v6141_v34 = vpop.f32.mrf.mxu1  ;;  %v5174_v42 = vld [vmem:[#allocation5 + $0x324] ss:$8 sps:$4 sm:$0xff]   ;;  %v5169_v12 = vld [vmem:[#allocation5 + $0x200] ss:$8 sps:$4 sm:$0xff]  }
 0x59a   :  { %v5172_v9 = vld [vmem:[#allocation5 + $0x320] ss:$8 sps:$4 sm:$0xff]  }
 0x59b   :  { %v2697_v49 = vpop.f32.mrf.mxu1 }
 0x59c   :  { %3613 = vmatpush1.bf16.msra.mxu1 %v5145_v40  ;;  %3650 = vmatpush1.bf16.msra.mxu0 %v5148_v29  ;;  %v2753_v32 = vpack.c.bf16 %v2697_v49, %v2697_v49  ;;  %v5180_v40 = vld [vmem:[#allocation5 + $0x314] ss:$8 sps:$4 sm:$0xff]   ;;  %v5175_v29 = vld [vmem:[#allocation5 + $0x2f0] ss:$8 sps:$4 sm:$0xff]   ;;  %v5186_v49 = vld [vmem:[#allocation5 + $0x304] ss:$8 sps:$4 sm:$0xff]  }
 0x59d   :  { %3614 = vmatprep.subr.bf16.mxu1 %v5153_v6  ;;  %3651 = vmatprep.subr.bf16.mxu0 %v5156_v24  ;;  %v2699_v37 = vpop.f32.mrf.mxu1  ;;  %v5178_v6 = vld [vmem:[#allocation5 + $0x310] ss:$8 sps:$4 sm:$0xff]   ;;  %v5183_v24 = vld [vmem:[#allocation5 + $0x2e4] ss:$8 sps:$4 sm:$0xff]  }
 0x59e   :  { %3638 = vmatprep.mubr.bf16.mxu1 %v2753_v32  ;;  %v5189_v32 = vld [vmem:[#allocation5 + $0x2d4] ss:$8 sps:$4 sm:$0xff]   ;;  %v5190_v37 = vld [vmem:[#allocation5 + $0x3f0] ss:$8 sps:$4 sm:$0xff]  }
 0x59f   :  { %v2700_v38 = vpop.f32.mrf.mxu1 }
 0x5a0   :  { %3615 = vmatpush1.bf16.msra.mxu1 %v5151_v39  ;;  %3652 = vmatpush1.bf16.msra.mxu0 %v5154_v56  ;;  %v5181_v39 = vld [vmem:[#allocation5 + $0x2e0] ss:$8 sps:$4 sm:$0xff]   ;;  %v5195_v38 = vld [vmem:[#allocation5 + $0x2c4] ss:$8 sps:$4 sm:$0xff]  }
 0x5a1   :  { %3616 = vmatprep.subr.bf16.mxu1 %v5159_v14  ;;  %3653 = vmatprep.subr.bf16.mxu0 %v5162_v59  ;;  %v6143_v43 = vpop.f32.mrf.mxu1  ;;  %v5184_v56 = vld [vmem:[#allocation5 + $0x300] ss:$8 sps:$4 sm:$0xff]   ;;  %v5192_v14 = vld [vmem:[#allocation5 + $0x3f4] ss:$8 sps:$4 sm:$0xff]   ;;  %v5187_v59 = vld [vmem:[#allocation5 + $0x2d0] ss:$8 sps:$4 sm:$0xff]  }
 0x5a3   :  { %v2743_v55 = vpop.f32.mrf.mxu1 }
 0x5a4   :  { %3617 = vmatpush1.bf16.msra.mxu1 %v5157_v15  ;;  %3654 = vmatpush1.bf16.msra.mxu0 %v5160_v41  ;;  %v2755_v5 = vpack.c.bf16 %v2743_v55, %v2743_v55  ;;  %v5198_v15 = vld [vmem:[#allocation5 + $0x3e4] ss:$8 sps:$4 sm:$0xff]   ;;  %v5193_v41 = vld [vmem:[#allocation5 + $0x2c0] ss:$8 sps:$4 sm:$0xff]   ;;  %v5204_v55 = vld [vmem:[#allocation5 + $0x3d4] ss:$8 sps:$4 sm:$0xff]  }
 0x5a5   :  { %3618 = vmatprep.subr.bf16.mxu1 %v5165_v33  ;;  %3655 = vmatprep.subr.bf16.mxu0 %v5168_v8  ;;  %v2745_v44 = vpop.f32.mrf.mxu1  ;;  %v5196_v33 = vld [vmem:[#allocation5 + $0x3e0] ss:$8 sps:$4 sm:$0xff]   ;;  %v5201_v8 = vld [vmem:[#allocation5 + $0x2b4] ss:$8 sps:$4 sm:$0xff]  }
 0x5a6   :  { %3679 = vmatprep.mubr.bf16.mxu0 %v2755_v5  ;;  %v5207_v5 = vld [vmem:[#allocation5 + $0x2a4] ss:$8 sps:$4 sm:$0xff]   ;;  %v5208_v44 = vld [vmem:[#allocation5 + $0x3c0] ss:$8 sps:$4 sm:$0xff]  }
 0x5a7   :  { %v2746_v10 = vpop.f32.mrf.mxu1 }
 0x5a8   :  { %3619 = vmatpush1.bf16.msra.mxu1 %v5163_v57  ;;  %3656 = vmatpush1.bf16.msra.mxu0 %v5166_v45  ;;  %v5199_v57 = vld [vmem:[#allocation5 + $0x2b0] ss:$8 sps:$4 sm:$0xff]   ;;  %v5213_v10 = vld [vmem:[#allocation5 + $0x294] ss:$8 sps:$4 sm:$0xff]  }
 0x5a9   :  { %3620 = vmatprep.subr.bf16.mxu1 %v5171_v27  ;;  %3657 = vmatprep.subr.bf16.mxu0 %v5174_v42  ;;  %v5202_v45 = vld [vmem:[#allocation5 + $0x3d0] ss:$8 sps:$4 sm:$0xff]   ;;  %v5210_v27 = vld [vmem:[#allocation5 + $0x3c4] ss:$8 sps:$4 sm:$0xff]   ;;  %v5205_v42 = vld [vmem:[#allocation5 + $0x2a0] ss:$8 sps:$4 sm:$0xff]  }
 0x5ac   :  { %3621 = vmatpush1.bf16.msra.mxu1 %v5169_v12  ;;  %3658 = vmatpush1.bf16.msra.mxu0 %v5172_v9  ;;  %v5216_v12 = vld [vmem:[#allocation5 + $0x3b4] ss:$8 sps:$4 sm:$0xff]   ;;  %v5211_v9 = vld [vmem:[#allocation5 + $0x290] ss:$8 sps:$4 sm:$0xff]  }
 0x5ad   :  { %3622 = vmatprep.subr.bf16.mxu1 %v5177_v26  ;;  %3659 = vmatprep.subr.bf16.mxu0 %v5180_v40  ;;  %v5214_v26 = vld [vmem:[#allocation5 + $0x3b0] ss:$8 sps:$4 sm:$0xff]   ;;  %v5219_v40 = vld [vmem:[#allocation5 + $0x284] ss:$8 sps:$4 sm:$0xff]  }
 0x5b0   :  { %3623 = vmatpush2.bf16.msra.mxu1 %v5175_v29  ;;  %3660 = vmatpush1.bf16.msra.mxu0 %v5178_v6  ;;  %v5222_v29 = vld [vmem:[#allocation5 + $0x3a4] ss:$8 sps:$4 sm:$0xff]   ;;  %v5217_v6 = vld [vmem:[#allocation5 + $0x280] ss:$8 sps:$4 sm:$0xff]  }
 0x5b1   :  { %3624 = vmatprep.subr.bf16.mxu1 %v5183_v24  ;;  %3661 = vmatprep.subr.bf16.mxu0 %v5186_v49  ;;  %v5220_v24 = vld [vmem:[#allocation5 + $0x3a0] ss:$8 sps:$4 sm:$0xff]   ;;  %v5225_v49 = vld [vmem:[#allocation5 + $0x394] ss:$8 sps:$4 sm:$0xff]  }
 0x5b4   :  { %3625 = vmatpush2.bf16.msra.mxu1 %v5181_v39  ;;  %3662 = vmatpush1.bf16.msra.mxu0 %v5184_v56  ;;  %v5223_v39 = vld [vmem:[#allocation5 + $0x390] ss:$8 sps:$4 sm:$0xff]   ;;  %v2752_v56 = vpack.c.bf16 %v6141_v34, %v6141_v34  ;;  %v3743_v34 = vand.u32 63, %v5698_v0  ;;  %v3736_v0 = vand.u32 63, %v5741_v19  ;;  %v3729_v19 = vand.u32 63, %v5804_v46 }
 0x5b5   :  { %3626 = vmatprep.subr.bf16.mxu1 %v5189_v32  ;;  %3663 = vmatprep.subr.bf16.mxu0 %v5192_v14  ;;  %v5228_v32 = vld [vmem:[#allocation5 + $0x384] ss:$8 sps:$4 sm:$0xff]   ;;  %v5226_v14 = vld [vmem:[#allocation5 + $0x380] ss:$8 sps:$4 sm:$0xff]   ;;  %v3722_v46 = vand.u32 63, %v5840_v4 }
 0x5b6   :  { %vm3807_vm4 = vcmp.eq.s32.totalorder %v3743_v34, 0  ;;  %vm3800_vm12 = vcmp.eq.s32.totalorder %v3736_v0, 0  ;;  %v6406_v4 = vld [vmem:[#allocation9_spill] sm:$0xff] }
 0x5b7   :  { %v6422_v34 = vld [vmem:[#allocation25_spill] sm:$0xff] }
 0x5b8   :  { %3627 = vmatpush2.bf16.msra.mxu1 %v5187_v59  ;;  %3664 = vmatpush2.bf16.msra.mxu0 %v5190_v37  ;;  %v2754_v59 = vpack.c.bf16 %v6143_v43, %v6143_v43  ;;  %v3747_v37 = vand.u32 63, %v5686_v60  ;;  %v3740_v60 = vand.u32 63, %v5707_v3  ;;  %v3733_v3 = vand.u32 63, %v5766_v30 }
 0x5b9   :  { %3628 = vmatprep.subr.bf16.mxu1 %v5195_v38  ;;  %3665 = vmatprep.subr.bf16.mxu0 %v5198_v15  ;;  %v3746_v38 = vand.u32 63, %v5689_v61  ;;  %v3745_v15 = vand.u32 63, %v5692_v62  ;;  %v3739_v61 = vand.u32 63, %v5732_v16  ;;  %v3738_v62 = vand.u32 63, %v5735_v17 }
 0x5ba   :  { %vm3811_vm0 = vcmp.eq.s32.totalorder %v3747_v37, 0  ;;  %vm3804_vm7 = vcmp.eq.s32.totalorder %v3740_v60, 0  ;;  %v3732_v16 = vand.u32 63, %v5769_v31  ;;  %v3731_v17 = vand.u32 63, %v5787_v35  ;;  %v6420_v37 = vld [vmem:[#allocation23_spill] sm:$0xff] }
 0x5bb   :  { %vm3810_vm1 = vcmp.eq.s32.totalorder %v3746_v38, 0  ;;  %vm3809_vm2 = vcmp.eq.s32.totalorder %v3745_v15, 0  ;;  %vm3803_vm8 = vcmp.eq.s32.totalorder %v3739_v61, 0  ;;  %vm3802_vm9 = vcmp.eq.s32.totalorder %v3738_v62, 0  ;;  %v6421_v15 = vld [vmem:[#allocation24_spill] sm:$0xff]  ;;  %v6424_v61 = vld [vmem:[#allocation27_spill] sm:$0xff] }
 0x5bc   :  { %3629 = vmatpush2.bf16.msra.mxu1 %v5193_v41  ;;  %3666 = vmatpush2.bf16.msra.mxu0 %v5196_v33  ;;  %v3744_v41 = vand.u32 63, %v5695_v63  ;;  %v3742_v33 = vand.u32 63, %v5701_v1  ;;  %v3737_v63 = vand.u32 63, %v5738_v18  ;;  %v3735_v1 = vand.u32 63, %v5749_v21 }
 0x5bd   :  { %3630 = vmatprep.subr.bf16.mxu1 %v5201_v8  ;;  %3667 = vmatprep.subr.bf16.mxu0 %v5204_v55  ;;  %v3741_v8 = vand.u32 63, %v5704_v2  ;;  %v6405_v55 = vmov 1.0   ;;  %v3734_v2 = vand.u32 63, %v5752_v22  ;;  %v3730_v18 = vand.u32 63, %v5790_v36 }
 0x5be   :  { %vm3808_vm3 = vcmp.eq.s32.totalorder %v3744_v41, 0  ;;  %vm3806_vm5 = vcmp.eq.s32.totalorder %v3742_v33, 0  ;;  %vm3801_vm11 = vcmp.eq.s32.totalorder %v3737_v63, 0  ;;  %vm3799_vm13 = vcmp.eq.s32.totalorder %v3735_v1, 0  ;;  %v6425_v63 = vld [vmem:[#allocation28_spill] sm:$0xff]  ;;  %v6426_v1 = vld [vmem:[#allocation29_spill] sm:$0xff] }
 0x5bf   :  { %vm3805_vm6 = vcmp.eq.s32.totalorder %v3741_v8, 0  ;;  %vm3798_vm14 = vcmp.eq.s32.totalorder %v3734_v2, 0  ;;  %vm3797_vm15 = vcmp.eq.s32.totalorder %v3733_v3, 0  ;;  %v3728_v21 = vand.u32 63, %v5807_v47  ;;  %v6423_v8 = vld [vmem:[#allocation26_spill] sm:$0xff] }
 0x5c0   :  { %3631 = vmatpush2.bf16.msra.mxu1 %v5199_v57  ;;  %3668 = vmatpush2.bf16.msra.mxu0 %v5202_v45  ;;  %v3727_v22 = vand.u32 63, %v5815_v52  ;;  %v3726_v30 = vand.u32 63, %v5818_v53  ;;  %v3725_v31 = vand.u32 63, %v5823_v58  ;;  %v3724_v35 = vand.u32 63, %v5831_v50  ;;  %v6410_v57 = vld [vmem:[#allocation13_spill] sm:$0xff]  ;;  %v6427_v3 = vld [vmem:[#allocation30_spill] sm:$0xff] }
 0x5c1   :  { %3632 = vmatprep.subr.bf16.mxu1 %v5207_v5  ;;  %3669 = vmatprep.subr.bf16.mxu0 %v5210_v27  ;;  %v3723_v36 = vand.u32 63, %v5835_v51  ;;  %v3721_v47 = vand.u32 63, %v5855_v11  ;;  %v3720_v52 = vand.u32 63, %v5858_v13  ;;  %v3719_v53 = vand.u32 63, %v5864_v20  ;;  %v6407_v13 = vld [vmem:[#allocation10_spill] sm:$0xff] }
 0x5c2   :  { %v3718_v58 = vand.u32 63, %v5867_v23  ;;  %v3717_v50 = vand.u32 63, %v5873_v25  ;;  %v3716_v51 = vand.u32 63, %v5882_v28  ;;  %v3779_v11 = vand.u32 63, %v6406_v4  ;;  %v6408_v23 = vld [vmem:[#allocation11_spill] sm:$0xff]  ;;  %v6409_v28 = vld [vmem:[#allocation12_spill] sm:$0xff] }
 0x5c3   :  { %v3778_v20 = vand.u32 63, %v6407_v13  ;;  %v3777_v25 = vand.u32 63, %v6408_v23  ;;  %v3776_v43 = vand.u32 63, %v6409_v28  ;;  %v3775_v45 = vand.u32 63, %v6410_v57  ;;  %v6411_v5 = vld [vmem:[#allocation14_spill] sm:$0xff]  ;;  %v6436_v4 = vld [vmem:[#allocation39_spill] sm:$0xff] }
 0x5c4   :  { %3633 = vmatpush2.bf16.msra.mxu1 %v5205_v42  ;;  %3670 = vmatpush2.bf16.msra.mxu0 %v5208_v44  ;;  %v3774_v27 = vand.u32 63, %v6411_v5  ;;  %v6412_v42 = vld [vmem:[#allocation15_spill] sm:$0xff]  ;;  %v3765_v38 = vand.u32 63, %v6420_v37  ;;  %v3764_v41 = vand.u32 63, %v6421_v15  ;;  %v3763_v33 = vand.u32 63, %v6422_v34  ;;  %v6437_v13 = vld [vmem:[#allocation40_spill] sm:$0xff] }
 0x5c5   :  { %3634 = vmatprep.subr.bf16.mxu1 %v5213_v10  ;;  %3671 = vmatprep.subr.bf16.mxu0 %v5216_v12  ;;  %v3773_v44 = vand.u32 63, %v6412_v42  ;;  %v6413_v10 = vld [vmem:[#allocation16_spill] sm:$0xff]  ;;  %v3762_v60 = vand.u32 63, %v6423_v8  ;;  %v3761_v62 = vand.u32 63, %v6424_v61  ;;  %v3760_v0 = vand.u32 63, %v6425_v63 }
 0x5c6   :  { %v3772_v12 = vand.u32 63, %v6413_v10  ;;  %v3759_v2 = vand.u32 63, %v6426_v1 }
 0x5c8   :  { %3635 = vmatpush2.bf16.msra.mxu1 %v5211_v9  ;;  %3672 = vmatpush2.bf16.msra.mxu0 %v5214_v26  ;;  %v6414_v9 = vld [vmem:[#allocation17_spill] sm:$0xff] }
 0x5c9   :  { %3636 = vmatprep.subr.bf16.mxu1 %v5219_v40  ;;  %3673 = vmatprep.subr.bf16.mxu0 %v5222_v29  ;;  %v3771_v26 = vand.u32 63, %v6414_v9  ;;  %v6415_v40 = vld [vmem:[#allocation18_spill] sm:$0xff] }
 0x5ca   :  { %v3770_v29 = vand.u32 63, %v6415_v40 }
 0x5cc   :  { %3637 = vmatpush2.bf16.msra.mxu1 %v5217_v6  ;;  %3674 = vmatpush2.bf16.msra.mxu0 %v5220_v24  ;;  %v6416_v6 = vld [vmem:[#allocation19_spill] sm:$0xff] }
 0x5cd   :  { %3675 = vmatprep.subr.bf16.mxu0 %v5225_v49  ;;  %4588 = vmatprep.subr.msk.mxu1 %vm3811_vm0, %v6405_v55  ;;  %vm3796_vm0 = vcmp.eq.s32.totalorder %v3732_v16, 0  ;;  %v3769_v24 = vand.u32 63, %v6416_v6  ;;  %v6417_v49 = vld [vmem:[#allocation20_spill] sm:$0xff]  ;;  %v3758_v16 = vand.u32 63, %v6427_v3 }
 0x5cf   :  { %3639 = vmatmul.mubr.bf16.vlgmr.msra.gmra.mxu1 %v2752_v56  ;;  %v6418_v56 = vld [vmem:[#allocation21_spill] sm:$0xff] }
 0x5d0   :  { %3676 = vmatpush2.bf16.msra.mxu0 %v5223_v39  ;;  %4589 = vmatpush1.msk.msra.mxu1 %vm3810_vm1, %v6405_v55  ;;  %vm3795_vm1 = vcmp.eq.s32.totalorder %v3731_v17, 0  ;;  %v3768_v39 = vand.u32 63, %v6417_v49  ;;  %v6428_v17 = vld [vmem:[#allocation31_spill] sm:$0xff] }
 0x5d1   :  { %3677 = vmatprep.subr.bf16.mxu0 %v5228_v32  ;;  %4590 = vmatprep.subr.msk.mxu1 %vm3809_vm2, %v6405_v55  ;;  %vm3794_vm2 = vcmp.eq.s32.totalorder %v3730_v18, 0  ;;  %v3767_v32 = vand.u32 63, %v6418_v56  ;;  %v3757_v18 = vand.u32 63, %v6428_v17 }
 0x5d2   :  { %4591 = vmatpush1.msk.msra.mxu1 %vm3808_vm3, %v6405_v55  ;;  %vm3793_vm3 = vcmp.eq.s32.totalorder %v3729_v19, 0  ;;  %v6429_v19 = vld [vmem:[#allocation32_spill] sm:$0xff] }
 0x5d3   :  { %4592 = vmatprep.subr.msk.mxu1 %vm3807_vm4, %v6405_v55  ;;  %vm3792_vm4 = vcmp.eq.s32.totalorder %v3728_v21, 0  ;;  %v3756_v21 = vand.u32 63, %v6429_v19 }
 0x5d4   :  { %3678 = vmatpush2.bf16.msra.mxu0 %v5226_v14  ;;  %4593 = vmatpush1.msk.msra.mxu1 %vm3806_vm5, %v6405_v55  ;;  %vm3791_vm5 = vcmp.eq.s32.totalorder %v3727_v22, 0  ;;  %v6419_v14 = vld [vmem:[#allocation22_spill] sm:$0xff]  ;;  %v6430_v22 = vld [vmem:[#allocation33_spill] sm:$0xff] }
 0x5d5   :  { %4594 = vmatprep.subr.msk.mxu1 %vm3805_vm6, %v6405_v55  ;;  %vm3790_vm6 = vcmp.eq.s32.totalorder %v3726_v30, 0  ;;  %v3755_v30 = vand.u32 63, %v6430_v22 }
 0x5d6   :  { %4595 = vmatpush1.msk.msra.mxu1 %vm3804_vm7, %v6405_v55  ;;  %vm3789_vm7 = vcmp.eq.s32.totalorder %v3725_v31, 0  ;;  %v6431_v31 = vld [vmem:[#allocation34_spill] sm:$0xff] }
 0x5d7   :  { %3680 = vmatmul.mubr.bf16.vlgmr.msra.gmra.mxu0 %v2754_v59  ;;  %4596 = vmatprep.subr.msk.mxu1 %vm3803_vm8, %v6405_v55  ;;  %vm3788_vm8 = vcmp.eq.s32.totalorder %v3724_v35, 0  ;;  %v3766_v59 = vand.u32 63, %v6419_v14  ;;  %v3754_v35 = vand.u32 63, %v6431_v31 }
 0x5d8   :  { %4597 = vmatpush1.msk.msra.mxu1 %vm3802_vm9, %v6405_v55  ;;  %vm3787_vm9 = vcmp.eq.s32.totalorder %v3723_v36, 0  ;;  %v6432_v36 = vld [vmem:[#allocation35_spill] sm:$0xff] }
 0x5d9   :  { %4598 = vmatprep.subr.msk.mxu1 %vm3801_vm11, %v6405_v55  ;;  %vm3786_vm11 = vcmp.eq.s32.totalorder %v3722_v46, 0  ;;  %v3753_v46 = vand.u32 63, %v6432_v36 }
 0x5da   :  { %4599 = vmatpush1.msk.msra.mxu1 %vm3800_vm12, %v6405_v55  ;;  %vm3785_vm12 = vcmp.eq.s32.totalorder %v3721_v47, 0  ;;  %v6433_v47 = vld [vmem:[#allocation36_spill] sm:$0xff] }
 0x5db   :  { %4600 = vmatprep.subr.msk.mxu1 %vm3799_vm13, %v6405_v55  ;;  %vm3784_vm13 = vcmp.eq.s32.totalorder %v3720_v52, 0  ;;  %v3752_v52 = vand.u32 63, %v6433_v47 }
 0x5dc   :  { %4601 = vmatpush1.msk.msra.mxu1 %vm3798_vm14, %v6405_v55  ;;  %vm3783_vm14 = vcmp.eq.s32.totalorder %v3719_v53, 0  ;;  %v6434_v53 = vld [vmem:[#allocation37_spill] sm:$0xff] }
 0x5dd   :  { %4602 = vmatprep.subr.msk.mxu1 %vm3797_vm15, %v6405_v55  ;;  %vm3782_vm15 = vcmp.eq.s32.totalorder %v3718_v58, 0  ;;  %v3751_v58 = vand.u32 63, %v6434_v53 }
 0x5de   :  { %4603 = vmatpush1.msk.msra.mxu1 %vm3796_vm0, %v6405_v55  ;;  %vm3781_vm0 = vcmp.eq.s32.totalorder %v3717_v50, 0  ;;  %v6435_v50 = vld [vmem:[#allocation38_spill] sm:$0xff] }
 0x5df   :  { %4604 = vmatprep.subr.msk.mxu1 %vm3795_vm1, %v6405_v55  ;;  %vm3780_vm1 = vcmp.eq.s32.totalorder %v3716_v51, 0  ;;  %v3750_v51 = vand.u32 63, %v6435_v50 }
 0x5e0   :  { %4605 = vmatpush1.msk.msra.mxu1 %vm3794_vm2, %v6405_v55  ;;  %vm3843_vm2 = vcmp.eq.s32.totalorder %v3779_v11, 0  ;;  %v3749_v11 = vand.u32 63, %v6436_v4 }
 0x5e1   :  { %4606 = vmatprep.subr.msk.mxu1 %vm3793_vm3, %v6405_v55  ;;  %vm3842_vm3 = vcmp.eq.s32.totalorder %v3778_v20, 0  ;;  %v3748_v20 = vand.u32 63, %v6437_v13 }
 0x5e2   :  { %4607 = vmatpush1.msk.msra.mxu1 %vm3792_vm4, %v6405_v55  ;;  %vm3841_vm4 = vcmp.eq.s32.totalorder %v3777_v25, 0 }
 0x5e3   :  { %4608 = vmatprep.subr.msk.mxu1 %vm3791_vm5, %v6405_v55  ;;  %vm3840_vm5 = vcmp.eq.s32.totalorder %v3776_v43, 0 }
 0x5e4   :  { %4609 = vmatpush1.msk.msra.mxu1 %vm3790_vm6, %v6405_v55  ;;  %vm3839_vm6 = vcmp.eq.s32.totalorder %v3775_v45, 0 }
 0x5e5   :  { %4610 = vmatprep.subr.msk.mxu1 %vm3789_vm7, %v6405_v55  ;;  %vm3838_vm7 = vcmp.eq.s32.totalorder %v3774_v27, 0 }
 0x5e6   :  { %4611 = vmatpush1.msk.msra.mxu1 %vm3788_vm8, %v6405_v55  ;;  %vm3837_vm8 = vcmp.eq.s32.totalorder %v3773_v44, 0 }
 0x5e7   :  { %4612 = vmatprep.subr.msk.mxu1 %vm3787_vm9, %v6405_v55  ;;  %vm3836_vm9 = vcmp.eq.s32.totalorder %v3772_v12, 0 }
 0x5e8   :  { %4613 = vmatpush1.msk.msra.mxu1 %vm3786_vm11, %v6405_v55  ;;  %vm3835_vm11 = vcmp.eq.s32.totalorder %v3771_v26, 0 }
 0x5e9   :  { %4614 = vmatprep.subr.msk.mxu1 %vm3785_vm12, %v6405_v55  ;;  %vm3834_vm12 = vcmp.eq.s32.totalorder %v3770_v29, 0 }
 0x5ea   :  { %4615 = vmatpush1.msk.msra.mxu1 %vm3784_vm13, %v6405_v55  ;;  %vm3833_vm13 = vcmp.eq.s32.totalorder %v3769_v24, 0 }
 0x5eb   :  { %4616 = vmatprep.subr.msk.mxu1 %vm3783_vm14, %v6405_v55  ;;  %vm3832_vm14 = vcmp.eq.s32.totalorder %v3768_v39, 0 }
 0x5ec   :  { %4617 = vmatpush1.msk.msra.mxu1 %vm3782_vm15, %v6405_v55  ;;  %vm3831_vm15 = vcmp.eq.s32.totalorder %v3767_v32, 0 }
 0x5ed   :  { %4618 = vmatprep.subr.msk.mxu1 %vm3781_vm0, %v6405_v55  ;;  %vm3830_vm0 = vcmp.eq.s32.totalorder %v3766_v59, 0 }
 0x5ee   :  { %4619 = vmatpush1.msk.msra.mxu1 %vm3780_vm1, %v6405_v55  ;;  %vm3829_vm1 = vcmp.eq.s32.totalorder %v3765_v38, 0 }
 0x5ef   :  { %4620 = vmatprep.subr.msk.mxu1 %vm3843_vm2, %v6405_v55  ;;  %vm3828_vm2 = vcmp.eq.s32.totalorder %v3764_v41, 0 }
 0x5f0   :  { %4621 = vmatpush2.msk.msra.mxu1 %vm3842_vm3, %v6405_v55  ;;  %vm3827_vm3 = vcmp.eq.s32.totalorder %v3763_v33, 0 }
 0x5f1   :  { %4622 = vmatprep.subr.msk.mxu1 %vm3841_vm4, %v6405_v55  ;;  %vm3826_vm4 = vcmp.eq.s32.totalorder %v3762_v60, 0 }
 0x5f2   :  { %4623 = vmatpush2.msk.msra.mxu1 %vm3840_vm5, %v6405_v55  ;;  %vm3825_vm5 = vcmp.eq.s32.totalorder %v3761_v62, 0 }
 0x5f3   :  { %4624 = vmatprep.subr.msk.mxu1 %vm3839_vm6, %v6405_v55  ;;  %vm3824_vm6 = vcmp.eq.s32.totalorder %v3760_v0, 0 }
 0x5f4   :  { %4625 = vmatpush2.msk.msra.mxu1 %vm3838_vm7, %v6405_v55  ;;  %vm3823_vm7 = vcmp.eq.s32.totalorder %v3759_v2, 0 }
 0x5f5   :  { %4626 = vmatprep.subr.msk.mxu1 %vm3837_vm8, %v6405_v55  ;;  %vm3822_vm8 = vcmp.eq.s32.totalorder %v3758_v16, 0 }
 0x5f6   :  { %4627 = vmatpush2.msk.msra.mxu1 %vm3836_vm9, %v6405_v55  ;;  %vm3821_vm9 = vcmp.eq.s32.totalorder %v3757_v18, 0 }
 0x5f7   :  { %4628 = vmatprep.subr.msk.mxu1 %vm3835_vm11, %v6405_v55  ;;  %vm3820_vm11 = vcmp.eq.s32.totalorder %v3756_v21, 0 }
 0x5f8   :  { %4629 = vmatpush2.msk.msra.mxu1 %vm3834_vm12, %v6405_v55  ;;  %vm3819_vm12 = vcmp.eq.s32.totalorder %v3755_v30, 0 }
 0x5f9   :  { %4630 = vmatprep.subr.msk.mxu1 %vm3833_vm13, %v6405_v55  ;;  %vm3818_vm13 = vcmp.eq.s32.totalorder %v3754_v35, 0 }
 0x5fa   :  { %4631 = vmatpush2.msk.msra.mxu1 %vm3832_vm14, %v6405_v55  ;;  %vm3817_vm14 = vcmp.eq.s32.totalorder %v3753_v46, 0  ;;  %v5287_v46 = vmov 0.0  }
 0x5fb   :  { %4632 = vmatprep.subr.msk.mxu1 %vm3831_vm15, %v6405_v55  ;;  %vm3816_vm15 = vcmp.eq.s32.totalorder %v3752_v52, 0 }
 0x5fc   :  { %4633 = vmatpush2.msk.msra.mxu1 %vm3830_vm0, %v6405_v55  ;;  %vm3815_vm0 = vcmp.eq.s32.totalorder %v3751_v58, 0 }
 0x5fd   :  { %4634 = vmatprep.subr.msk.mxu1 %vm3829_vm1, %v6405_v55  ;;  %vm3814_vm1 = vcmp.eq.s32.totalorder %v3750_v51, 0 }
 0x5fe   :  { %4635 = vmatpush2.msk.msra.mxu1 %vm3828_vm2, %v6405_v55  ;;  %vm3813_vm2 = vcmp.eq.s32.totalorder %v3749_v11, 0 }
 0x5ff   :  { %4636 = vmatprep.subr.msk.mxu1 %vm3827_vm3, %v6405_v55  ;;  %vm3812_vm3 = vcmp.eq.s32.totalorder %v3748_v20, 0 }
 0x600   :  { %4637 = vmatpush2.msk.msra.mxu1 %vm3826_vm4, %v6405_v55 }
 0x601   :  { %4638 = vmatprep.subr.msk.mxu1 %vm3825_vm5, %v6405_v55  ;;  %vm4054_vm5 = vcmask 64512  }
 0x602   :  { %4639 = vmatpush2.msk.msra.mxu1 %vm3824_vm6, %v6405_v55  ;;  %vm4129_vm6 = vcmask 1041408  }
 0x603   :  { %4640 = vmatprep.subr.msk.mxu1 %vm3823_vm7, %v6405_v55  ;;  %vm4143_vm7 = vcmask 1024  }
 0x604   :  { %4641 = vmatpush2.msk.msra.mxu1 %vm3822_vm8, %v6405_v55 }
 0x605   :  { %4642 = vmatprep.subr.msk.mxu1 %vm3821_vm9, %v6405_v55 }
 0x606   :  { %4643 = vmatpush2.msk.msra.mxu1 %vm3820_vm11, %v6405_v55 }
 0x607   :  { %4644 = vmatprep.subr.msk.mxu1 %vm3819_vm12, %v6405_v55 }
 0x608   :  { %4645 = vmatpush2.msk.msra.mxu1 %vm3818_vm13, %v6405_v55 }
 0x609   :  { %4646 = vmatprep.subr.msk.mxu1 %vm3817_vm14, %v6405_v55 }
 0x60a   :  { %4647 = vmatpush2.msk.msra.mxu1 %vm3816_vm15, %v6405_v55 }
 0x60b   :  { %4648 = vmatprep.subr.msk.mxu1 %vm3815_vm0, %v6405_v55 }
 0x60c   :  { %4649 = vmatpush2.msk.msra.mxu1 %vm3814_vm1, %v6405_v55 }
 0x60d   :  { %4650 = vmatprep.subr.msk.mxu1 %vm3813_vm2, %v6405_v55 }
 0x60e   :  { %4651 = vmatpush2.msk.msra.mxu1 %vm3812_vm3, %v6405_v55 }
 0x64f   :  { %v3558_v23 = vpop.f32.mrf.mxu1 }
 0x651   :  { %v3560_v25 = vpop.f32.mrf.mxu1 }
 0x653   :  { %v3562_v28 = vpop.f32.mrf.mxu1 }
 0x654   :  { %v4015_v28 = vld [vmem:[%s6316_s9] sm:$0x3] }
 0x655   :  { %v3563_v43 = vpop.f32.mrf.mxu1 }
 0x657   :  { %v3599_v57 = vpop.f32.mrf.mxu0 }
 0x658   :  { %v3600_v12 = vadd.f32 %v3599_v57, %v3558_v23 }
 0x659   :  { %v3601_v45 = vpop.f32.mrf.mxu0 }
 0x65a   :  { %v3602_v26 = vadd.f32 %v3601_v45, %v3560_v25  ;;  %v4029_v45 = vld [vmem:[%s6317_s10] sm:$0x3] }
 0x65b   :  { %v3603_v5 = vpop.f32.mrf.mxu0 }
 0x65d   :  { %v3604_v27 = vpop.f32.mrf.mxu0 }
 0x68f   :  { %v3640_v42 = vpop.f32.mrf.mxu1 }
 0x690   :  { %v3641_v40 = vadd.f32 %v3640_v42, %v3600_v12  ;;  %v4020_v42 = vrot.slane %v4015_v28, %v6099_v7 }
 0x691   :  { %v3642_v44 = vpop.f32.mrf.mxu1 }
 0x692   :  { %v3643_v6 = vadd.f32 %v3642_v44, %v3602_v26 }
 0x693   :  { %v3644_v10 = vpop.f32.mrf.mxu1 }
 0x694   :  { %v4024_v10 = vrot.slane %v4015_v28, %v6103_v48 }
 0x695   :  { %v3645_v9 = vpop.f32.mrf.mxu1 }
 0x697   :  { %v3681_v29 = vpop.f32.mrf.mxu0 }
 0x698   :  { %v3682_v24 = vadd.f32 %v3681_v29, %v3641_v40  ;;  %v4034_v40 = vrot.slane %v4029_v45, %v6099_v7 }
 0x699   :  { %v3683_v49 = vpop.f32.mrf.mxu0 }
 0x69a   :  { %v3688_v55 = vrot.slane %v3682_v24, 4  ;;  %v3700_v39 = vmul.f32 %v3682_v24, %v3682_v24  ;;  %v3684_v56 = vadd.f32 %v3683_v49, %v3643_v6  ;;  %v4038_v49 = vrot.slane %v4029_v45, %v6103_v48 }
 0x69b   :  { %v3685_v32 = vpop.f32.mrf.mxu0 }
 0x69c   :  { %v3689_v14 = vadd.f32 %v3688_v55, %v3682_v24  ;;  %v3702_v59 = vrot.slane %v3700_v39, 4  ;;  %v3694_v37 = vrot.slane %v3684_v56, 4  ;;  %v3701_v38 = vmul.f32 %v3684_v56, %v3684_v56 }
 0x69d   :  { %v3686_v15 = vpop.f32.mrf.mxu0 }
 0x69e   :  { %v3690_v41 = vrot.slane %v3689_v14, 2  ;;  %v3703_v34 = vadd.f32 %v3702_v59, %v3700_v39  ;;  %v3695_v33 = vadd.f32 %v3694_v37, %v3684_v56  ;;  %v3708_v8 = vrot.slane %v3701_v38, 4  ;;  %v4050_v59 = vld [vmem:[%s6318_s11 + $0x8] sm:$0xff] }
 0x6a0   :  { %v3696_v60 = vrot.slane %v3695_v33, 2  ;;  %v3709_v61 = vadd.f32 %v3708_v8, %v3701_v38  ;;  %v3704_v62 = vrot.slane %v3703_v34, 2  ;;  %v3691_v63 = vadd.f32 %v3690_v41, %v3689_v14 }
 0x6a2   :  { %v3697_v0 = vadd.f32 %v3696_v60, %v3695_v33  ;;  %v3710_v1 = vrot.slane %v3709_v61, 2  ;;  %v3705_v2 = vadd.f32 %v3704_v62, %v3703_v34  ;;  %v3692_v18 = vrot.slane %v3691_v63, 1 }
 0x6a4   :  { %v3698_v3 = vrot.slane %v3697_v0, 1  ;;  %v3711_v16 = vadd.f32 %v3710_v1, %v3709_v61  ;;  %v3706_v17 = vrot.slane %v3705_v2, 1  ;;  %v3693_v31 = vadd.f32 %v3692_v18, %v3691_v63  ;;  %v4653_v61 = vld [vmem:[#allocation2] ss:$0 sm:$0xff] }
 0x6a6   :  { %v3712_v19 = vrot.slane %v3711_v16, 1  ;;  %v3707_v21 = vadd.f32 %v3706_v17, %v3705_v2  ;;  %v3699_v22 = vadd.f32 %v3698_v3, %v3697_v0 }
 0x6a8   :  { %v3713_v30 = vadd.f32 %v3712_v19, %v3711_v16  ;;  %v3714_v36 = vsel %vm2114_vm10, %v3693_v31, %v3707_v21 }
 0x6aa   :  { %v3715_v35 = vsel %vm2114_vm10, %v3699_v22, %v3713_v30 }
 0x6ab   :  { %3972 = vmatprep.mubr.f32.mxu1 %v3715_v35 }
 0x6ac   :  { %3973 = vmatmul.mubr.f32.vlgmr.msra.gmra.mxu1 %v3714_v36 }
 0x6ad   :  { %4122 = vmatprep.mubr.f32.mxu1 %v5287_v46 }
 0x76c   :  { %v3974_v47 = vpop.f32.mrf.mxu1 }
 0x76d   :  { %v3979_v52 = vmul.f32 0.03125, %v3974_v47 }
 0x76e   :  { %v3976_v53 = vpop.f32.mrf.mxu1 }
 0x76f   :  { %v3981_v58 = vmul.f32 %v3979_v52, %v3979_v52  ;;  %v3980_v50 = vmul.f32 0.03125, %v3976_v53  ;;  %v3994_v54 = vrot.slane %v3979_v52, %v6099_v7 }
 0x771   :  { %v3985_v51 = vrot.slane %v3981_v58, 7  ;;  %v3982_v4 = vmul.f32 %v3980_v50, %v3980_v50  ;;  %v3998_v43 = vrot.slane %v3980_v50, %v6099_v7  ;;  %v3999_v5 = vsub.f32 %v3682_v24, %v3994_v54  ;;  %v4049_v7 = vld [vmem:[%s6318_s11] sm:$0xff] }
 0x773   :  { %v3989_v11 = vsub.f32 %v3979_v52, %v3985_v51  ;;  %v3986_v13 = vrot.slane %v3982_v4, 7  ;;  %v4000_v9 = vsub.f32 %v3684_v56, %v3998_v43 }
 0x775   :  { %v4001_v20 = vadd.f32 1e-05, %v3989_v11  ;;  %v3990_v23 = vsub.f32 %v3980_v50, %v3986_v13 }
 0x777   :  { %5233 = vrsqrt.f32 %v4001_v20  ;;  %v4002_v25 = vadd.f32 1e-05, %v3990_v23 }
 0x779   :  { %5235 = vrsqrt.f32 %v4002_v25 }
 0x784   :  { %v5234_v57 = vpop.eup %5233 }
 0x785   :  { %v4008_v27 = vrot.slane %v5234_v57, %v6103_v48 }
 0x786   :  { %v5236_v44 = vpop.eup %5235 }
 0x787   :  { %v4013_v12 = vmul.f32 %v4008_v27, %v3999_v5  ;;  %v4012_v26 = vrot.slane %v5236_v44, %v6103_v48  ;;  %v4053_v48 = vld [vmem:[%s6319_s12] sm:$0x3] }
 0x789   :  { %v4027_v29 = vmul.f32 %v4020_v42, %v4013_v12  ;;  %v4014_v6 = vmul.f32 %v4012_v26, %v4000_v9 }
 0x78b   :  { %v4028_v55 = vmul.f32 %v4024_v10, %v4014_v6  ;;  %v4041_v39 = vadd.f32 %v4034_v40, %v4027_v29 }
 0x78d   :  { %v4042_v24 = vadd.f32 %v4038_v49, %v4028_v55  ;;  %vm4043_vm10 = vcmp.ge.f32.partialorder %v4041_v39, 0.0  ;;  %v4045_v32 = vmul.f32 0.01, %v4041_v39 }
 0x78f   :  { %vm4044_vm4 = vcmp.ge.f32.partialorder %v4042_v24, 0.0  ;;  %v4046_v14 = vmul.f32 0.01, %v4042_v24  ;;  %v4047_v56 = vsel %vm4043_vm10, %v4041_v39, %v4045_v32 }
 0x790   :  { %v4051_v15 = vmul.f32 %v4049_v7, %v4047_v56 }
 0x791   :  { %v4048_v37 = vsel %vm4044_vm4, %v4042_v24, %v4046_v14 }
 0x792   :  { %v4052_v38 = vmul.f32 %v4050_v59, %v4048_v37 }
 0x794   :  { %4088 = vmatprep.subr.mxu1 %v4052_v38 }
 0x795   :  { %4089 = vmatpush1.msra.mxu1 %v4051_v15 }
 0x796   :  { %4652 = vmatmul.mubr.msk.f32.vlgmr.msra.gmra.mxu1 %vm4054_vm5, %v4053_v48 }
 0x856   :  { %v4124_v41 = vpop.f32.mrf.mxu1 }
 0x857   :  { %v4130_v33 = vsel %vm4129_vm6, %v4124_v41, 0.0 }
 0x858   :  { %v4126_v34 = vpop.f32.mrf.mxu1 }
 0x859   :  { %v4131_v8 = vsel %vm4129_vm6, %v4126_v34, 0.0 }
 0x85a   :  { %v4132_v60 = vadd.f32 %v4131_v8, %v4130_v33 }
 0x85c   :  { %4133 = vadd.xlane.f32.xlu0 %v4132_v60 }
 0x8e5   :  { %v4134_v62 = vpop.xlane.xlu0 %4133 }
 0x8e6   :  { %v4142_v63 = vadd.f32 %v4653_v61, %v4134_v62 }
 0x8e8   :  { %4144 = vst.msk [vmem:[%s6321_s14] sm:$0x3] %vm4143_vm7, %v4142_v63 }
 0x8e9   :  { %4149 = vsyncpa [#allocation4], 1 }
 0x8ea   :  { %4150 = vsyncpa [#allocation6], 1 }

</bundles_post_ra>
